<compile_context>
chip_gen: v7x
topology: tpu7x:2x2x1
jax: 0.10.0
libtpu: 0.0.40
codegen_flags: <defaults>
</compile_context>

<pallas_src>
import jax
import jax.numpy as jnp
from jax import lax
from jax.experimental import pallas as pl
from jax.experimental.pallas import tpu as pltpu


# ----------------------------- fused kernel --------------------------------

def _build_fused_kernel(T_rs, T_rt, T_src, T_tgt, R, B, H):
    """Builds the single fused forward kernel for static sequence dims."""
    Tk = T_rt - 1

    def mx(a, b):
        # MXU matmul: bf16 operands, f32 accumulation.
        return jnp.dot(a.astype(jnp.bfloat16), b.astype(jnp.bfloat16),
                       preferred_element_type=jnp.float32)

    def mx_qkt(q, k):
        # q @ k.T without materializing a transpose (contract on dim 1 of both).
        return lax.dot_general(q.astype(jnp.bfloat16), k.astype(jnp.bfloat16),
                               (((1,), (1,)), ((), ())),
                               preferred_element_type=jnp.float32)

    def run_rnn(x_flat, wx, wh, b, h0, hs_ref, T, nb):
        # tanh-RNN over T steps of an nb-wide batch, time-major flat rows
        # (row = t*nb + b).  Input projection hoisted to one GEMM; the time
        # loop is fully unrolled at trace time so every VMEM access is a
        # static slice and only h @ Wh is serialized.
        xp = mx(x_flat, wx) + b                       # (T*nb, H) f32
        h = h0
        for t in range(T):                            # static unroll (T <= 8)
            h = jnp.tanh(xp[t * nb:(t + 1) * nb, :] + mx(h, wh))
            hs_ref[pl.ds(t * nb, nb), :] = h
        return h

    def attend(q, keys, values, bias):
        # Masked softmax attention over flat (time*batch) rows.  `bias` is an
        # additive 0/-1e9 mask that enforces both the same-batch block
        # structure and the length mask, so one GEMM covers the whole batch.
        s = mx_qkt(q, keys) + bias                    # (Nq, Nk) f32
        m = jnp.max(s, axis=-1, keepdims=True)
        p = jnp.exp(s - m)
        denom = jnp.sum(p, axis=-1, keepdims=True)
        probs = p * pl.reciprocal(denom, approx=True)  # EUP, not a VPU divide
        return mx(probs, values), probs

    def kernel(x_rs, x_rt, x_src, x_tgt, mb_rd, mb_dr, mb_ds,
               wx_es, wh_es, b_es,
               wx_er, wh_er, b_er,
               wx_dr, wh_dr, b_dr, wo_dr_h, wo_dr_c, bo_dr,
               wx_d, wh_d, b_d, wo_d_h, wo_d_r, wo_d_s, bo_d,
               o_dec, o_attn, o_keys,
               hs_rs, hs_dr, hs_er, hs_src, hs_dec):
        # ------------------------------ encode ------------------------------
        # encoder_src over the stacked ref_src sequences (effective batch R).
        enc_ref_hidden = run_rnn(x_rs[...], wx_es[...], wh_es[...], b_es[...],
                                 jnp.zeros((R, H), jnp.float32), hs_rs, T_rs, R)

        # decoder_ref: RNN over ref_tgt (init = enc_ref_hidden) + attention
        # over ref_src_context; split-weight output projection (no concat).
        run_rnn(x_rt[...], wx_dr[...], wh_dr[...], b_dr[...],
                enc_ref_hidden, hs_dr, T_rt, R)
        ref_src_ctx = hs_rs[...]
        dr_states = hs_dr[...]
        ctx_dr, _ = attend(dr_states, ref_src_ctx, ref_src_ctx, mb_rd[...])
        ref_key_full = jnp.tanh(mx(dr_states, wo_dr_h[...])
                                + mx(ctx_dr, wo_dr_c[...]) + bo_dr[...])

        # encoder_ref over ref_tgt -> ref values.
        run_rnn(x_rt[...], wx_er[...], wh_er[...], b_er[...],
                jnp.zeros((R, H), jnp.float32), hs_er, T_rt, R)
        ref_val_full = hs_er[...]

        # ref_keys = ref_key[:-1], ref_values = ref_value[1:] (time-major flat).
        ref_keys = ref_key_full[:Tk * R, :]
        ref_vals = ref_val_full[R:, :]
        o_keys[...] = ref_keys

        # encoder_src over the actual source.
        enc_hidden = run_rnn(x_src[...], wx_es[...], wh_es[...], b_es[...],
                             jnp.zeros((B, H), jnp.float32), hs_src, T_src, B)
        src_ctx = hs_src[...]

        # ------------------------------ decode ------------------------------
        # init_decoder_state == enc_hidden.
        run_rnn(x_tgt[...], wx_d[...], wh_d[...], b_d[...],
                enc_hidden, hs_dec, T_tgt, B)
        dec_states = hs_dec[...]

        # key/value attention over refs (probs are a model output) and plain
        # attention over src_context (its probs are discarded -> never written).
        ctx_ref, probs = attend(dec_states, ref_keys, ref_vals, mb_dr[...])
        ctx_src, _ = attend(dec_states, src_ctx, src_ctx, mb_ds[...])
        o_attn[...] = probs

        # output projection with split weights ([h; ctx_ref; ctx_src] avoided).
        o_dec[...] = jnp.tanh(mx(dec_states, wo_d_h[...])
                              + mx(ctx_ref, wo_d_r[...])
                              + mx(ctx_src, wo_d_s[...]) + bo_d[...])

    return kernel


# ------------------------------- model glue ---------------------------------

def init_params(key, V, E, H):
    def w(k, shape, scale=0.1):
        return (scale * jax.random.normal(k, shape, jnp.float32)).astype(jnp.bfloat16)

    ks = jax.random.split(key, 16)
    return {
        "emb_enc": w(ks[0], (V, E)),
        "emb_dec": w(ks[1], (V, E)),
        # encoder_src (shared by src and every ref_src sequence)
        "wx_es": w(ks[2], (E, H)), "wh_es": w(ks[3], (H, H)),
        "b_es": jnp.zeros((1, H), jnp.float32),
        # encoder_ref (ref values)
        "wx_er": w(ks[4], (E, H)), "wh_er": w(ks[5], (H, H)),
        "b_er": jnp.zeros((1, H), jnp.float32),
        # decoder_ref (ref keys): RNN + split output projection
        "wx_dr": w(ks[6], (E, H)), "wh_dr": w(ks[7], (H, H)),
        "b_dr": jnp.zeros((1, H), jnp.float32),
        "wo_dr_h": w(ks[8], (H, H)), "wo_dr_c": w(ks[9], (H, H)),
        "bo_dr": jnp.zeros((1, H), jnp.float32),
        # decoder: RNN + split output projection over [h, ctx_ref, ctx_src]
        "wx_d": w(ks[10], (E, H)), "wh_d": w(ks[11], (H, H)),
        "b_d": jnp.zeros((1, H), jnp.float32),
        "wo_d_h": w(ks[12], (H, H)), "wo_d_r": w(ks[13], (H, H)),
        "wo_d_s": w(ks[14], (H, H)),
        "bo_d": jnp.zeros((1, H), jnp.float32),
    }


def ref_nmt_forward(params, src_inputs, tgt_inputs, ref_src_inputs,
                    ref_tgt_inputs, src_lengths, ref_src_lengths,
                    ref_tgt_lengths):
    """Mirrors refNMTModel.forward; returns (dec_outputs, attn, ref_keys)."""
    p = params
    E, H = p["wx_es"].shape
    T_src, B = src_inputs.shape
    T_tgt = tgt_inputs.shape[0]
    N = len(ref_src_inputs)
    T_rs = ref_src_inputs[0].shape[0]
    T_rt = ref_tgt_inputs[0].shape[0]
    R, Tk = N * B, T_rt - 1
    NEG = jnp.float32(-1e9)

    # Stack the per-ref lists into an effective batch of R = N*B independent
    # sequences so the whole per-ref encode is one fused batched RNN.
    rs_tok = jnp.stack(ref_src_inputs, axis=1).reshape(T_rs, R)   # (T, N*B)
    rt_tok = jnp.stack(ref_tgt_inputs, axis=1).reshape(T_rt, R)
    rs_len = jnp.stack(ref_src_lengths, axis=0).reshape(R)        # r = n*B + b
    rt_len = jnp.stack(ref_tgt_lengths, axis=0).reshape(R)

    # Embedding gathers (JAX glue), flattened time-major (row = t*batch + b).
    x_rs = jnp.take(p["emb_enc"], rs_tok, axis=0).reshape(T_rs * R, E)
    x_rt = jnp.take(p["emb_dec"], rt_tok, axis=0).reshape(T_rt * R, E)
    x_src = jnp.take(p["emb_enc"], src_inputs, axis=0).reshape(T_src * B, E)
    x_tgt = jnp.take(p["emb_dec"], tgt_inputs, axis=0).reshape(T_tgt * B, E)

    # Additive attention biases (0 where allowed, -1e9 elsewhere).
    # decoder_ref over ref_src_context: same (ref,batch) sequence, t < ref_src_len.
    q_r = jnp.tile(jnp.arange(R), T_rt)
    k_r = jnp.tile(jnp.arange(R), T_rs)
    k_t = jnp.repeat(jnp.arange(T_rs), R)
    ok = (q_r[:, None] == k_r[None, :]) & (k_t[None, :] < rs_len[k_r][None, :])
    mb_rd = jnp.where(ok, 0.0, NEG).astype(jnp.float32)

    # decoder over ref keys/values: same batch, t < ref_tgt_len - 1.
    q_b = jnp.tile(jnp.arange(B), T_tgt)
    kk_r = jnp.tile(jnp.arange(R), Tk)
    kk_t = jnp.repeat(jnp.arange(Tk), R)
    ok = (q_b[:, None] == (kk_r % B)[None, :]) & \
         (kk_t[None, :] < (rt_len[kk_r] - 1)[None, :])
    mb_dr = jnp.where(ok, 0.0, NEG).astype(jnp.float32)

    # decoder over src_context: same batch, t < src_len.
    ks_b = jnp.tile(jnp.arange(B), T_src)
    ks_t = jnp.repeat(jnp.arange(T_src), B)
    ok = (q_b[:, None] == ks_b[None, :]) & \
         (ks_t[None, :] < src_lengths[ks_b][None, :])
    mb_ds = jnp.where(ok, 0.0, NEG).astype(jnp.float32)

    kernel = _build_fused_kernel(T_rs, T_rt, T_src, T_tgt, R, B, H)
    o_dec, o_attn, o_keys = pl.pallas_call(
        kernel,
        # No grid: the whole working set (<1 MiB) stays resident in VMEM for
        # the entire forward pass -> single launch, no intermediate HBM traffic.
        out_shape=(
            jax.ShapeDtypeStruct((T_tgt * B, H), jnp.float32),
            jax.ShapeDtypeStruct((T_tgt * B, Tk * R), jnp.float32),
            jax.ShapeDtypeStruct((Tk * R, H), jnp.float32),
        ),
        scratch_shapes=[
            pltpu.VMEM((T_rs * R, H), jnp.float32),   # ref_src contexts
            pltpu.VMEM((T_rt * R, H), jnp.float32),   # decoder_ref states
            pltpu.VMEM((T_rt * R, H), jnp.float32),   # encoder_ref states
            pltpu.VMEM((T_src * B, H), jnp.float32),  # src contexts
            pltpu.VMEM((T_tgt * B, H), jnp.float32),  # decoder states
        ],
    )(x_rs, x_rt, x_src, x_tgt, mb_rd, mb_dr, mb_ds,
      p["wx_es"], p["wh_es"], p["b_es"],
      p["wx_er"], p["wh_er"], p["b_er"],
      p["wx_dr"], p["wh_dr"], p["b_dr"], p["wo_dr_h"], p["wo_dr_c"], p["bo_dr"],
      p["wx_d"], p["wh_d"], p["b_d"], p["wo_d_h"], p["wo_d_r"], p["wo_d_s"],
      p["bo_d"])

    # Restore the module's (time, batch, ...) output layouts (cheap glue).
    dec_outputs = o_dec.reshape(T_tgt, B, H)
    ref_keys = o_keys.reshape(Tk, N, B, H).transpose(1, 0, 2, 3)
    ref_keys = ref_keys.reshape(N * Tk, B, H)
    attn5 = o_attn.reshape(T_tgt, B, Tk, N, B)
    attn = jnp.einsum("tbknc,bc->tbkn", attn5, jnp.eye(B, dtype=o_attn.dtype))
    attn = attn.transpose(0, 1, 3, 2).reshape(T_tgt, B, N * Tk)
    return dec_outputs, attn, ref_keys


# ----------------------------------- main ------------------------------------

if __name__ == "__main__":
    V, E, H = 50, 32, 32
    B, N = 2, 2
    T_src, T_tgt, T_rs, T_rt = 8, 8, 6, 8
    Tk = T_rt - 1

    key = jax.random.PRNGKey(0)
    kp, *ks = jax.random.split(key, 12)
    params = init_params(kp, V, E, H)

    src_inputs = jax.random.randint(ks[0], (T_src, B), 0, V, dtype=jnp.int32)
    tgt_inputs = jax.random.randint(ks[1], (T_tgt, B), 0, V, dtype=jnp.int32)
    ref_src_inputs = [jax.random.randint(ks[2 + i], (T_rs, B), 0, V, dtype=jnp.int32)
                      for i in range(N)]
    ref_tgt_inputs = [jax.random.randint(ks[4 + i], (T_rt, B), 0, V, dtype=jnp.int32)
                      for i in range(N)]
    src_lengths = jnp.array([T_src, T_src - 2], dtype=jnp.int32)
    ref_src_lengths = [jnp.array([T_rs, T_rs - 1], jnp.int32),
                       jnp.array([T_rs - 2, T_rs], jnp.int32)]
    ref_tgt_lengths = [jnp.array([T_rt, T_rt - 3], jnp.int32),
                       jnp.array([T_rt - 1, T_rt], jnp.int32)]

    fwd = jax.jit(ref_nmt_forward)
    dec_outputs, attn, ref_keys = fwd(
        params, src_inputs, tgt_inputs, ref_src_inputs, ref_tgt_inputs,
        src_lengths, ref_src_lengths, ref_tgt_lengths)
    jax.block_until_ready((dec_outputs, attn, ref_keys))

    assert dec_outputs.shape == (T_tgt, B, H)
    assert attn.shape == (T_tgt, B, N * Tk)
    assert ref_keys.shape == (N * Tk, B, H)
    assert bool(jnp.isfinite(dec_outputs).all())
    assert bool(jnp.isfinite(attn).all())
    assert bool(jnp.isfinite(ref_keys).all())
    # Attention rows are proper (masked) distributions.
    assert bool(jnp.allclose(attn.sum(-1), 1.0, atol=1e-2))
    print("KERNEL_OK")
</pallas_src>

<mosaic_0001>
module attributes {stable_mosaic.version = 11 : i64} {
  func.func @kernel(%arg0: memref<24x32xbf16, #tpu.memory_space<vmem>>, %arg1: memref<32x32xbf16, #tpu.memory_space<vmem>>, %arg2: memref<16x32xbf16, #tpu.memory_space<vmem>>, %arg3: memref<16x32xbf16, #tpu.memory_space<vmem>>, %arg4: memref<32x24xf32, #tpu.memory_space<vmem>>, %arg5: memref<16x28xf32, #tpu.memory_space<vmem>>, %arg6: memref<16x16xf32, #tpu.memory_space<vmem>>, %arg7: memref<32x32xbf16, #tpu.memory_space<vmem>>, %arg8: memref<32x32xbf16, #tpu.memory_space<vmem>>, %arg9: memref<1x32xf32, #tpu.memory_space<vmem>>, %arg10: memref<32x32xbf16, #tpu.memory_space<vmem>>, %arg11: memref<32x32xbf16, #tpu.memory_space<vmem>>, %arg12: memref<1x32xf32, #tpu.memory_space<vmem>>, %arg13: memref<32x32xbf16, #tpu.memory_space<vmem>>, %arg14: memref<32x32xbf16, #tpu.memory_space<vmem>>, %arg15: memref<1x32xf32, #tpu.memory_space<vmem>>, %arg16: memref<32x32xbf16, #tpu.memory_space<vmem>>, %arg17: memref<32x32xbf16, #tpu.memory_space<vmem>>, %arg18: memref<1x32xf32, #tpu.memory_space<vmem>>, %arg19: memref<32x32xbf16, #tpu.memory_space<vmem>>, %arg20: memref<32x32xbf16, #tpu.memory_space<vmem>>, %arg21: memref<1x32xf32, #tpu.memory_space<vmem>>, %arg22: memref<32x32xbf16, #tpu.memory_space<vmem>>, %arg23: memref<32x32xbf16, #tpu.memory_space<vmem>>, %arg24: memref<32x32xbf16, #tpu.memory_space<vmem>>, %arg25: memref<1x32xf32, #tpu.memory_space<vmem>>, %arg26: memref<16x32xf32, #tpu.memory_space<vmem>>, %arg27: memref<16x28xf32, #tpu.memory_space<vmem>>, %arg28: memref<28x32xf32, #tpu.memory_space<vmem>>, %arg29: memref<24x32xf32, #tpu.memory_space<vmem>>, %arg30: memref<32x32xf32, #tpu.memory_space<vmem>>, %arg31: memref<32x32xf32, #tpu.memory_space<vmem>>, %arg32: memref<16x32xf32, #tpu.memory_space<vmem>>, %arg33: memref<16x32xf32, #tpu.memory_space<vmem>>) attributes {dimension_semantics = [], scalar_prefetch = 0 : i64, scratch_operands = 5 : i64, tpu.core_type = #tpu.core_type<tc>} {
    %c0 = arith.constant 0 : index
    %c0_0 = arith.constant 0 : index
    %0 = vector.load %arg0[%c0, %c0_0] : memref<24x32xbf16, #tpu.memory_space<vmem>>, vector<24x32xbf16>
    %c0_1 = arith.constant 0 : index
    %c0_2 = arith.constant 0 : index
    %1 = vector.load %arg7[%c0_1, %c0_2] : memref<32x32xbf16, #tpu.memory_space<vmem>>, vector<32x32xbf16>
    %c0_3 = arith.constant 0 : index
    %c0_4 = arith.constant 0 : index
    %2 = vector.load %arg8[%c0_3, %c0_4] : memref<32x32xbf16, #tpu.memory_space<vmem>>, vector<32x32xbf16>
    %c0_5 = arith.constant 0 : index
    %c0_6 = arith.constant 0 : index
    %3 = vector.load %arg9[%c0_5, %c0_6] : memref<1x32xf32, #tpu.memory_space<vmem>>, vector<1x32xf32>
    %cst = arith.constant 0.000000e+00 : f32
    %4 = vector.broadcast %cst : f32 to vector<4x32xf32>
    %cst_7 = arith.constant dense<0.000000e+00> : vector<24x32xf32>
    %5 = tpu.matmul %0, %1, %cst_7 {dimension_numbers = #tpu.dot_dimension_numbers<[1], [0], [0], [1], [0, 0, 1, 1], [], []>} : vector<24x32xbf16>, vector<32x32xbf16>, vector<24x32xf32> -> vector<24x32xf32>
    %6 = vector.broadcast %3 : vector<1x32xf32> to vector<24x32xf32>
    %7 = arith.addf %5, %6 : vector<24x32xf32>
    %8 = vector.extract_strided_slice %7 {offsets = [0, 0], sizes = [4, 32], strides = [1, 1]} : vector<24x32xf32> to vector<4x32xf32>
    %9 = arith.truncf %4 : vector<4x32xf32> to vector<4x32xbf16>
    %cst_8 = arith.constant dense<0.000000e+00> : vector<4x32xf32>
    %10 = tpu.matmul %9, %2, %cst_8 {dimension_numbers = #tpu.dot_dimension_numbers<[1], [0], [0], [1], [0, 0, 1, 1], [], []>} : vector<4x32xbf16>, vector<32x32xbf16>, vector<4x32xf32> -> vector<4x32xf32>
    %11 = arith.addf %8, %10 : vector<4x32xf32>
    %12 = math.tanh %11 : vector<4x32xf32>
    %c0_9 = arith.constant 0 : index
    %c0_10 = arith.constant 0 : index
    %13 = vector.load %arg29[%c0_9, %c0_10] : memref<24x32xf32, #tpu.memory_space<vmem>>, vector<4x32xf32>
    tpu.vector_store %arg29[%c0_9, %c0_10], %12 {strides = array<i32>} : memref<24x32xf32, #tpu.memory_space<vmem>>, vector<4x32xf32>,
    %14 = vector.extract_strided_slice %7 {offsets = [4, 0], sizes = [4, 32], strides = [1, 1]} : vector<24x32xf32> to vector<4x32xf32>
    %15 = arith.truncf %12 : vector<4x32xf32> to vector<4x32xbf16>
    %cst_11 = arith.constant dense<0.000000e+00> : vector<4x32xf32>
    %16 = tpu.matmul %15, %2, %cst_11 {dimension_numbers = #tpu.dot_dimension_numbers<[1], [0], [0], [1], [0, 0, 1, 1], [], []>} : vector<4x32xbf16>, vector<32x32xbf16>, vector<4x32xf32> -> vector<4x32xf32>
    %17 = arith.addf %14, %16 : vector<4x32xf32>
    %18 = math.tanh %17 : vector<4x32xf32>
    %c4 = arith.constant 4 : index
    %c0_12 = arith.constant 0 : index
    %19 = vector.load %arg29[%c4, %c0_12] : memref<24x32xf32, #tpu.memory_space<vmem>>, vector<4x32xf32>
    tpu.vector_store %arg29[%c4, %c0_12], %18 {strides = array<i32>} : memref<24x32xf32, #tpu.memory_space<vmem>>, vector<4x32xf32>,
    %20 = vector.extract_strided_slice %7 {offsets = [8, 0], sizes = [4, 32], strides = [1, 1]} : vector<24x32xf32> to vector<4x32xf32>
    %21 = arith.truncf %18 : vector<4x32xf32> to vector<4x32xbf16>
    %cst_13 = arith.constant dense<0.000000e+00> : vector<4x32xf32>
    %22 = tpu.matmul %21, %2, %cst_13 {dimension_numbers = #tpu.dot_dimension_numbers<[1], [0], [0], [1], [0, 0, 1, 1], [], []>} : vector<4x32xbf16>, vector<32x32xbf16>, vector<4x32xf32> -> vector<4x32xf32>
    %23 = arith.addf %20, %22 : vector<4x32xf32>
    %24 = math.tanh %23 : vector<4x32xf32>
    %c8 = arith.constant 8 : index
    %c0_14 = arith.constant 0 : index
    %25 = vector.load %arg29[%c8, %c0_14] : memref<24x32xf32, #tpu.memory_space<vmem>>, vector<4x32xf32>
    tpu.vector_store %arg29[%c8, %c0_14], %24 {strides = array<i32>} : memref<24x32xf32, #tpu.memory_space<vmem>>, vector<4x32xf32>,
    %26 = vector.extract_strided_slice %7 {offsets = [12, 0], sizes = [4, 32], strides = [1, 1]} : vector<24x32xf32> to vector<4x32xf32>
    %27 = arith.truncf %24 : vector<4x32xf32> to vector<4x32xbf16>
    %cst_15 = arith.constant dense<0.000000e+00> : vector<4x32xf32>
    %28 = tpu.matmul %27, %2, %cst_15 {dimension_numbers = #tpu.dot_dimension_numbers<[1], [0], [0], [1], [0, 0, 1, 1], [], []>} : vector<4x32xbf16>, vector<32x32xbf16>, vector<4x32xf32> -> vector<4x32xf32>
    %29 = arith.addf %26, %28 : vector<4x32xf32>
    %30 = math.tanh %29 : vector<4x32xf32>
    %c12 = arith.constant 12 : index
    %c0_16 = arith.constant 0 : index
    %31 = vector.load %arg29[%c12, %c0_16] : memref<24x32xf32, #tpu.memory_space<vmem>>, vector<4x32xf32>
    tpu.vector_store %arg29[%c12, %c0_16], %30 {strides = array<i32>} : memref<24x32xf32, #tpu.memory_space<vmem>>, vector<4x32xf32>,
    %32 = vector.extract_strided_slice %7 {offsets = [16, 0], sizes = [4, 32], strides = [1, 1]} : vector<24x32xf32> to vector<4x32xf32>
    %33 = arith.truncf %30 : vector<4x32xf32> to vector<4x32xbf16>
    %cst_17 = arith.constant dense<0.000000e+00> : vector<4x32xf32>
    %34 = tpu.matmul %33, %2, %cst_17 {dimension_numbers = #tpu.dot_dimension_numbers<[1], [0], [0], [1], [0, 0, 1, 1], [], []>} : vector<4x32xbf16>, vector<32x32xbf16>, vector<4x32xf32> -> vector<4x32xf32>
    %35 = arith.addf %32, %34 : vector<4x32xf32>
    %36 = math.tanh %35 : vector<4x32xf32>
    %c16 = arith.constant 16 : index
    %c0_18 = arith.constant 0 : index
    %37 = vector.load %arg29[%c16, %c0_18] : memref<24x32xf32, #tpu.memory_space<vmem>>, vector<4x32xf32>
    tpu.vector_store %arg29[%c16, %c0_18], %36 {strides = array<i32>} : memref<24x32xf32, #tpu.memory_space<vmem>>, vector<4x32xf32>,
    %38 = vector.extract_strided_slice %7 {offsets = [20, 0], sizes = [4, 32], strides = [1, 1]} : vector<24x32xf32> to vector<4x32xf32>
    %39 = arith.truncf %36 : vector<4x32xf32> to vector<4x32xbf16>
    %cst_19 = arith.constant dense<0.000000e+00> : vector<4x32xf32>
    %40 = tpu.matmul %39, %2, %cst_19 {dimension_numbers = #tpu.dot_dimension_numbers<[1], [0], [0], [1], [0, 0, 1, 1], [], []>} : vector<4x32xbf16>, vector<32x32xbf16>, vector<4x32xf32> -> vector<4x32xf32>
    %41 = arith.addf %38, %40 : vector<4x32xf32>
    %42 = math.tanh %41 : vector<4x32xf32>
    %c20 = arith.constant 20 : index
    %c0_20 = arith.constant 0 : index
    %43 = vector.load %arg29[%c20, %c0_20] : memref<24x32xf32, #tpu.memory_space<vmem>>, vector<4x32xf32>
    tpu.vector_store %arg29[%c20, %c0_20], %42 {strides = array<i32>} : memref<24x32xf32, #tpu.memory_space<vmem>>, vector<4x32xf32>,
    %c0_21 = arith.constant 0 : index
    %c0_22 = arith.constant 0 : index
    %44 = vector.load %arg1[%c0_21, %c0_22] : memref<32x32xbf16, #tpu.memory_space<vmem>>, vector<32x32xbf16>
    %c0_23 = arith.constant 0 : index
    %c0_24 = arith.constant 0 : index
    %45 = vector.load %arg13[%c0_23, %c0_24] : memref<32x32xbf16, #tpu.memory_space<vmem>>, vector<32x32xbf16>
    %c0_25 = arith.constant 0 : index
    %c0_26 = arith.constant 0 : index
    %46 = vector.load %arg14[%c0_25, %c0_26] : memref<32x32xbf16, #tpu.memory_space<vmem>>, vector<32x32xbf16>
    %c0_27 = arith.constant 0 : index
    %c0_28 = arith.constant 0 : index
    %47 = vector.load %arg15[%c0_27, %c0_28] : memref<1x32xf32, #tpu.memory_space<vmem>>, vector<1x32xf32>
    %cst_29 = arith.constant dense<0.000000e+00> : vector<32x32xf32>
    %48 = tpu.matmul %44, %45, %cst_29 {dimension_numbers = #tpu.dot_dimension_numbers<[1], [0], [0], [1], [0, 0, 1, 1], [], []>} : vector<32x32xbf16>, vector<32x32xbf16>, vector<32x32xf32> -> vector<32x32xf32>
    %49 = vector.broadcast %47 : vector<1x32xf32> to vector<32x32xf32>
    %50 = arith.addf %48, %49 : vector<32x32xf32>
    %51 = vector.extract_strided_slice %50 {offsets = [0, 0], sizes = [4, 32], strides = [1, 1]} : vector<32x32xf32> to vector<4x32xf32>
    %52 = arith.truncf %42 : vector<4x32xf32> to vector<4x32xbf16>
    %cst_30 = arith.constant dense<0.000000e+00> : vector<4x32xf32>
    %53 = tpu.matmul %52, %46, %cst_30 {dimension_numbers = #tpu.dot_dimension_numbers<[1], [0], [0], [1], [0, 0, 1, 1], [], []>} : vector<4x32xbf16>, vector<32x32xbf16>, vector<4x32xf32> -> vector<4x32xf32>
    %54 = arith.addf %51, %53 : vector<4x32xf32>
    %55 = math.tanh %54 : vector<4x32xf32>
    %c0_31 = arith.constant 0 : index
    %c0_32 = arith.constant 0 : index
    %56 = vector.load %arg30[%c0_31, %c0_32] : memref<32x32xf32, #tpu.memory_space<vmem>>, vector<4x32xf32>
    tpu.vector_store %arg30[%c0_31, %c0_32], %55 {strides = array<i32>} : memref<32x32xf32, #tpu.memory_space<vmem>>, vector<4x32xf32>,
    %57 = vector.extract_strided_slice %50 {offsets = [4, 0], sizes = [4, 32], strides = [1, 1]} : vector<32x32xf32> to vector<4x32xf32>
    %58 = arith.truncf %55 : vector<4x32xf32> to vector<4x32xbf16>
    %cst_33 = arith.constant dense<0.000000e+00> : vector<4x32xf32>
    %59 = tpu.matmul %58, %46, %cst_33 {dimension_numbers = #tpu.dot_dimension_numbers<[1], [0], [0], [1], [0, 0, 1, 1], [], []>} : vector<4x32xbf16>, vector<32x32xbf16>, vector<4x32xf32> -> vector<4x32xf32>
    %60 = arith.addf %57, %59 : vector<4x32xf32>
    %61 = math.tanh %60 : vector<4x32xf32>
    %c4_34 = arith.constant 4 : index
    %c0_35 = arith.constant 0 : index
    %62 = vector.load %arg30[%c4_34, %c0_35] : memref<32x32xf32, #tpu.memory_space<vmem>>, vector<4x32xf32>
    tpu.vector_store %arg30[%c4_34, %c0_35], %61 {strides = array<i32>} : memref<32x32xf32, #tpu.memory_space<vmem>>, vector<4x32xf32>,
    %63 = vector.extract_strided_slice %50 {offsets = [8, 0], sizes = [4, 32], strides = [1, 1]} : vector<32x32xf32> to vector<4x32xf32>
    %64 = arith.truncf %61 : vector<4x32xf32> to vector<4x32xbf16>
    %cst_36 = arith.constant dense<0.000000e+00> : vector<4x32xf32>
    %65 = tpu.matmul %64, %46, %cst_36 {dimension_numbers = #tpu.dot_dimension_numbers<[1], [0], [0], [1], [0, 0, 1, 1], [], []>} : vector<4x32xbf16>, vector<32x32xbf16>, vector<4x32xf32> -> vector<4x32xf32>
    %66 = arith.addf %63, %65 : vector<4x32xf32>
    %67 = math.tanh %66 : vector<4x32xf32>
    %c8_37 = arith.constant 8 : index
    %c0_38 = arith.constant 0 : index
    %68 = vector.load %arg30[%c8_37, %c0_38] : memref<32x32xf32, #tpu.memory_space<vmem>>, vector<4x32xf32>
    tpu.vector_store %arg30[%c8_37, %c0_38], %67 {strides = array<i32>} : memref<32x32xf32, #tpu.memory_space<vmem>>, vector<4x32xf32>,
    %69 = vector.extract_strided_slice %50 {offsets = [12, 0], sizes = [4, 32], strides = [1, 1]} : vector<32x32xf32> to vector<4x32xf32>
    %70 = arith.truncf %67 : vector<4x32xf32> to vector<4x32xbf16>
    %cst_39 = arith.constant dense<0.000000e+00> : vector<4x32xf32>
    %71 = tpu.matmul %70, %46, %cst_39 {dimension_numbers = #tpu.dot_dimension_numbers<[1], [0], [0], [1], [0, 0, 1, 1], [], []>} : vector<4x32xbf16>, vector<32x32xbf16>, vector<4x32xf32> -> vector<4x32xf32>
    %72 = arith.addf %69, %71 : vector<4x32xf32>
    %73 = math.tanh %72 : vector<4x32xf32>
    %c12_40 = arith.constant 12 : index
    %c0_41 = arith.constant 0 : index
    %74 = vector.load %arg30[%c12_40, %c0_41] : memref<32x32xf32, #tpu.memory_space<vmem>>, vector<4x32xf32>
    tpu.vector_store %arg30[%c12_40, %c0_41], %73 {strides = array<i32>} : memref<32x32xf32, #tpu.memory_space<vmem>>, vector<4x32xf32>,
    %75 = vector.extract_strided_slice %50 {offsets = [16, 0], sizes = [4, 32], strides = [1, 1]} : vector<32x32xf32> to vector<4x32xf32>
    %76 = arith.truncf %73 : vector<4x32xf32> to vector<4x32xbf16>
    %cst_42 = arith.constant dense<0.000000e+00> : vector<4x32xf32>
    %77 = tpu.matmul %76, %46, %cst_42 {dimension_numbers = #tpu.dot_dimension_numbers<[1], [0], [0], [1], [0, 0, 1, 1], [], []>} : vector<4x32xbf16>, vector<32x32xbf16>, vector<4x32xf32> -> vector<4x32xf32>
    %78 = arith.addf %75, %77 : vector<4x32xf32>
    %79 = math.tanh %78 : vector<4x32xf32>
    %c16_43 = arith.constant 16 : index
    %c0_44 = arith.constant 0 : index
    %80 = vector.load %arg30[%c16_43, %c0_44] : memref<32x32xf32, #tpu.memory_space<vmem>>, vector<4x32xf32>
    tpu.vector_store %arg30[%c16_43, %c0_44], %79 {strides = array<i32>} : memref<32x32xf32, #tpu.memory_space<vmem>>, vector<4x32xf32>,
    %81 = vector.extract_strided_slice %50 {offsets = [20, 0], sizes = [4, 32], strides = [1, 1]} : vector<32x32xf32> to vector<4x32xf32>
    %82 = arith.truncf %79 : vector<4x32xf32> to vector<4x32xbf16>
    %cst_45 = arith.constant dense<0.000000e+00> : vector<4x32xf32>
    %83 = tpu.matmul %82, %46, %cst_45 {dimension_numbers = #tpu.dot_dimension_numbers<[1], [0], [0], [1], [0, 0, 1, 1], [], []>} : vector<4x32xbf16>, vector<32x32xbf16>, vector<4x32xf32> -> vector<4x32xf32>
    %84 = arith.addf %81, %83 : vector<4x32xf32>
    %85 = math.tanh %84 : vector<4x32xf32>
    %c20_46 = arith.constant 20 : index
    %c0_47 = arith.constant 0 : index
    %86 = vector.load %arg30[%c20_46, %c0_47] : memref<32x32xf32, #tpu.memory_space<vmem>>, vector<4x32xf32>
    tpu.vector_store %arg30[%c20_46, %c0_47], %85 {strides = array<i32>} : memref<32x32xf32, #tpu.memory_space<vmem>>, vector<4x32xf32>,
    %87 = vector.extract_strided_slice %50 {offsets = [24, 0], sizes = [4, 32], strides = [1, 1]} : vector<32x32xf32> to vector<4x32xf32>
    %88 = arith.truncf %85 : vector<4x32xf32> to vector<4x32xbf16>
    %cst_48 = arith.constant dense<0.000000e+00> : vector<4x32xf32>
    %89 = tpu.matmul %88, %46, %cst_48 {dimension_numbers = #tpu.dot_dimension_numbers<[1], [0], [0], [1], [0, 0, 1, 1], [], []>} : vector<4x32xbf16>, vector<32x32xbf16>, vector<4x32xf32> -> vector<4x32xf32>
    %90 = arith.addf %87, %89 : vector<4x32xf32>
    %91 = math.tanh %90 : vector<4x32xf32>
    %c24 = arith.constant 24 : index
    %c0_49 = arith.constant 0 : index
    %92 = vector.load %arg30[%c24, %c0_49] : memref<32x32xf32, #tpu.memory_space<vmem>>, vector<4x32xf32>
    tpu.vector_store %arg30[%c24, %c0_49], %91 {strides = array<i32>} : memref<32x32xf32, #tpu.memory_space<vmem>>, vector<4x32xf32>,
    %93 = vector.extract_strided_slice %50 {offsets = [28, 0], sizes = [4, 32], strides = [1, 1]} : vector<32x32xf32> to vector<4x32xf32>
    %94 = arith.truncf %91 : vector<4x32xf32> to vector<4x32xbf16>
    %cst_50 = arith.constant dense<0.000000e+00> : vector<4x32xf32>
    %95 = tpu.matmul %94, %46, %cst_50 {dimension_numbers = #tpu.dot_dimension_numbers<[1], [0], [0], [1], [0, 0, 1, 1], [], []>} : vector<4x32xbf16>, vector<32x32xbf16>, vector<4x32xf32> -> vector<4x32xf32>
    %96 = arith.addf %93, %95 : vector<4x32xf32>
    %97 = math.tanh %96 : vector<4x32xf32>
    %c28 = arith.constant 28 : index
    %c0_51 = arith.constant 0 : index
    %98 = vector.load %arg30[%c28, %c0_51] : memref<32x32xf32, #tpu.memory_space<vmem>>, vector<4x32xf32>
    tpu.vector_store %arg30[%c28, %c0_51], %97 {strides = array<i32>} : memref<32x32xf32, #tpu.memory_space<vmem>>, vector<4x32xf32>,
    %c0_52 = arith.constant 0 : index
    %c0_53 = arith.constant 0 : index
    %99 = vector.load %arg29[%c0_52, %c0_53] : memref<24x32xf32, #tpu.memory_space<vmem>>, vector<24x32xf32>
    %c0_54 = arith.constant 0 : index
    %c0_55 = arith.constant 0 : index
    %100 = vector.load %arg30[%c0_54, %c0_55] : memref<32x32xf32, #tpu.memory_space<vmem>>, vector<32x32xf32>
    %c0_56 = arith.constant 0 : index
    %c0_57 = arith.constant 0 : index
    %101 = vector.load %arg4[%c0_56, %c0_57] : memref<32x24xf32, #tpu.memory_space<vmem>>, vector<32x24xf32>
    %102 = arith.truncf %100 : vector<32x32xf32> to vector<32x32xbf16>
    %103 = arith.truncf %99 : vector<24x32xf32> to vector<24x32xbf16>
    %cst_58 = arith.constant dense<0.000000e+00> : vector<32x24xf32>
    %104 = tpu.matmul %102, %103, %cst_58 {dimension_numbers = #tpu.dot_dimension_numbers<[1], [1], [0], [0], [0, 0, 1, 0], [], []>} : vector<32x32xbf16>, vector<24x32xbf16>, vector<32x24xf32> -> vector<32x24xf32>
    %105 = arith.addf %104, %101 : vector<32x24xf32>
    %cst_59 = arith.constant dense<0xFF800000> : vector<32xf32>
    %106 = vector.multi_reduction <maximumf>, %105, %cst_59 [1] : vector<32x24xf32> to vector<32xf32>
    %107 = vector.shape_cast %106 : vector<32xf32> to vector<32x1xf32>
    %108 = vector.broadcast %107 : vector<32x1xf32> to vector<32x24xf32>
    %109 = arith.subf %105, %108 : vector<32x24xf32>
    %110 = math.exp %109 : vector<32x24xf32>
    %cst_60 = arith.constant dense<0.000000e+00> : vector<32xf32>
    %111 = vector.multi_reduction <add>, %110, %cst_60 [1] : vector<32x24xf32> to vector<32xf32>
    %112 = vector.shape_cast %111 : vector<32xf32> to vector<32x1xf32>
    %113 = tpu.reciprocal %112 {approx = true} : vector<32x1xf32> -> vector<32x1xf32>
    %114 = vector.broadcast %113 : vector<32x1xf32> to vector<32x24xf32>
    %115 = arith.mulf %110, %114 : vector<32x24xf32>
    %116 = arith.truncf %115 : vector<32x24xf32> to vector<32x24xbf16>
    %117 = arith.truncf %99 : vector<24x32xf32> to vector<24x32xbf16>
    %cst_61 = arith.constant dense<0.000000e+00> : vector<32x32xf32>
    %118 = tpu.matmul %116, %117, %cst_61 {dimension_numbers = #tpu.dot_dimension_numbers<[1], [0], [0], [1], [0, 0, 1, 1], [], []>} : vector<32x24xbf16>, vector<24x32xbf16>, vector<32x32xf32> -> vector<32x32xf32>
    %c0_62 = arith.constant 0 : index
    %c0_63 = arith.constant 0 : index
    %119 = vector.load %arg16[%c0_62, %c0_63] : memref<32x32xbf16, #tpu.memory_space<vmem>>, vector<32x32xbf16>
    %120 = arith.truncf %100 : vector<32x32xf32> to vector<32x32xbf16>
    %cst_64 = arith.constant dense<0.000000e+00> : vector<32x32xf32>
    %121 = tpu.matmul %120, %119, %cst_64 {dimension_numbers = #tpu.dot_dimension_numbers<[1], [0], [0], [1], [0, 0, 1, 1], [], []>} : vector<32x32xbf16>, vector<32x32xbf16>, vector<32x32xf32> -> vector<32x32xf32>
    %c0_65 = arith.constant 0 : index
    %c0_66 = arith.constant 0 : index
    %122 = vector.load %arg17[%c0_65, %c0_66] : memref<32x32xbf16, #tpu.memory_space<vmem>>, vector<32x32xbf16>
    %123 = arith.truncf %118 : vector<32x32xf32> to vector<32x32xbf16>
    %cst_67 = arith.constant dense<0.000000e+00> : vector<32x32xf32>
    %124 = tpu.matmul %123, %122, %cst_67 {dimension_numbers = #tpu.dot_dimension_numbers<[1], [0], [0], [1], [0, 0, 1, 1], [], []>} : vector<32x32xbf16>, vector<32x32xbf16>, vector<32x32xf32> -> vector<32x32xf32>
    %125 = arith.addf %121, %124 : vector<32x32xf32>
    %c0_68 = arith.constant 0 : index
    %c0_69 = arith.constant 0 : index
    %126 = vector.load %arg18[%c0_68, %c0_69] : memref<1x32xf32, #tpu.memory_space<vmem>>, vector<1x32xf32>
    %127 = vector.broadcast %126 : vector<1x32xf32> to vector<32x32xf32>
    %128 = arith.addf %125, %127 : vector<32x32xf32>
    %129 = math.tanh %128 : vector<32x32xf32>
    %c0_70 = arith.constant 0 : index
    %c0_71 = arith.constant 0 : index
    %130 = vector.load %arg1[%c0_70, %c0_71] : memref<32x32xbf16, #tpu.memory_space<vmem>>, vector<32x32xbf16>
    %c0_72 = arith.constant 0 : index
    %c0_73 = arith.constant 0 : index
    %131 = vector.load %arg10[%c0_72, %c0_73] : memref<32x32xbf16, #tpu.memory_space<vmem>>, vector<32x32xbf16>
    %c0_74 = arith.constant 0 : index
    %c0_75 = arith.constant 0 : index
    %132 = vector.load %arg11[%c0_74, %c0_75] : memref<32x32xbf16, #tpu.memory_space<vmem>>, vector<32x32xbf16>
    %c0_76 = arith.constant 0 : index
    %c0_77 = arith.constant 0 : index
    %133 = vector.load %arg12[%c0_76, %c0_77] : memref<1x32xf32, #tpu.memory_space<vmem>>, vector<1x32xf32>
    %cst_78 = arith.constant 0.000000e+00 : f32
    %134 = vector.broadcast %cst_78 : f32 to vector<4x32xf32>
    %cst_79 = arith.constant dense<0.000000e+00> : vector<32x32xf32>
    %135 = tpu.matmul %130, %131, %cst_79 {dimension_numbers = #tpu.dot_dimension_numbers<[1], [0], [0], [1], [0, 0, 1, 1], [], []>} : vector<32x32xbf16>, vector<32x32xbf16>, vector<32x32xf32> -> vector<32x32xf32>
    %136 = vector.broadcast %133 : vector<1x32xf32> to vector<32x32xf32>
    %137 = arith.addf %135, %136 : vector<32x32xf32>
    %138 = vector.extract_strided_slice %137 {offsets = [0, 0], sizes = [4, 32], strides = [1, 1]} : vector<32x32xf32> to vector<4x32xf32>
    %139 = arith.truncf %134 : vector<4x32xf32> to vector<4x32xbf16>
    %cst_80 = arith.constant dense<0.000000e+00> : vector<4x32xf32>
    %140 = tpu.matmul %139, %132, %cst_80 {dimension_numbers = #tpu.dot_dimension_numbers<[1], [0], [0], [1], [0, 0, 1, 1], [], []>} : vector<4x32xbf16>, vector<32x32xbf16>, vector<4x32xf32> -> vector<4x32xf32>
    %141 = arith.addf %138, %140 : vector<4x32xf32>
    %142 = math.tanh %141 : vector<4x32xf32>
    %c0_81 = arith.constant 0 : index
    %c0_82 = arith.constant 0 : index
    %143 = vector.load %arg31[%c0_81, %c0_82] : memref<32x32xf32, #tpu.memory_space<vmem>>, vector<4x32xf32>
    tpu.vector_store %arg31[%c0_81, %c0_82], %142 {strides = array<i32>} : memref<32x32xf32, #tpu.memory_space<vmem>>, vector<4x32xf32>,
    %144 = vector.extract_strided_slice %137 {offsets = [4, 0], sizes = [4, 32], strides = [1, 1]} : vector<32x32xf32> to vector<4x32xf32>
    %145 = arith.truncf %142 : vector<4x32xf32> to vector<4x32xbf16>
    %cst_83 = arith.constant dense<0.000000e+00> : vector<4x32xf32>
    %146 = tpu.matmul %145, %132, %cst_83 {dimension_numbers = #tpu.dot_dimension_numbers<[1], [0], [0], [1], [0, 0, 1, 1], [], []>} : vector<4x32xbf16>, vector<32x32xbf16>, vector<4x32xf32> -> vector<4x32xf32>
    %147 = arith.addf %144, %146 : vector<4x32xf32>
    %148 = math.tanh %147 : vector<4x32xf32>
    %c4_84 = arith.constant 4 : index
    %c0_85 = arith.constant 0 : index
    %149 = vector.load %arg31[%c4_84, %c0_85] : memref<32x32xf32, #tpu.memory_space<vmem>>, vector<4x32xf32>
    tpu.vector_store %arg31[%c4_84, %c0_85], %148 {strides = array<i32>} : memref<32x32xf32, #tpu.memory_space<vmem>>, vector<4x32xf32>,
    %150 = vector.extract_strided_slice %137 {offsets = [8, 0], sizes = [4, 32], strides = [1, 1]} : vector<32x32xf32> to vector<4x32xf32>
    %151 = arith.truncf %148 : vector<4x32xf32> to vector<4x32xbf16>
    %cst_86 = arith.constant dense<0.000000e+00> : vector<4x32xf32>
    %152 = tpu.matmul %151, %132, %cst_86 {dimension_numbers = #tpu.dot_dimension_numbers<[1], [0], [0], [1], [0, 0, 1, 1], [], []>} : vector<4x32xbf16>, vector<32x32xbf16>, vector<4x32xf32> -> vector<4x32xf32>
    %153 = arith.addf %150, %152 : vector<4x32xf32>
    %154 = math.tanh %153 : vector<4x32xf32>
    %c8_87 = arith.constant 8 : index
    %c0_88 = arith.constant 0 : index
    %155 = vector.load %arg31[%c8_87, %c0_88] : memref<32x32xf32, #tpu.memory_space<vmem>>, vector<4x32xf32>
    tpu.vector_store %arg31[%c8_87, %c0_88], %154 {strides = array<i32>} : memref<32x32xf32, #tpu.memory_space<vmem>>, vector<4x32xf32>,
    %156 = vector.extract_strided_slice %137 {offsets = [12, 0], sizes = [4, 32], strides = [1, 1]} : vector<32x32xf32> to vector<4x32xf32>
    %157 = arith.truncf %154 : vector<4x32xf32> to vector<4x32xbf16>
    %cst_89 = arith.constant dense<0.000000e+00> : vector<4x32xf32>
    %158 = tpu.matmul %157, %132, %cst_89 {dimension_numbers = #tpu.dot_dimension_numbers<[1], [0], [0], [1], [0, 0, 1, 1], [], []>} : vector<4x32xbf16>, vector<32x32xbf16>, vector<4x32xf32> -> vector<4x32xf32>
    %159 = arith.addf %156, %158 : vector<4x32xf32>
    %160 = math.tanh %159 : vector<4x32xf32>
    %c12_90 = arith.constant 12 : index
    %c0_91 = arith.constant 0 : index
    %161 = vector.load %arg31[%c12_90, %c0_91] : memref<32x32xf32, #tpu.memory_space<vmem>>, vector<4x32xf32>
    tpu.vector_store %arg31[%c12_90, %c0_91], %160 {strides = array<i32>} : memref<32x32xf32, #tpu.memory_space<vmem>>, vector<4x32xf32>,
    %162 = vector.extract_strided_slice %137 {offsets = [16, 0], sizes = [4, 32], strides = [1, 1]} : vector<32x32xf32> to vector<4x32xf32>
    %163 = arith.truncf %160 : vector<4x32xf32> to vector<4x32xbf16>
    %cst_92 = arith.constant dense<0.000000e+00> : vector<4x32xf32>
    %164 = tpu.matmul %163, %132, %cst_92 {dimension_numbers = #tpu.dot_dimension_numbers<[1], [0], [0], [1], [0, 0, 1, 1], [], []>} : vector<4x32xbf16>, vector<32x32xbf16>, vector<4x32xf32> -> vector<4x32xf32>
    %165 = arith.addf %162, %164 : vector<4x32xf32>
    %166 = math.tanh %165 : vector<4x32xf32>
    %c16_93 = arith.constant 16 : index
    %c0_94 = arith.constant 0 : index
    %167 = vector.load %arg31[%c16_93, %c0_94] : memref<32x32xf32, #tpu.memory_space<vmem>>, vector<4x32xf32>
    tpu.vector_store %arg31[%c16_93, %c0_94], %166 {strides = array<i32>} : memref<32x32xf32, #tpu.memory_space<vmem>>, vector<4x32xf32>,
    %168 = vector.extract_strided_slice %137 {offsets = [20, 0], sizes = [4, 32], strides = [1, 1]} : vector<32x32xf32> to vector<4x32xf32>
    %169 = arith.truncf %166 : vector<4x32xf32> to vector<4x32xbf16>
    %cst_95 = arith.constant dense<0.000000e+00> : vector<4x32xf32>
    %170 = tpu.matmul %169, %132, %cst_95 {dimension_numbers = #tpu.dot_dimension_numbers<[1], [0], [0], [1], [0, 0, 1, 1], [], []>} : vector<4x32xbf16>, vector<32x32xbf16>, vector<4x32xf32> -> vector<4x32xf32>
    %171 = arith.addf %168, %170 : vector<4x32xf32>
    %172 = math.tanh %171 : vector<4x32xf32>
    %c20_96 = arith.constant 20 : index
    %c0_97 = arith.constant 0 : index
    %173 = vector.load %arg31[%c20_96, %c0_97] : memref<32x32xf32, #tpu.memory_space<vmem>>, vector<4x32xf32>
    tpu.vector_store %arg31[%c20_96, %c0_97], %172 {strides = array<i32>} : memref<32x32xf32, #tpu.memory_space<vmem>>, vector<4x32xf32>,
    %174 = vector.extract_strided_slice %137 {offsets = [24, 0], sizes = [4, 32], strides = [1, 1]} : vector<32x32xf32> to vector<4x32xf32>
    %175 = arith.truncf %172 : vector<4x32xf32> to vector<4x32xbf16>
    %cst_98 = arith.constant dense<0.000000e+00> : vector<4x32xf32>
    %176 = tpu.matmul %175, %132, %cst_98 {dimension_numbers = #tpu.dot_dimension_numbers<[1], [0], [0], [1], [0, 0, 1, 1], [], []>} : vector<4x32xbf16>, vector<32x32xbf16>, vector<4x32xf32> -> vector<4x32xf32>
    %177 = arith.addf %174, %176 : vector<4x32xf32>
    %178 = math.tanh %177 : vector<4x32xf32>
    %c24_99 = arith.constant 24 : index
    %c0_100 = arith.constant 0 : index
    %179 = vector.load %arg31[%c24_99, %c0_100] : memref<32x32xf32, #tpu.memory_space<vmem>>, vector<4x32xf32>
    tpu.vector_store %arg31[%c24_99, %c0_100], %178 {strides = array<i32>} : memref<32x32xf32, #tpu.memory_space<vmem>>, vector<4x32xf32>,
    %180 = vector.extract_strided_slice %137 {offsets = [28, 0], sizes = [4, 32], strides = [1, 1]} : vector<32x32xf32> to vector<4x32xf32>
    %181 = arith.truncf %178 : vector<4x32xf32> to vector<4x32xbf16>
    %cst_101 = arith.constant dense<0.000000e+00> : vector<4x32xf32>
    %182 = tpu.matmul %181, %132, %cst_101 {dimension_numbers = #tpu.dot_dimension_numbers<[1], [0], [0], [1], [0, 0, 1, 1], [], []>} : vector<4x32xbf16>, vector<32x32xbf16>, vector<4x32xf32> -> vector<4x32xf32>
    %183 = arith.addf %180, %182 : vector<4x32xf32>
    %184 = math.tanh %183 : vector<4x32xf32>
    %c28_102 = arith.constant 28 : index
    %c0_103 = arith.constant 0 : index
    %185 = vector.load %arg31[%c28_102, %c0_103] : memref<32x32xf32, #tpu.memory_space<vmem>>, vector<4x32xf32>
    tpu.vector_store %arg31[%c28_102, %c0_103], %184 {strides = array<i32>} : memref<32x32xf32, #tpu.memory_space<vmem>>, vector<4x32xf32>,
    %c0_104 = arith.constant 0 : index
    %c0_105 = arith.constant 0 : index
    %186 = vector.load %arg31[%c0_104, %c0_105] : memref<32x32xf32, #tpu.memory_space<vmem>>, vector<32x32xf32>
    %187 = vector.extract_strided_slice %129 {offsets = [0, 0], sizes = [28, 32], strides = [1, 1]} : vector<32x32xf32> to vector<28x32xf32>
    %188 = vector.extract_strided_slice %186 {offsets = [4, 0], sizes = [28, 32], strides = [1, 1]} : vector<32x32xf32> to vector<28x32xf32>
    %c0_106 = arith.constant 0 : index
    %c0_107 = arith.constant 0 : index
    %189 = vector.load %arg28[%c0_106, %c0_107] : memref<28x32xf32, #tpu.memory_space<vmem>>, vector<28x32xf32>
    tpu.vector_store %arg28[%c0_106, %c0_107], %187 {strides = array<i32>} : memref<28x32xf32, #tpu.memory_space<vmem>>, vector<28x32xf32>,
    %c0_108 = arith.constant 0 : index
    %c0_109 = arith.constant 0 : index
    %190 = vector.load %arg2[%c0_108, %c0_109] : memref<16x32xbf16, #tpu.memory_space<vmem>>, vector<16x32xbf16>
    %c0_110 = arith.constant 0 : index
    %c0_111 = arith.constant 0 : index
    %191 = vector.load %arg7[%c0_110, %c0_111] : memref<32x32xbf16, #tpu.memory_space<vmem>>, vector<32x32xbf16>
    %c0_112 = arith.constant 0 : index
    %c0_113 = arith.constant 0 : index
    %192 = vector.load %arg8[%c0_112, %c0_113] : memref<32x32xbf16, #tpu.memory_space<vmem>>, vector<32x32xbf16>
    %c0_114 = arith.constant 0 : index
    %c0_115 = arith.constant 0 : index
    %193 = vector.load %arg9[%c0_114, %c0_115] : memref<1x32xf32, #tpu.memory_space<vmem>>, vector<1x32xf32>
    %cst_116 = arith.constant 0.000000e+00 : f32
    %194 = vector.broadcast %cst_116 : f32 to vector<2x32xf32>
    %cst_117 = arith.constant dense<0.000000e+00> : vector<16x32xf32>
    %195 = tpu.matmul %190, %191, %cst_117 {dimension_numbers = #tpu.dot_dimension_numbers<[1], [0], [0], [1], [0, 0, 1, 1], [], []>} : vector<16x32xbf16>, vector<32x32xbf16>, vector<16x32xf32> -> vector<16x32xf32>
    %196 = vector.broadcast %193 : vector<1x32xf32> to vector<16x32xf32>
    %197 = arith.addf %195, %196 : vector<16x32xf32>
    %198 = vector.extract_strided_slice %197 {offsets = [0, 0], sizes = [2, 32], strides = [1, 1]} : vector<16x32xf32> to vector<2x32xf32>
    %199 = arith.truncf %194 : vector<2x32xf32> to vector<2x32xbf16>
    %cst_118 = arith.constant dense<0.000000e+00> : vector<2x32xf32>
    %200 = tpu.matmul %199, %192, %cst_118 {dimension_numbers = #tpu.dot_dimension_numbers<[1], [0], [0], [1], [0, 0, 1, 1], [], []>} : vector<2x32xbf16>, vector<32x32xbf16>, vector<2x32xf32> -> vector<2x32xf32>
    %201 = arith.addf %198, %200 : vector<2x32xf32>
    %202 = math.tanh %201 : vector<2x32xf32>
    %c0_119 = arith.constant 0 : index
    %c0_120 = arith.constant 0 : index
    %203 = vector.load %arg32[%c0_119, %c0_120] : memref<16x32xf32, #tpu.memory_space<vmem>>, vector<2x32xf32>
    tpu.vector_store %arg32[%c0_119, %c0_120], %202 {strides = array<i32>} : memref<16x32xf32, #tpu.memory_space<vmem>>, vector<2x32xf32>,
    %204 = vector.extract_strided_slice %197 {offsets = [2, 0], sizes = [2, 32], strides = [1, 1]} : vector<16x32xf32> to vector<2x32xf32>
    %205 = arith.truncf %202 : vector<2x32xf32> to vector<2x32xbf16>
    %cst_121 = arith.constant dense<0.000000e+00> : vector<2x32xf32>
    %206 = tpu.matmul %205, %192, %cst_121 {dimension_numbers = #tpu.dot_dimension_numbers<[1], [0], [0], [1], [0, 0, 1, 1], [], []>} : vector<2x32xbf16>, vector<32x32xbf16>, vector<2x32xf32> -> vector<2x32xf32>
    %207 = arith.addf %204, %206 : vector<2x32xf32>
    %208 = math.tanh %207 : vector<2x32xf32>
    %c2 = arith.constant 2 : index
    %c0_122 = arith.constant 0 : index
    %209 = vector.load %arg32[%c2, %c0_122] : memref<16x32xf32, #tpu.memory_space<vmem>>, vector<2x32xf32>
    tpu.vector_store %arg32[%c2, %c0_122], %208 {strides = array<i32>} : memref<16x32xf32, #tpu.memory_space<vmem>>, vector<2x32xf32>,
    %210 = vector.extract_strided_slice %197 {offsets = [4, 0], sizes = [2, 32], strides = [1, 1]} : vector<16x32xf32> to vector<2x32xf32>
    %211 = arith.truncf %208 : vector<2x32xf32> to vector<2x32xbf16>
    %cst_123 = arith.constant dense<0.000000e+00> : vector<2x32xf32>
    %212 = tpu.matmul %211, %192, %cst_123 {dimension_numbers = #tpu.dot_dimension_numbers<[1], [0], [0], [1], [0, 0, 1, 1], [], []>} : vector<2x32xbf16>, vector<32x32xbf16>, vector<2x32xf32> -> vector<2x32xf32>
    %213 = arith.addf %210, %212 : vector<2x32xf32>
    %214 = math.tanh %213 : vector<2x32xf32>
    %c4_124 = arith.constant 4 : index
    %c0_125 = arith.constant 0 : index
    %215 = vector.load %arg32[%c4_124, %c0_125] : memref<16x32xf32, #tpu.memory_space<vmem>>, vector<2x32xf32>
    tpu.vector_store %arg32[%c4_124, %c0_125], %214 {strides = array<i32>} : memref<16x32xf32, #tpu.memory_space<vmem>>, vector<2x32xf32>,
    %216 = vector.extract_strided_slice %197 {offsets = [6, 0], sizes = [2, 32], strides = [1, 1]} : vector<16x32xf32> to vector<2x32xf32>
    %217 = arith.truncf %214 : vector<2x32xf32> to vector<2x32xbf16>
    %cst_126 = arith.constant dense<0.000000e+00> : vector<2x32xf32>
    %218 = tpu.matmul %217, %192, %cst_126 {dimension_numbers = #tpu.dot_dimension_numbers<[1], [0], [0], [1], [0, 0, 1, 1], [], []>} : vector<2x32xbf16>, vector<32x32xbf16>, vector<2x32xf32> -> vector<2x32xf32>
    %219 = arith.addf %216, %218 : vector<2x32xf32>
    %220 = math.tanh %219 : vector<2x32xf32>
    %c6 = arith.constant 6 : index
    %c0_127 = arith.constant 0 : index
    %221 = vector.load %arg32[%c6, %c0_127] : memref<16x32xf32, #tpu.memory_space<vmem>>, vector<2x32xf32>
    tpu.vector_store %arg32[%c6, %c0_127], %220 {strides = array<i32>} : memref<16x32xf32, #tpu.memory_space<vmem>>, vector<2x32xf32>,
    %222 = vector.extract_strided_slice %197 {offsets = [8, 0], sizes = [2, 32], strides = [1, 1]} : vector<16x32xf32> to vector<2x32xf32>
    %223 = arith.truncf %220 : vector<2x32xf32> to vector<2x32xbf16>
    %cst_128 = arith.constant dense<0.000000e+00> : vector<2x32xf32>
    %224 = tpu.matmul %223, %192, %cst_128 {dimension_numbers = #tpu.dot_dimension_numbers<[1], [0], [0], [1], [0, 0, 1, 1], [], []>} : vector<2x32xbf16>, vector<32x32xbf16>, vector<2x32xf32> -> vector<2x32xf32>
    %225 = arith.addf %222, %224 : vector<2x32xf32>
    %226 = math.tanh %225 : vector<2x32xf32>
    %c8_129 = arith.constant 8 : index
    %c0_130 = arith.constant 0 : index
    %227 = vector.load %arg32[%c8_129, %c0_130] : memref<16x32xf32, #tpu.memory_space<vmem>>, vector<2x32xf32>
    tpu.vector_store %arg32[%c8_129, %c0_130], %226 {strides = array<i32>} : memref<16x32xf32, #tpu.memory_space<vmem>>, vector<2x32xf32>,
    %228 = vector.extract_strided_slice %197 {offsets = [10, 0], sizes = [2, 32], strides = [1, 1]} : vector<16x32xf32> to vector<2x32xf32>
    %229 = arith.truncf %226 : vector<2x32xf32> to vector<2x32xbf16>
    %cst_131 = arith.constant dense<0.000000e+00> : vector<2x32xf32>
    %230 = tpu.matmul %229, %192, %cst_131 {dimension_numbers = #tpu.dot_dimension_numbers<[1], [0], [0], [1], [0, 0, 1, 1], [], []>} : vector<2x32xbf16>, vector<32x32xbf16>, vector<2x32xf32> -> vector<2x32xf32>
    %231 = arith.addf %228, %230 : vector<2x32xf32>
    %232 = math.tanh %231 : vector<2x32xf32>
    %c10 = arith.constant 10 : index
    %c0_132 = arith.constant 0 : index
    %233 = vector.load %arg32[%c10, %c0_132] : memref<16x32xf32, #tpu.memory_space<vmem>>, vector<2x32xf32>
    tpu.vector_store %arg32[%c10, %c0_132], %232 {strides = array<i32>} : memref<16x32xf32, #tpu.memory_space<vmem>>, vector<2x32xf32>,
    %234 = vector.extract_strided_slice %197 {offsets = [12, 0], sizes = [2, 32], strides = [1, 1]} : vector<16x32xf32> to vector<2x32xf32>
    %235 = arith.truncf %232 : vector<2x32xf32> to vector<2x32xbf16>
    %cst_133 = arith.constant dense<0.000000e+00> : vector<2x32xf32>
    %236 = tpu.matmul %235, %192, %cst_133 {dimension_numbers = #tpu.dot_dimension_numbers<[1], [0], [0], [1], [0, 0, 1, 1], [], []>} : vector<2x32xbf16>, vector<32x32xbf16>, vector<2x32xf32> -> vector<2x32xf32>
    %237 = arith.addf %234, %236 : vector<2x32xf32>
    %238 = math.tanh %237 : vector<2x32xf32>
    %c12_134 = arith.constant 12 : index
    %c0_135 = arith.constant 0 : index
    %239 = vector.load %arg32[%c12_134, %c0_135] : memref<16x32xf32, #tpu.memory_space<vmem>>, vector<2x32xf32>
    tpu.vector_store %arg32[%c12_134, %c0_135], %238 {strides = array<i32>} : memref<16x32xf32, #tpu.memory_space<vmem>>, vector<2x32xf32>,
    %240 = vector.extract_strided_slice %197 {offsets = [14, 0], sizes = [2, 32], strides = [1, 1]} : vector<16x32xf32> to vector<2x32xf32>
    %241 = arith.truncf %238 : vector<2x32xf32> to vector<2x32xbf16>
    %cst_136 = arith.constant dense<0.000000e+00> : vector<2x32xf32>
    %242 = tpu.matmul %241, %192, %cst_136 {dimension_numbers = #tpu.dot_dimension_numbers<[1], [0], [0], [1], [0, 0, 1, 1], [], []>} : vector<2x32xbf16>, vector<32x32xbf16>, vector<2x32xf32> -> vector<2x32xf32>
    %243 = arith.addf %240, %242 : vector<2x32xf32>
    %244 = math.tanh %243 : vector<2x32xf32>
    %c14 = arith.constant 14 : index
    %c0_137 = arith.constant 0 : index
    %245 = vector.load %arg32[%c14, %c0_137] : memref<16x32xf32, #tpu.memory_space<vmem>>, vector<2x32xf32>
    tpu.vector_store %arg32[%c14, %c0_137], %244 {strides = array<i32>} : memref<16x32xf32, #tpu.memory_space<vmem>>, vector<2x32xf32>,
    %c0_138 = arith.constant 0 : index
    %c0_139 = arith.constant 0 : index
    %246 = vector.load %arg32[%c0_138, %c0_139] : memref<16x32xf32, #tpu.memory_space<vmem>>, vector<16x32xf32>
    %c0_140 = arith.constant 0 : index
    %c0_141 = arith.constant 0 : index
    %247 = vector.load %arg3[%c0_140, %c0_141] : memref<16x32xbf16, #tpu.memory_space<vmem>>, vector<16x32xbf16>
    %c0_142 = arith.constant 0 : index
    %c0_143 = arith.constant 0 : index
    %248 = vector.load %arg19[%c0_142, %c0_143] : memref<32x32xbf16, #tpu.memory_space<vmem>>, vector<32x32xbf16>
    %c0_144 = arith.constant 0 : index
    %c0_145 = arith.constant 0 : index
    %249 = vector.load %arg20[%c0_144, %c0_145] : memref<32x32xbf16, #tpu.memory_space<vmem>>, vector<32x32xbf16>
    %c0_146 = arith.constant 0 : index
    %c0_147 = arith.constant 0 : index
    %250 = vector.load %arg21[%c0_146, %c0_147] : memref<1x32xf32, #tpu.memory_space<vmem>>, vector<1x32xf32>
    %cst_148 = arith.constant dense<0.000000e+00> : vector<16x32xf32>
    %251 = tpu.matmul %247, %248, %cst_148 {dimension_numbers = #tpu.dot_dimension_numbers<[1], [0], [0], [1], [0, 0, 1, 1], [], []>} : vector<16x32xbf16>, vector<32x32xbf16>, vector<16x32xf32> -> vector<16x32xf32>
    %252 = vector.broadcast %250 : vector<1x32xf32> to vector<16x32xf32>
    %253 = arith.addf %251, %252 : vector<16x32xf32>
    %254 = vector.extract_strided_slice %253 {offsets = [0, 0], sizes = [2, 32], strides = [1, 1]} : vector<16x32xf32> to vector<2x32xf32>
    %255 = arith.truncf %244 : vector<2x32xf32> to vector<2x32xbf16>
    %cst_149 = arith.constant dense<0.000000e+00> : vector<2x32xf32>
    %256 = tpu.matmul %255, %249, %cst_149 {dimension_numbers = #tpu.dot_dimension_numbers<[1], [0], [0], [1], [0, 0, 1, 1], [], []>} : vector<2x32xbf16>, vector<32x32xbf16>, vector<2x32xf32> -> vector<2x32xf32>
    %257 = arith.addf %254, %256 : vector<2x32xf32>
    %258 = math.tanh %257 : vector<2x32xf32>
    %c0_150 = arith.constant 0 : index
    %c0_151 = arith.constant 0 : index
    %259 = vector.load %arg33[%c0_150, %c0_151] : memref<16x32xf32, #tpu.memory_space<vmem>>, vector<2x32xf32>
    tpu.vector_store %arg33[%c0_150, %c0_151], %258 {strides = array<i32>} : memref<16x32xf32, #tpu.memory_space<vmem>>, vector<2x32xf32>,
    %260 = vector.extract_strided_slice %253 {offsets = [2, 0], sizes = [2, 32], strides = [1, 1]} : vector<16x32xf32> to vector<2x32xf32>
    %261 = arith.truncf %258 : vector<2x32xf32> to vector<2x32xbf16>
    %cst_152 = arith.constant dense<0.000000e+00> : vector<2x32xf32>
    %262 = tpu.matmul %261, %249, %cst_152 {dimension_numbers = #tpu.dot_dimension_numbers<[1], [0], [0], [1], [0, 0, 1, 1], [], []>} : vector<2x32xbf16>, vector<32x32xbf16>, vector<2x32xf32> -> vector<2x32xf32>
    %263 = arith.addf %260, %262 : vector<2x32xf32>
    %264 = math.tanh %263 : vector<2x32xf32>
    %c2_153 = arith.constant 2 : index
    %c0_154 = arith.constant 0 : index
    %265 = vector.load %arg33[%c2_153, %c0_154] : memref<16x32xf32, #tpu.memory_space<vmem>>, vector<2x32xf32>
    tpu.vector_store %arg33[%c2_153, %c0_154], %264 {strides = array<i32>} : memref<16x32xf32, #tpu.memory_space<vmem>>, vector<2x32xf32>,
    %266 = vector.extract_strided_slice %253 {offsets = [4, 0], sizes = [2, 32], strides = [1, 1]} : vector<16x32xf32> to vector<2x32xf32>
    %267 = arith.truncf %264 : vector<2x32xf32> to vector<2x32xbf16>
    %cst_155 = arith.constant dense<0.000000e+00> : vector<2x32xf32>
    %268 = tpu.matmul %267, %249, %cst_155 {dimension_numbers = #tpu.dot_dimension_numbers<[1], [0], [0], [1], [0, 0, 1, 1], [], []>} : vector<2x32xbf16>, vector<32x32xbf16>, vector<2x32xf32> -> vector<2x32xf32>
    %269 = arith.addf %266, %268 : vector<2x32xf32>
    %270 = math.tanh %269 : vector<2x32xf32>
    %c4_156 = arith.constant 4 : index
    %c0_157 = arith.constant 0 : index
    %271 = vector.load %arg33[%c4_156, %c0_157] : memref<16x32xf32, #tpu.memory_space<vmem>>, vector<2x32xf32>
    tpu.vector_store %arg33[%c4_156, %c0_157], %270 {strides = array<i32>} : memref<16x32xf32, #tpu.memory_space<vmem>>, vector<2x32xf32>,
    %272 = vector.extract_strided_slice %253 {offsets = [6, 0], sizes = [2, 32], strides = [1, 1]} : vector<16x32xf32> to vector<2x32xf32>
    %273 = arith.truncf %270 : vector<2x32xf32> to vector<2x32xbf16>
    %cst_158 = arith.constant dense<0.000000e+00> : vector<2x32xf32>
    %274 = tpu.matmul %273, %249, %cst_158 {dimension_numbers = #tpu.dot_dimension_numbers<[1], [0], [0], [1], [0, 0, 1, 1], [], []>} : vector<2x32xbf16>, vector<32x32xbf16>, vector<2x32xf32> -> vector<2x32xf32>
    %275 = arith.addf %272, %274 : vector<2x32xf32>
    %276 = math.tanh %275 : vector<2x32xf32>
    %c6_159 = arith.constant 6 : index
    %c0_160 = arith.constant 0 : index
    %277 = vector.load %arg33[%c6_159, %c0_160] : memref<16x32xf32, #tpu.memory_space<vmem>>, vector<2x32xf32>
    tpu.vector_store %arg33[%c6_159, %c0_160], %276 {strides = array<i32>} : memref<16x32xf32, #tpu.memory_space<vmem>>, vector<2x32xf32>,
    %278 = vector.extract_strided_slice %253 {offsets = [8, 0], sizes = [2, 32], strides = [1, 1]} : vector<16x32xf32> to vector<2x32xf32>
    %279 = arith.truncf %276 : vector<2x32xf32> to vector<2x32xbf16>
    %cst_161 = arith.constant dense<0.000000e+00> : vector<2x32xf32>
    %280 = tpu.matmul %279, %249, %cst_161 {dimension_numbers = #tpu.dot_dimension_numbers<[1], [0], [0], [1], [0, 0, 1, 1], [], []>} : vector<2x32xbf16>, vector<32x32xbf16>, vector<2x32xf32> -> vector<2x32xf32>
    %281 = arith.addf %278, %280 : vector<2x32xf32>
    %282 = math.tanh %281 : vector<2x32xf32>
    %c8_162 = arith.constant 8 : index
    %c0_163 = arith.constant 0 : index
    %283 = vector.load %arg33[%c8_162, %c0_163] : memref<16x32xf32, #tpu.memory_space<vmem>>, vector<2x32xf32>
    tpu.vector_store %arg33[%c8_162, %c0_163], %282 {strides = array<i32>} : memref<16x32xf32, #tpu.memory_space<vmem>>, vector<2x32xf32>,
    %284 = vector.extract_strided_slice %253 {offsets = [10, 0], sizes = [2, 32], strides = [1, 1]} : vector<16x32xf32> to vector<2x32xf32>
    %285 = arith.truncf %282 : vector<2x32xf32> to vector<2x32xbf16>
    %cst_164 = arith.constant dense<0.000000e+00> : vector<2x32xf32>
    %286 = tpu.matmul %285, %249, %cst_164 {dimension_numbers = #tpu.dot_dimension_numbers<[1], [0], [0], [1], [0, 0, 1, 1], [], []>} : vector<2x32xbf16>, vector<32x32xbf16>, vector<2x32xf32> -> vector<2x32xf32>
    %287 = arith.addf %284, %286 : vector<2x32xf32>
    %288 = math.tanh %287 : vector<2x32xf32>
    %c10_165 = arith.constant 10 : index
    %c0_166 = arith.constant 0 : index
    %289 = vector.load %arg33[%c10_165, %c0_166] : memref<16x32xf32, #tpu.memory_space<vmem>>, vector<2x32xf32>
    tpu.vector_store %arg33[%c10_165, %c0_166], %288 {strides = array<i32>} : memref<16x32xf32, #tpu.memory_space<vmem>>, vector<2x32xf32>,
    %290 = vector.extract_strided_slice %253 {offsets = [12, 0], sizes = [2, 32], strides = [1, 1]} : vector<16x32xf32> to vector<2x32xf32>
    %291 = arith.truncf %288 : vector<2x32xf32> to vector<2x32xbf16>
    %cst_167 = arith.constant dense<0.000000e+00> : vector<2x32xf32>
    %292 = tpu.matmul %291, %249, %cst_167 {dimension_numbers = #tpu.dot_dimension_numbers<[1], [0], [0], [1], [0, 0, 1, 1], [], []>} : vector<2x32xbf16>, vector<32x32xbf16>, vector<2x32xf32> -> vector<2x32xf32>
    %293 = arith.addf %290, %292 : vector<2x32xf32>
    %294 = math.tanh %293 : vector<2x32xf32>
    %c12_168 = arith.constant 12 : index
    %c0_169 = arith.constant 0 : index
    %295 = vector.load %arg33[%c12_168, %c0_169] : memref<16x32xf32, #tpu.memory_space<vmem>>, vector<2x32xf32>
    tpu.vector_store %arg33[%c12_168, %c0_169], %294 {strides = array<i32>} : memref<16x32xf32, #tpu.memory_space<vmem>>, vector<2x32xf32>,
    %296 = vector.extract_strided_slice %253 {offsets = [14, 0], sizes = [2, 32], strides = [1, 1]} : vector<16x32xf32> to vector<2x32xf32>
    %297 = arith.truncf %294 : vector<2x32xf32> to vector<2x32xbf16>
    %cst_170 = arith.constant dense<0.000000e+00> : vector<2x32xf32>
    %298 = tpu.matmul %297, %249, %cst_170 {dimension_numbers = #tpu.dot_dimension_numbers<[1], [0], [0], [1], [0, 0, 1, 1], [], []>} : vector<2x32xbf16>, vector<32x32xbf16>, vector<2x32xf32> -> vector<2x32xf32>
    %299 = arith.addf %296, %298 : vector<2x32xf32>
    %300 = math.tanh %299 : vector<2x32xf32>
    %c14_171 = arith.constant 14 : index
    %c0_172 = arith.constant 0 : index
    %301 = vector.load %arg33[%c14_171, %c0_172] : memref<16x32xf32, #tpu.memory_space<vmem>>, vector<2x32xf32>
    tpu.vector_store %arg33[%c14_171, %c0_172], %300 {strides = array<i32>} : memref<16x32xf32, #tpu.memory_space<vmem>>, vector<2x32xf32>,
    %c0_173 = arith.constant 0 : index
    %c0_174 = arith.constant 0 : index
    %302 = vector.load %arg33[%c0_173, %c0_174] : memref<16x32xf32, #tpu.memory_space<vmem>>, vector<16x32xf32>
    %c0_175 = arith.constant 0 : index
    %c0_176 = arith.constant 0 : index
    %303 = vector.load %arg5[%c0_175, %c0_176] : memref<16x28xf32, #tpu.memory_space<vmem>>, vector<16x28xf32>
    %304 = arith.truncf %302 : vector<16x32xf32> to vector<16x32xbf16>
    %305 = arith.truncf %187 : vector<28x32xf32> to vector<28x32xbf16>
    %cst_177 = arith.constant dense<0.000000e+00> : vector<16x28xf32>
    %306 = tpu.matmul %304, %305, %cst_177 {dimension_numbers = #tpu.dot_dimension_numbers<[1], [1], [0], [0], [0, 0, 1, 0], [], []>} : vector<16x32xbf16>, vector<28x32xbf16>, vector<16x28xf32> -> vector<16x28xf32>
    %307 = arith.addf %306, %303 : vector<16x28xf32>
    %cst_178 = arith.constant dense<0xFF800000> : vector<16xf32>
    %308 = vector.multi_reduction <maximumf>, %307, %cst_178 [1] : vector<16x28xf32> to vector<16xf32>
    %309 = vector.shape_cast %308 : vector<16xf32> to vector<16x1xf32>
    %310 = vector.broadcast %309 : vector<16x1xf32> to vector<16x28xf32>
    %311 = arith.subf %307, %310 : vector<16x28xf32>
    %312 = math.exp %311 : vector<16x28xf32>
    %cst_179 = arith.constant dense<0.000000e+00> : vector<16xf32>
    %313 = vector.multi_reduction <add>, %312, %cst_179 [1] : vector<16x28xf32> to vector<16xf32>
    %314 = vector.shape_cast %313 : vector<16xf32> to vector<16x1xf32>
    %315 = tpu.reciprocal %314 {approx = true} : vector<16x1xf32> -> vector<16x1xf32>
    %316 = vector.broadcast %315 : vector<16x1xf32> to vector<16x28xf32>
    %317 = arith.mulf %312, %316 : vector<16x28xf32>
    %318 = arith.truncf %317 : vector<16x28xf32> to vector<16x28xbf16>
    %319 = arith.truncf %188 : vector<28x32xf32> to vector<28x32xbf16>
    %cst_180 = arith.constant dense<0.000000e+00> : vector<16x32xf32>
    %320 = tpu.matmul %318, %319, %cst_180 {dimension_numbers = #tpu.dot_dimension_numbers<[1], [0], [0], [1], [0, 0, 1, 1], [], []>} : vector<16x28xbf16>, vector<28x32xbf16>, vector<16x32xf32> -> vector<16x32xf32>
    %c0_181 = arith.constant 0 : index
    %c0_182 = arith.constant 0 : index
    %321 = vector.load %arg6[%c0_181, %c0_182] : memref<16x16xf32, #tpu.memory_space<vmem>>, vector<16x16xf32>
    %322 = arith.truncf %302 : vector<16x32xf32> to vector<16x32xbf16>
    %323 = arith.truncf %246 : vector<16x32xf32> to vector<16x32xbf16>
    %cst_183 = arith.constant dense<0.000000e+00> : vector<16x16xf32>
    %324 = tpu.matmul %322, %323, %cst_183 {dimension_numbers = #tpu.dot_dimension_numbers<[1], [1], [0], [0], [0, 0, 1, 0], [], []>} : vector<16x32xbf16>, vector<16x32xbf16>, vector<16x16xf32> -> vector<16x16xf32>
    %325 = arith.addf %324, %321 : vector<16x16xf32>
    %cst_184 = arith.constant dense<0xFF800000> : vector<16xf32>
    %326 = vector.multi_reduction <maximumf>, %325, %cst_184 [1] : vector<16x16xf32> to vector<16xf32>
    %327 = vector.shape_cast %326 : vector<16xf32> to vector<16x1xf32>
    %328 = vector.broadcast %327 : vector<16x1xf32> to vector<16x16xf32>
    %329 = arith.subf %325, %328 : vector<16x16xf32>
    %330 = math.exp %329 : vector<16x16xf32>
    %cst_185 = arith.constant dense<0.000000e+00> : vector<16xf32>
    %331 = vector.multi_reduction <add>, %330, %cst_185 [1] : vector<16x16xf32> to vector<16xf32>
    %332 = vector.shape_cast %331 : vector<16xf32> to vector<16x1xf32>
    %333 = tpu.reciprocal %332 {approx = true} : vector<16x1xf32> -> vector<16x1xf32>
    %334 = vector.broadcast %333 : vector<16x1xf32> to vector<16x16xf32>
    %335 = arith.mulf %330, %334 : vector<16x16xf32>
    %336 = arith.truncf %335 : vector<16x16xf32> to vector<16x16xbf16>
    %337 = arith.truncf %246 : vector<16x32xf32> to vector<16x32xbf16>
    %cst_186 = arith.constant dense<0.000000e+00> : vector<16x32xf32>
    %338 = tpu.matmul %336, %337, %cst_186 {dimension_numbers = #tpu.dot_dimension_numbers<[1], [0], [0], [1], [0, 0, 1, 1], [], []>} : vector<16x16xbf16>, vector<16x32xbf16>, vector<16x32xf32> -> vector<16x32xf32>
    %c0_187 = arith.constant 0 : index
    %c0_188 = arith.constant 0 : index
    %339 = vector.load %arg27[%c0_187, %c0_188] : memref<16x28xf32, #tpu.memory_space<vmem>>, vector<16x28xf32>
    tpu.vector_store %arg27[%c0_187, %c0_188], %317 {strides = array<i32>} : memref<16x28xf32, #tpu.memory_space<vmem>>, vector<16x28xf32>,
    %c0_189 = arith.constant 0 : index
    %c0_190 = arith.constant 0 : index
    %340 = vector.load %arg22[%c0_189, %c0_190] : memref<32x32xbf16, #tpu.memory_space<vmem>>, vector<32x32xbf16>
    %341 = arith.truncf %302 : vector<16x32xf32> to vector<16x32xbf16>
    %cst_191 = arith.constant dense<0.000000e+00> : vector<16x32xf32>
    %342 = tpu.matmul %341, %340, %cst_191 {dimension_numbers = #tpu.dot_dimension_numbers<[1], [0], [0], [1], [0, 0, 1, 1], [], []>} : vector<16x32xbf16>, vector<32x32xbf16>, vector<16x32xf32> -> vector<16x32xf32>
    %c0_192 = arith.constant 0 : index
    %c0_193 = arith.constant 0 : index
    %343 = vector.load %arg23[%c0_192, %c0_193] : memref<32x32xbf16, #tpu.memory_space<vmem>>, vector<32x32xbf16>
    %344 = arith.truncf %320 : vector<16x32xf32> to vector<16x32xbf16>
    %cst_194 = arith.constant dense<0.000000e+00> : vector<16x32xf32>
    %345 = tpu.matmul %344, %343, %cst_194 {dimension_numbers = #tpu.dot_dimension_numbers<[1], [0], [0], [1], [0, 0, 1, 1], [], []>} : vector<16x32xbf16>, vector<32x32xbf16>, vector<16x32xf32> -> vector<16x32xf32>
    %346 = arith.addf %342, %345 : vector<16x32xf32>
    %c0_195 = arith.constant 0 : index
    %c0_196 = arith.constant 0 : index
    %347 = vector.load %arg24[%c0_195, %c0_196] : memref<32x32xbf16, #tpu.memory_space<vmem>>, vector<32x32xbf16>
    %348 = arith.truncf %338 : vector<16x32xf32> to vector<16x32xbf16>
    %cst_197 = arith.constant dense<0.000000e+00> : vector<16x32xf32>
    %349 = tpu.matmul %348, %347, %cst_197 {dimension_numbers = #tpu.dot_dimension_numbers<[1], [0], [0], [1], [0, 0, 1, 1], [], []>} : vector<16x32xbf16>, vector<32x32xbf16>, vector<16x32xf32> -> vector<16x32xf32>
    %350 = arith.addf %346, %349 : vector<16x32xf32>
    %c0_198 = arith.constant 0 : index
    %c0_199 = arith.constant 0 : index
    %351 = vector.load %arg25[%c0_198, %c0_199] : memref<1x32xf32, #tpu.memory_space<vmem>>, vector<1x32xf32>
    %352 = vector.broadcast %351 : vector<1x32xf32> to vector<16x32xf32>
    %353 = arith.addf %350, %352 : vector<16x32xf32>
    %354 = math.tanh %353 : vector<16x32xf32>
    %c0_200 = arith.constant 0 : index
    %c0_201 = arith.constant 0 : index
    %355 = vector.load %arg26[%c0_200, %c0_201] : memref<16x32xf32, #tpu.memory_space<vmem>>, vector<16x32xf32>
    tpu.vector_store %arg26[%c0_200, %c0_201], %354 {strides = array<i32>} : memref<16x32xf32, #tpu.memory_space<vmem>>, vector<16x32xf32>,
    return
  }
}

</mosaic_0001>

<bundles_post_ra>
// kernel: eq.28
= control target key start
LH: loop header
LB: loop body
LE: loop exit
PB: predicated region body
PF: predicated region fallthrough
CT: control target
= control target key end

     0   :  { %s51_s10 = smov 20   ;;  %s52_s11 = smov 12   ;;  %vm3_vm0 = vcmask 31744   ;;  %vm9_vm1 = vcmask 195744   ;;  %vm15_vm2 = vcmask 162944   ;;  %vm21_vm3 = vcmask 130144   ;;  %s87_s0 = inlined_call_operand.vmem [shape: s32[6,4], index: 0, kind: input, shape index: {}]   ;;  %s88_s1 = inlined_call_operand.vmem [shape: s32[24], index: 1, kind: output, shape index: {}]  }
   0x1   :  { %v41_v0 = vld [vmem:[%s87_s0 + $0x5] sm:$0x1]   ;;  %v43_v1 = vld [vmem:[%s87_s0 + $0x3] sm:$0x1]   ;;  %v42_v2 = vld [vmem:[%s87_s0 + $0x4] sm:$0x1]  }
   0x2   :  { %7 = vrot.lane.b32.xlu0 %v41_v0, %s51_s10  ;;  %19 = vrot.lane.b32.xlu1 %v43_v1, %s52_s11  ;;  %v44_v3 = vld [vmem:[%s87_s0 + $0x2] sm:$0x1]   ;;  %v2_v4 = vld [vmem:[%s87_s0] sm:$0x1]   ;;  %s53_s18 = smov 16   ;;  %s54_s19 = smov 8  }
   0x3   :  { %4 = vst.msk [vmem:[#allocation0] sm:$0x1] %vm3_vm0, %v2_v4   ;;  %v45_v5 = vld [vmem:[%s87_s0 + $0x1] sm:$0x1]   ;;  %s55_s0 = smov 4   ;;  %vm27_vm4 = vcmask 97344  }
   0x4   :  { %vm33_vm5 = vcmask 64544  }
   0x6   :  { %13 = vrot.lane.b32.xlu0 %v42_v2, %s53_s18  ;;  %25 = vrot.lane.b32.xlu1 %v44_v3, %s54_s19 }
   0xa   :  { %31 = vrot.lane.b32.xlu0 %v45_v5, %s55_s0 }
  0x74   :  { %v8_v6 = vpop.permute.xlu0 %7   ;;  %v20_v7 = vpop.permute.xlu1 %19  }
  0x75   :  { %10 = vst.msk [vmem:[#allocation0] sm:$0x1] %vm9_vm1, %v8_v6  }
  0x78   :  { %v14_v8 = vpop.permute.xlu0 %13   ;;  %v26_v9 = vpop.permute.xlu1 %25  }
  0x79   :  { %16 = vst.msk [vmem:[#allocation0] sm:$0x1] %vm15_vm2, %v14_v8  }
  0x7a   :  { %22 = vst.msk [vmem:[#allocation0] sm:$0x1] %vm21_vm3, %v20_v7  }
  0x7b   :  { %28 = vst.msk [vmem:[#allocation0] sm:$0x1] %vm27_vm4, %v26_v9  }
  0x7c   :  { %v32_v10 = vpop.permute.xlu0 %31  }
  0x7d   :  { %34 = vst.msk [vmem:[#allocation0] sm:$0x1] %vm33_vm5, %v32_v10  }
  0x84   :  { %v38_v11 = vld [vmem:[#allocation0] sm:$0x1] }
  0x85   :  { %40 = vst [vmem:[%s88_s1] sm:$0x1] %v38_v11 }

// kernel: eq.25
= control target key start
LH: loop header
LB: loop body
LE: loop exit
PB: predicated region body
PF: predicated region fallthrough
CT: control target
= control target key end

     0   :  { %s67_s10 = smov 28   ;;  %s68_s11 = smov 20   ;;  %vm3_vm0 = vcmask 31744   ;;  %vm9_vm1 = vcmask 261344   ;;  %vm15_vm2 = vcmask 228544   ;;  %vm21_vm3 = vcmask 195744   ;;  %s111_s0 = inlined_call_operand.vmem [shape: s32[8,4], index: 0, kind: input, shape index: {}]   ;;  %s112_s1 = inlined_call_operand.vmem [shape: s32[32], index: 1, kind: output, shape index: {}]  }
   0x1   :  { %v53_v0 = vld [vmem:[%s111_s0 + $0x7] sm:$0x1]   ;;  %v55_v1 = vld [vmem:[%s111_s0 + $0x5] sm:$0x1]   ;;  %v54_v2 = vld [vmem:[%s111_s0 + $0x6] sm:$0x1]  }
   0x2   :  { %7 = vrot.lane.b32.xlu0 %v53_v0, %s67_s10  ;;  %19 = vrot.lane.b32.xlu1 %v55_v1, %s68_s11  ;;  %v56_v3 = vld [vmem:[%s111_s0 + $0x4] sm:$0x1]   ;;  %v2_v4 = vld [vmem:[%s111_s0] sm:$0x1]   ;;  %s69_s18 = smov 24   ;;  %s70_s19 = smov 16  }
   0x3   :  { %4 = vst.msk [vmem:[#allocation0] sm:$0x1] %vm3_vm0, %v2_v4   ;;  %v57_v5 = vld [vmem:[%s111_s0 + $0x3] sm:$0x1]   ;;  %v58_v6 = vld [vmem:[%s111_s0 + $0x2] sm:$0x1]  }
   0x4   :  { %s71_s24 = smov 12   ;;  %s72_s25 = smov 8   ;;  %v59_v7 = vld [vmem:[%s111_s0 + $0x1] sm:$0x1]   ;;  %vm27_vm4 = vcmask 162944   ;;  %vm33_vm5 = vcmask 130144  }
   0x5   :  { %s73_s0 = smov 4   ;;  %vm39_vm6 = vcmask 97344   ;;  %vm45_vm7 = vcmask 64544  }
   0x6   :  { %13 = vrot.lane.b32.xlu0 %v54_v2, %s69_s18  ;;  %25 = vrot.lane.b32.xlu1 %v56_v3, %s70_s19 }
   0xa   :  { %31 = vrot.lane.b32.xlu0 %v57_v5, %s71_s24  ;;  %37 = vrot.lane.b32.xlu1 %v58_v6, %s72_s25 }
   0xe   :  { %43 = vrot.lane.b32.xlu0 %v59_v7, %s73_s0 }
  0x74   :  { %v8_v8 = vpop.permute.xlu0 %7   ;;  %v20_v9 = vpop.permute.xlu1 %19  }
  0x75   :  { %10 = vst.msk [vmem:[#allocation0] sm:$0x1] %vm9_vm1, %v8_v8  }
  0x78   :  { %v14_v10 = vpop.permute.xlu0 %13   ;;  %v26_v11 = vpop.permute.xlu1 %25  }
  0x79   :  { %16 = vst.msk [vmem:[#allocation0] sm:$0x1] %vm15_vm2, %v14_v10  }
  0x7a   :  { %22 = vst.msk [vmem:[#allocation0] sm:$0x1] %vm21_vm3, %v20_v9  }
  0x7b   :  { %28 = vst.msk [vmem:[#allocation0] sm:$0x1] %vm27_vm4, %v26_v11  }
  0x7c   :  { %v32_v12 = vpop.permute.xlu0 %31   ;;  %v38_v13 = vpop.permute.xlu1 %37  }
  0x7d   :  { %34 = vst.msk [vmem:[#allocation0] sm:$0x1] %vm33_vm5, %v32_v12  }
  0x7e   :  { %40 = vst.msk [vmem:[#allocation0] sm:$0x1] %vm39_vm6, %v38_v13  }
  0x80   :  { %v44_v14 = vpop.permute.xlu0 %43  }
  0x81   :  { %46 = vst.msk [vmem:[#allocation0] sm:$0x1] %vm45_vm7, %v44_v14  }
  0x88   :  { %v50_v15 = vld [vmem:[#allocation0] sm:$0x1] }
  0x89   :  { %52 = vst [vmem:[%s112_s1] sm:$0x1] %v50_v15 }

// kernel: ref_nmt_forward.1
= control target key start
LH: loop header
LB: loop body
LE: loop exit
PB: predicated region body
PF: predicated region fallthrough
CT: control target
= control target key end

     0   :  { %s5014_s0 = inlined_call_operand.vmem [shape: bf16[24,32], index: 0, kind: input, shape index: {}]   ;;  %s5015_s1 = inlined_call_operand.vmem [shape: bf16[32,32], index: 1, kind: input, shape index: {}]   ;;  %s5016_s2 = inlined_call_operand.vmem [shape: bf16[16,32], index: 2, kind: input, shape index: {}]   ;;  %s5017_s3 = inlined_call_operand.vmem [shape: bf16[16,32], index: 3, kind: input, shape index: {}]   ;;  %s5018_s4 = inlined_call_operand.vmem [shape: f32[32,24], index: 4, kind: input, shape index: {}]   ;;  %s5019_s5 = inlined_call_operand.vmem [shape: f32[16,28], index: 5, kind: input, shape index: {}]   ;;  %s5020_s6 = inlined_call_operand.vmem [shape: f32[16,16], index: 6, kind: input, shape index: {}]   ;;  %s5021_s7 = inlined_call_operand.vmem [shape: bf16[32,32], index: 7, kind: input, shape index: {}]   ;;  %s5022_s8 = inlined_call_operand.vmem [shape: bf16[32,32], index: 8, kind: input, shape index: {}]   ;;  %s5023_s9 = inlined_call_operand.vmem [shape: f32[1,32], index: 9, kind: input, shape index: {}]   ;;  %s5024_s10 = inlined_call_operand.vmem [shape: bf16[32,32], index: 10, kind: input, shape index: {}]   ;;  %s5025_s11 = inlined_call_operand.vmem [shape: bf16[32,32], index: 11, kind: input, shape index: {}]   ;;  %s5026_s12 = inlined_call_operand.vmem [shape: f32[1,32], index: 12, kind: input, shape index: {}]   ;;  %s5027_s13 = inlined_call_operand.vmem [shape: bf16[32,32], index: 13, kind: input, shape index: {}]   ;;  %s5028_s14 = inlined_call_operand.vmem [shape: bf16[32,32], index: 14, kind: input, shape index: {}]   ;;  %s5029_s15 = inlined_call_operand.vmem [shape: f32[1,32], index: 15, kind: input, shape index: {}]   ;;  %s5030_s16 = inlined_call_operand.vmem [shape: bf16[32,32], index: 16, kind: input, shape index: {}]   ;;  %s5031_s17 = inlined_call_operand.vmem [shape: bf16[32,32], index: 17, kind: input, shape index: {}]   ;;  %s5032_s18 = inlined_call_operand.vmem [shape: f32[1,32], index: 18, kind: input, shape index: {}]   ;;  %s5033_s19 = inlined_call_operand.vmem [shape: bf16[32,32], index: 19, kind: input, shape index: {}]   ;;  %s5034_s20 = inlined_call_operand.vmem [shape: bf16[32,32], index: 20, kind: input, shape index: {}]   ;;  %s5035_s21 = inlined_call_operand.vmem [shape: f32[1,32], index: 21, kind: input, shape index: {}]   ;;  %s5036_s22 = inlined_call_operand.vmem [shape: bf16[32,32], index: 22, kind: input, shape index: {}]   ;;  %s5037_s23 = inlined_call_operand.vmem [shape: bf16[32,32], index: 23, kind: input, shape index: {}]   ;;  %s5038_s24 = inlined_call_operand.vmem [shape: bf16[32,32], index: 24, kind: input, shape index: {}]   ;;  %s5039_s25 = inlined_call_operand.vmem [shape: f32[1,32], index: 25, kind: input, shape index: {}]   ;;  %s5040_s26 = inlined_call_operand.hbm [shape: f32[16,32], index: 26, kind: output, shape index: {0}]   ;;  %s5041_s27 = inlined_call_operand.vmem [shape: f32[16,28], index: 27, kind: output, shape index: {1}]   ;;  %s5042_s28 = inlined_call_operand.vmem [shape: f32[28,32], index: 28, kind: output, shape index: {2}]  }
   0x1   :  { %5053 = sst [smem:[#allocation10_spill]] %s5014_s0 }
   0x2   :  { %5054 = sst [smem:[#allocation11_spill]] %s5015_s1 }
   0x3   :  { %5055 = sst [smem:[#allocation12_spill]] %s5016_s2 }
   0x4   :  { %5056 = sst [smem:[#allocation13_spill]] %s5017_s3 }
   0x5   :  { %5057 = sst [smem:[#allocation14_spill]] %s5018_s4 }
   0x6   :  { %5058 = sst [smem:[#allocation15_spill]] %s5019_s5 }
   0x7   :  { %5059 = sst [smem:[#allocation16_spill]] %s5020_s6 }
   0x8   :  { %5060 = sst [smem:[#allocation17_spill]] %s5021_s7 }
   0x9   :  { %5061 = sst [smem:[#allocation18_spill]] %s5022_s8 }
   0xa   :  { %5062 = sst [smem:[#allocation19_spill]] %s5023_s9 }
   0xb   :  { %5063 = sst [smem:[#allocation20_spill]] %s5024_s10 }
   0xc   :  { %5064 = sst [smem:[#allocation21_spill]] %s5025_s11 }
   0xd   :  { %5065 = sst [smem:[#allocation22_spill]] %s5026_s12 }
   0xe   :  { %s5066_s9 = sld [smem:[#allocation17_spill]]  ;;  %v4191_v1 = vmov 0.0   ;;  %s5067_s6 = sld [smem:[#allocation18_spill]]  ;;  %vm126_vm0 = vcmask 261120   ;;  %vm4192_vm1 = vmmov 0   ;;  %v4193_v7 = vmov 0  }
   0xf   :  { %3576 = vmatprep.subr.bf16.mxu1 %v4191_v1  ;;  %s5068_s12 = sld [smem:[#allocation10_spill]]  ;;  %3580 = vmatprep.mubr.msk.bf16.mxu1 %vm4192_vm1, %v4191_v1 }
  0x14   :  { %v4009_v0 = vld [vmem:[%s5066_s9] sm:$0xff]   ;;  %v4011_v3 = vld [vmem:[%s5066_s9 + $0x8] sm:$0xff]  }
  0x15   :  { %v4349_v2 = vld [vmem:[%s5067_s6] sm:$0xff]   ;;  %3568 = vmatprep.subr.bf16.mxu0 %v4009_v0  ;;  %v4358_v4 = vld [vmem:[%s5067_s6 + $0x8] sm:$0xff]  }
  0x16   :  { %3569 = vmatpush3.bf16.msra.mxu0 %v4009_v0  ;;  %3577 = vmatpush3.bf16.msra.mxu1 %v4349_v2  ;;  %v4013_v5 = vld [vmem:[%s5068_s12] sm:$0xff]   ;;  %v4014_v6 = vld [vmem:[%s5068_s12 + $0x8] ss:$0 sps:$4 sm:$0xff]  }
  0x17   :  { %3570 = vmatprep.subr.bf16.mxu0 %v4011_v3  ;;  %3578 = vmatprep.subr.bf16.mxu1 %v4191_v1 }
  0x18   :  { %3572 = vmatprep.mubr.msk.bf16.mxu0 %vm126_vm0, %v4013_v5 }
  0x1a   :  { %3571 = vmatpush3.bf16.msra.mxu0 %v4011_v3  ;;  %3579 = vmatpush3.bf16.msra.mxu1 %v4358_v4 }
  0x1b   :  { %3584 = vmatprep.subr.bf16.mxu0 %v4191_v1  ;;  %3592 = vmatprep.subr.bf16.mxu1 %v4191_v1 }
  0x1d   :  { %3573 = vmatmul.mubr.msk.bf16.vlgmr.msra.gmra.mrb[0].mxu0 %vm126_vm0, %v4014_v6  ;;  %3581 = vmatmul.mubr.bf16.vlgmr.msra.gmra.mrb[0].mxu1 %v4193_v7 }
  0x1e   :  { %3585 = vmatpush3.bf16.msra.mxu0 %v4349_v2  ;;  %3588 = vmatprep.mubr.msk.bf16.mxu0 %vm4192_vm1, %v4191_v1 }
  0x1f   :  { %3586 = vmatprep.subr.bf16.mxu0 %v4191_v1  ;;  %3593 = vmatpush3.bf16.msra.mxu1 %v4349_v2 }
  0x20   :  { %3594 = vmatprep.subr.bf16.mxu1 %v4191_v1  ;;  %3596 = vmatprep.mubr.msk.bf16.mxu1 %vm4192_vm1, %v4191_v1 }
  0x22   :  { %3587 = vmatpush3.bf16.msra.mxu0 %v4358_v4 }
  0x23   :  { %3595 = vmatpush3.bf16.msra.mxu1 %v4358_v4  ;;  %3600 = vmatprep.subr.bf16.mxu0 %v4191_v1 }
  0x24   :  { %3608 = vmatprep.subr.bf16.mxu1 %v4191_v1 }
  0x25   :  { %34 = vsyncpa [#allocation8], 0  ;;  %s5069_s30 = sld [smem:[#allocation19_spill]]  ;;  %vm238_vm2 = vcmask 257024   ;;  %vm289_vm3 = vcmask 261124   ;;  %v4015_v55 = vld [vmem:[%s5027_s13] sm:$0xff]  }
  0x26   :  { %v4016_v56 = vld [vmem:[%s5027_s13 + $0x8] sm:$0xff]   ;;  %v4431_v57 = vld [vmem:[%s5028_s14] sm:$0xff]   ;;  %s5070_s1 = sld [smem:[#allocation11_spill]]  ;;  %vm1122_vm4 = vcmask 1043456   ;;  %s5071_s0 = sld [smem:[#allocation14_spill]]  ;;  %vm1069_vm5 = vcmask 195584  }
  0x27   :  { %v4447_v60 = vld [vmem:[%s5028_s14 + $0x8] sm:$0xff]   ;;  %s5072_s5 = sld [smem:[#allocation20_spill]]  ;;  %s5073_s7 = sld [smem:[#allocation21_spill]]  ;;  %vm1965_vm6 = vcmask 254976   ;;  %vm2016_vm7 = vcmask 257026   ;;  %vm2069_vm8 = vcmask 259076  }
  0x28   :  { %s5074_s14 = sld [smem:[#allocation22_spill]]  ;;  %vm2122_vm9 = vcmask 261126   ;;  %s5076_s13 = sld [smem:[#allocation13_spill]]  ;;  %vm2910_vm10 = vcmask 1045504   ;;  %vm2882_vm11 = vcmask 228352   ;;  %vm3010_vm12 = vcmask 130048  }
  0x29   :  { %s5077_s3 = sld [smem:[#allocation15_spill]]  ;;  %s5078_s2 = sld [smem:[#allocation16_spill]] }
  0x2b   :  { %v3298_v8 = vld [vmem:[%s5069_s30] ss:$0 sm:$0xff] }
  0x2c   :  { %v4018_v58 = vld [vmem:[%s5070_s1] sm:$0xff]   ;;  %v4019_v59 = vld [vmem:[%s5070_s1 + $0x8] sm:$0xff]  }
  0xf0   :  { %v3574_v9 = vpop.f32.mrb[0].mxu0  ;;  %v230_v10 = vpop.f32.mrb[0].mxu1 }
  0xf1   :  { %v4390_v11 = vadd.f32 %v3574_v9, %v3298_v8  ;;  %v167_v12 = vpop.f32.mrb[1].mxu0  ;;  %v3582_v13 = vpop.f32.mrb[1].mxu1 }
  0xf2   :  { %v168_v14 = vadd.f32 %v3298_v8, %v167_v12  ;;  %v3575_v15 = vpop.f32.mrb[2].mxu0  ;;  %v233_v16 = vpop.f32.mrb[2].mxu1 }
  0xf3   :  { %v170_v17 = vpop.f32.mrb[3].mxu0  ;;  %v3583_v18 = vpop.f32.mrb[3].mxu1 }
  0xf4   :  { %v236_v19 = vadd.f32 %v230_v10, %v168_v14  ;;  %v171_v20 = vadd.f32 %v3298_v8, %v170_v17  ;;  %v3312_v8 = vld [vmem:[%s5029_s15] ss:$0 sm:$0xff] }
  0xf6   :  { %4047 = vtanh.f32 %v236_v19 }
 0x100   :  { %v4048_v21 = vpop.eup %4047 }
 0x101   :  { %239 = vst.msk [vmem:[#allocation2] sm:$0xf] %vm238_vm2, %v4048_v21  ;;  %v240_v22 = vpack.c.bf16 %v4048_v21, %v4048_v21 }
 0x103   :  { %3589 = vmatmul.mubr.msk.bf16.vlgmr.msra.gmra.mrb[4].mxu0 %vm126_vm0, %v240_v22 }
 0x104   :  { %3601 = vmatpush3.bf16.msra.mxu0 %v4349_v2  ;;  %3604 = vmatprep.mubr.msk.bf16.mxu0 %vm4192_vm1, %v4191_v1 }
 0x105   :  { %3602 = vmatprep.subr.bf16.mxu0 %v4191_v1 }
 0x108   :  { %3603 = vmatpush3.bf16.msra.mxu0 %v4358_v4 }
 0x109   :  { %3616 = vmatprep.subr.bf16.mxu0 %v4191_v1 }
 0x1d6   :  { %v278_v23 = vpop.f32.mrb[4].mxu0 }
 0x1d7   :  { %v285_v24 = vrot.slane %v278_v23, 4  ;;  %v3590_v25 = vpop.f32.mrb[5].mxu0 }
 0x1d8   :  { %v281_v26 = vpop.f32.mrb[6].mxu0 }
 0x1d9   :  { %v287_v27 = vadd.f32 %v285_v24, %v168_v14  ;;  %v3591_v28 = vpop.f32.mrb[7].mxu0 }
 0x1db   :  { %4049 = vtanh.f32 %v287_v27 }
 0x1e5   :  { %v4050_v29 = vpop.eup %4049 }
 0x1e6   :  { %290 = vst.msk [vmem:[#allocation2] sm:$0xf0] %vm289_vm3, %v4050_v29  ;;  %v291_v30 = vpack.c.bf16 %v4050_v29, %v4050_v29 }
 0x1e8   :  { %v293_v31 = vrot.slane %v291_v30, 2 }
 0x1ea   :  { %3597 = vmatmul.mubr.msk.bf16.vlgmr.msra.gmra.mrb[4].mxu1 %vm126_vm0, %v293_v31 }
 0x1eb   :  { %3609 = vmatpush3.bf16.msra.mxu1 %v4349_v2  ;;  %3612 = vmatprep.mubr.msk.bf16.mxu1 %vm4192_vm1, %v4191_v1 }
 0x1ec   :  { %3610 = vmatprep.subr.bf16.mxu1 %v4191_v1 }
 0x1ef   :  { %3611 = vmatpush3.bf16.msra.mxu1 %v4358_v4 }
 0x1f0   :  { %3624 = vmatprep.subr.bf16.mxu1 %v4015_v55 }
 0x2bd   :  { %v331_v32 = vpop.f32.mrb[4].mxu1 }
 0x2be   :  { %v337_v33 = vadd.f32 %v331_v32, %v171_v20  ;;  %v3598_v34 = vpop.f32.mrb[5].mxu1 }
 0x2bf   :  { %v334_v35 = vpop.f32.mrb[6].mxu1 }
 0x2c0   :  { %4051 = vtanh.f32 %v337_v33  ;;  %v3599_v36 = vpop.f32.mrb[7].mxu1 }
 0x2ca   :  { %v4052_v37 = vpop.eup %4051 }
 0x2cb   :  { %339 = vst.msk [vmem:[#allocation2 + $0x8] sm:$0xf] %vm238_vm2, %v4052_v37  ;;  %v340_v38 = vpack.c.bf16 %v4052_v37, %v4052_v37 }
 0x2cd   :  { %3605 = vmatmul.mubr.msk.bf16.vlgmr.msra.gmra.mrb[8].mxu0 %vm126_vm0, %v340_v38 }
 0x2ce   :  { %3617 = vmatpush3.bf16.msra.mxu0 %v4349_v2  ;;  %3620 = vmatprep.mubr.msk.bf16.mxu0 %vm4192_vm1, %v4191_v1 }
 0x2cf   :  { %3618 = vmatprep.subr.bf16.mxu0 %v4191_v1 }
 0x2d2   :  { %3619 = vmatpush3.bf16.msra.mxu0 %v4358_v4 }
 0x2d3   :  { %3632 = vmatprep.subr.bf16.mxu0 %v4191_v1 }
 0x3a0   :  { %v378_v39 = vpop.f32.mrb[8].mxu0 }
 0x3a1   :  { %v385_v40 = vrot.slane %v378_v39, 4  ;;  %v3606_v41 = vpop.f32.mrb[9].mxu0 }
 0x3a2   :  { %v381_v42 = vpop.f32.mrb[10].mxu0 }
 0x3a3   :  { %v387_v43 = vadd.f32 %v385_v40, %v171_v20  ;;  %v3607_v44 = vpop.f32.mrb[11].mxu0 }
 0x3a5   :  { %4053 = vtanh.f32 %v387_v43 }
 0x3af   :  { %v4054_v45 = vpop.eup %4053 }
 0x3b0   :  { %389 = vst.msk [vmem:[#allocation2 + $0x8] sm:$0xf0] %vm289_vm3, %v4054_v45  ;;  %v390_v46 = vpack.c.bf16 %v4054_v45, %v4054_v45 }
 0x3b2   :  { %v392_v47 = vrot.slane %v390_v46, 2 }
 0x3b4   :  { %3613 = vmatmul.mubr.msk.bf16.vlgmr.msra.gmra.mrb[8].mxu1 %vm126_vm0, %v392_v47 }
 0x3b5   :  { %3625 = vmatpush3.bf16.msra.mxu1 %v4015_v55  ;;  %3628 = vmatprep.mubr.msk.bf16.mxu1 %vm126_vm0, %v4018_v58 }
 0x3b6   :  { %3626 = vmatprep.subr.bf16.mxu1 %v4016_v56 }
 0x3b9   :  { %3627 = vmatpush3.bf16.msra.mxu1 %v4016_v56 }
 0x3ba   :  { %3640 = vmatprep.subr.bf16.mxu1 %v4191_v1 }
 0x3bc   :  { %3629 = vmatmul.mubr.msk.bf16.vlgmr.msra.gmra.mrb[12].mxu1 %vm126_vm0, %v4019_v59 }
 0x3bd   :  { %3641 = vmatpush3.bf16.msra.mxu1 %v4431_v57  ;;  %3644 = vmatprep.mubr.msk.bf16.mxu1 %vm4192_vm1, %v4191_v1 }
 0x3be   :  { %3642 = vmatprep.subr.bf16.mxu1 %v4191_v1 }
 0x3c1   :  { %3643 = vmatpush3.bf16.msra.mxu1 %v4447_v60 }
 0x3c2   :  { %3656 = vmatprep.subr.bf16.mxu1 %v4191_v1 }
 0x487   :  { %v430_v48 = vpop.f32.mrb[8].mxu1 }
 0x488   :  { %v436_v49 = vadd.f32 %v430_v48, %v4390_v11  ;;  %v3614_v50 = vpop.f32.mrb[9].mxu1 }
 0x489   :  { %v433_v51 = vpop.f32.mrb[10].mxu1  ;;  %v993_v50 = vld [vmem:[#allocation2] sm:$0xff] }
 0x48a   :  { %4055 = vtanh.f32 %v436_v49  ;;  %v3615_v52 = vpop.f32.mrb[11].mxu1  ;;  %v994_v49 = vld [vmem:[#allocation2 + $0x8] sm:$0xff] }
 0x48b   :  { %v1006_v51 = vpack.c.bf16 %v994_v49, %v993_v50 }
 0x48f   :  { %v3630_v9 = vpop.f32.mrb[12].mxu1 }
 0x490   :  { %v4469_v10 = vadd.f32 %v3630_v9, %v3312_v8 }
 0x494   :  { %v4056_v53 = vpop.eup %4055 }
 0x495   :  { %438 = vst.msk [vmem:[#allocation2 + $0x10] sm:$0xf] %vm238_vm2, %v4056_v53  ;;  %v439_v54 = vpack.c.bf16 %v4056_v53, %v4056_v53 }
 0x497   :  { %3621 = vmatmul.mubr.msk.bf16.vlgmr.msra.gmra.mrb[12].mxu0 %vm126_vm0, %v439_v54 }
 0x498   :  { %3636 = vmatprep.mubr.msk.bf16.mxu0 %vm4192_vm1, %v4191_v1  ;;  %3633 = vmatpush3.bf16.msra.mxu0 %v4431_v57 }
 0x499   :  { %3634 = vmatprep.subr.bf16.mxu0 %v4191_v1 }
 0x49c   :  { %3635 = vmatpush3.bf16.msra.mxu0 %v4447_v60 }
 0x49d   :  { %3648 = vmatprep.subr.bf16.mxu0 %v4191_v1 }
 0x56a   :  { %v477_v61 = vpop.f32.mrb[12].mxu0 }
 0x56b   :  { %v484_v62 = vrot.slane %v477_v61, 4  ;;  %v3622_v63 = vpop.f32.mrb[13].mxu0 }
 0x56c   :  { %v480_v0 = vpop.f32.mrb[14].mxu0 }
 0x56d   :  { %v486_v2 = vadd.f32 %v484_v62, %v4390_v11  ;;  %v3623_v3 = vpop.f32.mrb[15].mxu0  ;;  %v570_v11 = vpop.f32.mrb[13].mxu1 }
 0x56e   :  { %v3631_v12 = vpop.f32.mrb[14].mxu1  ;;  %v571_v16 = vadd.f32 %v3312_v8, %v570_v11 }
 0x56f   :  { %4057 = vtanh.f32 %v486_v2  ;;  %v4471_v13 = vadd.f32 %v3631_v12, %v3312_v8  ;;  %v573_v14 = vpop.f32.mrb[15].mxu1 }
 0x570   :  { %v574_v15 = vadd.f32 %v3312_v8, %v573_v14 }
 0x579   :  { %v4058_v4 = vpop.eup %4057 }
 0x57a   :  { %488 = vst.msk [vmem:[#allocation2 + $0x10] sm:$0xf0] %vm289_vm3, %v4058_v4  ;;  %v585_v5 = vpack.c.bf16 %v4058_v4, %v4058_v4 }
 0x57c   :  { %v587_v6 = vrot.slane %v585_v5, 2 }
 0x57e   :  { %3637 = vmatmul.mubr.msk.bf16.vlgmr.msra.gmra.mrb[16].mxu0 %vm126_vm0, %v587_v6 }
 0x57f   :  { %3649 = vmatpush3.bf16.msra.mxu0 %v4431_v57  ;;  %3652 = vmatprep.mubr.msk.bf16.mxu0 %vm4192_vm1, %v4191_v1 }
 0x580   :  { %3650 = vmatprep.subr.bf16.mxu0 %v4191_v1 }
 0x581   :  { %v995_v6 = vld [vmem:[#allocation2 + $0x10] sm:$0xff] }
 0x582   :  { %v1007_v12 = vpack.c.bf16 %v995_v6, %v995_v6  ;;  %v4022_v6 = vld [vmem:[%s5072_s5 + $0x8] sm:$0xff]  }
 0x583   :  { %3651 = vmatpush3.bf16.msra.mxu0 %v4447_v60 }
 0x584   :  { %3664 = vmatprep.subr.bf16.mxu0 %v4191_v1 }
 0x651   :  { %v637_v17 = vpop.f32.mrb[16].mxu0 }
 0x652   :  { %v643_v18 = vadd.f32 %v637_v17, %v571_v16  ;;  %v3638_v19 = vpop.f32.mrb[17].mxu0 }
 0x653   :  { %v640_v20 = vpop.f32.mrb[18].mxu0 }
 0x654   :  { %4059 = vtanh.f32 %v643_v18  ;;  %v3639_v21 = vpop.f32.mrb[19].mxu0 }
 0x655   :  { %v1123_v21 = vsel %vm1122_vm4, %v1007_v12, 0 }
 0x65e   :  { %v4060_v22 = vpop.eup %4059 }
 0x65f   :  { %645 = vst.msk [vmem:[#allocation3] sm:$0xf] %vm238_vm2, %v4060_v22  ;;  %v646_v23 = vpack.c.bf16 %v4060_v22, %v4060_v22 }
 0x661   :  { %3645 = vmatmul.mubr.msk.bf16.vlgmr.msra.gmra.mrb[16].mxu1 %vm126_vm0, %v646_v23 }
 0x662   :  { %3657 = vmatpush3.bf16.msra.mxu1 %v4431_v57  ;;  %3660 = vmatprep.mubr.msk.bf16.mxu1 %vm4192_vm1, %v4191_v1 }
 0x663   :  { %3658 = vmatprep.subr.bf16.mxu1 %v4191_v1 }
 0x666   :  { %3659 = vmatpush3.bf16.msra.mxu1 %v4447_v60 }
 0x667   :  { %3672 = vmatprep.subr.bf16.mxu1 %v4191_v1 }
 0x734   :  { %v684_v24 = vpop.f32.mrb[16].mxu1 }
 0x735   :  { %v691_v25 = vrot.slane %v684_v24, 4  ;;  %v3646_v26 = vpop.f32.mrb[17].mxu1 }
 0x736   :  { %v687_v27 = vpop.f32.mrb[18].mxu1 }
 0x737   :  { %v693_v28 = vadd.f32 %v691_v25, %v571_v16  ;;  %v3647_v29 = vpop.f32.mrb[19].mxu1 }
 0x739   :  { %4061 = vtanh.f32 %v693_v28 }
 0x743   :  { %v4062_v30 = vpop.eup %4061 }
 0x744   :  { %695 = vst.msk [vmem:[#allocation3] sm:$0xf0] %vm289_vm3, %v4062_v30  ;;  %v696_v31 = vpack.c.bf16 %v4062_v30, %v4062_v30 }
 0x746   :  { %v698_v32 = vrot.slane %v696_v31, 2 }
 0x748   :  { %3653 = vmatmul.mubr.msk.bf16.vlgmr.msra.gmra.mrb[20].mxu0 %vm126_vm0, %v698_v32  ;;  %v1002_v32 = vld [vmem:[%s5071_s0 + $0x10] sm:$0xff] }
 0x749   :  { %3665 = vmatpush3.bf16.msra.mxu0 %v4431_v57  ;;  %3668 = vmatprep.mubr.msk.bf16.mxu0 %vm4192_vm1, %v4191_v1 }
 0x74a   :  { %3666 = vmatprep.subr.bf16.mxu0 %v4191_v1 }
 0x74b   :  { %v996_v9 = vld [vmem:[#allocation3] sm:$0xff] }
 0x74d   :  { %3667 = vmatpush3.bf16.msra.mxu0 %v4447_v60 }
 0x74e   :  { %3680 = vmatprep.subr.bf16.mxu0 %v4191_v1 }
 0x81b   :  { %v736_v33 = vpop.f32.mrb[20].mxu0 }
 0x81c   :  { %v742_v34 = vadd.f32 %v736_v33, %v574_v15  ;;  %v3654_v35 = vpop.f32.mrb[21].mxu0 }
 0x81d   :  { %v739_v36 = vpop.f32.mrb[22].mxu0 }
 0x81e   :  { %4063 = vtanh.f32 %v742_v34  ;;  %v3655_v37 = vpop.f32.mrb[23].mxu0  ;;  %v1003_v34 = vld [vmem:[%s5071_s0 + $0x18] sm:$0xff] }
 0x81f   :  { %v1001_v37 = vld [vmem:[%s5071_s0 + $0x8] sm:$0xff] }
 0x828   :  { %v4064_v38 = vpop.eup %4063 }
 0x829   :  { %744 = vst.msk [vmem:[#allocation3 + $0x8] sm:$0xf] %vm238_vm2, %v4064_v38  ;;  %v745_v39 = vpack.c.bf16 %v4064_v38, %v4064_v38 }
 0x82b   :  { %3661 = vmatmul.mubr.msk.bf16.vlgmr.msra.gmra.mrb[20].mxu1 %vm126_vm0, %v745_v39 }
 0x82c   :  { %3673 = vmatpush3.bf16.msra.mxu1 %v4431_v57  ;;  %3676 = vmatprep.mubr.msk.bf16.mxu1 %vm4192_vm1, %v4191_v1 }
 0x82d   :  { %3674 = vmatprep.subr.bf16.mxu1 %v4191_v1 }
 0x830   :  { %3675 = vmatpush3.bf16.msra.mxu1 %v4447_v60 }
 0x831   :  { %3688 = vmatprep.subr.bf16.mxu1 %v4191_v1 }
 0x8fe   :  { %v783_v40 = vpop.f32.mrb[20].mxu1 }
 0x8ff   :  { %v790_v41 = vrot.slane %v783_v40, 4  ;;  %v3662_v42 = vpop.f32.mrb[21].mxu1 }
 0x900   :  { %v786_v43 = vpop.f32.mrb[22].mxu1 }
 0x901   :  { %v792_v44 = vadd.f32 %v790_v41, %v574_v15  ;;  %v3663_v45 = vpop.f32.mrb[23].mxu1 }
 0x903   :  { %4065 = vtanh.f32 %v792_v44 }
 0x90d   :  { %v4066_v46 = vpop.eup %4065 }
 0x90e   :  { %794 = vst.msk [vmem:[#allocation3 + $0x8] sm:$0xf0] %vm289_vm3, %v4066_v46  ;;  %v795_v47 = vpack.c.bf16 %v4066_v46, %v4066_v46 }
 0x910   :  { %v797_v48 = vrot.slane %v795_v47, 2 }
 0x912   :  { %3669 = vmatmul.mubr.msk.bf16.vlgmr.msra.gmra.mrb[24].mxu0 %vm126_vm0, %v797_v48 }
 0x913   :  { %3681 = vmatpush3.bf16.msra.mxu0 %v4431_v57  ;;  %3684 = vmatprep.mubr.msk.bf16.mxu0 %vm4192_vm1, %v4191_v1 }
 0x914   :  { %3682 = vmatprep.subr.bf16.mxu0 %v4191_v1 }
 0x915   :  { %v997_v5 = vld [vmem:[#allocation3 + $0x8] sm:$0xff] }
 0x916   :  { %v4515_v11 = vpack.c.bf16 %v997_v5, %v996_v9  ;;  %v4021_v5 = vld [vmem:[%s5072_s5] sm:$0xff]   ;;  %v4024_v9 = vld [vmem:[%s5070_s1 + $0x8] sm:$0xff]  }
 0x917   :  { %3683 = vmatpush3.bf16.msra.mxu0 %v4447_v60 }
 0x918   :  { %4000 = vmatprep.subr.msk.bf16.mxu0 %vm126_vm0, %v1006_v51 }
 0x9e5   :  { %v835_v52 = vpop.f32.mrb[24].mxu0 }
 0x9e6   :  { %v841_v53 = vadd.f32 %v835_v52, %v4469_v10  ;;  %v3670_v54 = vpop.f32.mrb[25].mxu0 }
 0x9e7   :  { %v838_v55 = vpop.f32.mrb[26].mxu0 }
 0x9e8   :  { %4067 = vtanh.f32 %v841_v53  ;;  %v3671_v56 = vpop.f32.mrb[27].mxu0 }
 0x9f2   :  { %v4068_v58 = vpop.eup %4067 }
 0x9f3   :  { %843 = vst.msk [vmem:[#allocation3 + $0x10] sm:$0xf] %vm238_vm2, %v4068_v58  ;;  %v844_v59 = vpack.c.bf16 %v4068_v58, %v4068_v58 }
 0x9f5   :  { %3677 = vmatmul.mubr.msk.bf16.vlgmr.msra.gmra.mrb[24].mxu1 %vm126_vm0, %v844_v59 }
 0x9f6   :  { %3689 = vmatpush3.bf16.msra.mxu1 %v4431_v57  ;;  %3692 = vmatprep.mubr.msk.bf16.mxu1 %vm4192_vm1, %v4191_v1 }
 0x9f7   :  { %3690 = vmatprep.subr.bf16.mxu1 %v4191_v1 }
 0x9fa   :  { %3691 = vmatpush3.bf16.msra.mxu1 %v4447_v60  ;;  %v1015_v60 = vsel %vm126_vm0, %v1006_v51, 0 }
 0x9fb   :  { %3704 = vmatprep.subr.bf16.mxu1 %v1006_v51 }
 0xac8   :  { %v882_v61 = vpop.f32.mrb[24].mxu1 }
 0xac9   :  { %v889_v62 = vrot.slane %v882_v61, 4  ;;  %v3678_v63 = vpop.f32.mrb[25].mxu1 }
 0xaca   :  { %v885_v0 = vpop.f32.mrb[26].mxu1 }
 0xacb   :  { %v891_v2 = vadd.f32 %v889_v62, %v4469_v10  ;;  %v3679_v3 = vpop.f32.mrb[27].mxu1  ;;  %v1018_v10 = vsel %vm126_vm0, %v1007_v12, 0 }
 0xacd   :  { %4069 = vtanh.f32 %v891_v2 }
 0xad7   :  { %v4070_v4 = vpop.eup %4069 }
 0xad8   :  { %893 = vst.msk [vmem:[#allocation3 + $0x10] sm:$0xf0] %vm289_vm3, %v4070_v4  ;;  %v894_v57 = vpack.c.bf16 %v4070_v4, %v4070_v4 }
 0xada   :  { %v896_v8 = vrot.slane %v894_v57, 2 }
 0xadc   :  { %3685 = vmatmul.mubr.msk.bf16.vlgmr.msra.gmra.mrb[28].mxu0 %vm126_vm0, %v896_v8  ;;  %v4023_v8 = vld [vmem:[%s5070_s1] sm:$0xff]  }
 0xadd   :  { %3697 = vmatpush3.bf16.xpose.msra.mxu0 %v1015_v60  ;;  %3700 = vmatprep.mubr.msk.bf16.mxu0 %vm126_vm0, %v4515_v11  ;;  %v4568_v60 = vld [vmem:[%s5073_s7] sm:$0xff]  }
 0xade   :  { %4001 = vmatprep.subr.msk.bf16.mxu0 %vm126_vm0, %v1007_v12 }
 0xadf   :  { %v998_v29 = vld [vmem:[#allocation3 + $0x10] sm:$0xff] }
 0xae5   :  { %3699 = vmatpush3.bf16.xpose.msra.mxu0 %v1018_v10  ;;  %v4027_v10 = vld [vmem:[%s5031_s17] sm:$0xff]  }
 0xae6   :  { %3728 = vmatprep.subr.bf16.mxu0 %v4021_v5 }
 0xbaf   :  { %v934_v14 = vpop.f32.mrb[28].mxu0 }
 0xbb0   :  { %v940_v15 = vadd.f32 %v934_v14, %v4471_v13  ;;  %v3686_v16 = vpop.f32.mrb[29].mxu0 }
 0xbb1   :  { %v937_v17 = vpop.f32.mrb[30].mxu0 }
 0xbb2   :  { %4071 = vtanh.f32 %v940_v15  ;;  %v3687_v18 = vpop.f32.mrb[31].mxu0 }
 0xbbc   :  { %v4072_v19 = vpop.eup %4071 }
 0xbbd   :  { %942 = vst.msk [vmem:[#allocation3 + $0x18] sm:$0xf] %vm238_vm2, %v4072_v19  ;;  %v943_v20 = vpack.c.bf16 %v4072_v19, %v4072_v19 }
 0xbbf   :  { %3693 = vmatmul.mubr.msk.bf16.vlgmr.msra.gmra.mrb[28].mxu1 %vm126_vm0, %v943_v20 }
 0xbc0   :  { %3705 = vmatpush3.bf16.msra.mxu1 %v1006_v51 }
 0xbc1   :  { %4002 = vmatprep.subr.msk.bf16.mxu1 %vm1122_vm4, %v1007_v12  ;;  %v4579_v12 = vld [vmem:[%s5073_s7 + $0x8] sm:$0xff]  }
 0xbc4   :  { %3707 = vmatpush3.bf16.msra.mxu1 %v1123_v21 }
 0xbc5   :  { %3712 = vmatprep.subr.bf16.mxu1 %v4027_v10 }
 0xc92   :  { %v981_v22 = vpop.f32.mrb[28].mxu1 }
 0xc93   :  { %v988_v23 = vrot.slane %v981_v22, 4  ;;  %v3694_v24 = vpop.f32.mrb[29].mxu1 }
 0xc94   :  { %v984_v25 = vpop.f32.mrb[30].mxu1 }
 0xc95   :  { %v990_v26 = vadd.f32 %v988_v23, %v4471_v13  ;;  %v3695_v27 = vpop.f32.mrb[31].mxu1  ;;  %v1000_v13 = vld [vmem:[%s5071_s0] sm:$0xff]  ;;  %s5075_s0 = sld [smem:[#allocation12_spill]] }
 0xc97   :  { %4073 = vtanh.f32 %v990_v26 }
 0xca1   :  { %v4074_v28 = vpop.eup %4073 }
 0xca2   :  { %992 = vst.msk [vmem:[#allocation3 + $0x18] sm:$0xf0] %vm289_vm3, %v4074_v28 }
 0xca9   :  { %v999_v30 = vld [vmem:[#allocation3 + $0x18] sm:$0xff] }
 0xcaa   :  { %v4528_v31 = vpack.c.bf16 %v999_v30, %v998_v29  ;;  %v3342_v29 = vld [vmem:[%s5074_s14] ss:$0 sm:$0xff] }
 0xcac   :  { %3701 = vmatmul.mubr.msk.bf16.vlgmr.msra.gmra.mrb[32].mxu0 %vm126_vm0, %v4528_v31 }
 0xcad   :  { %3729 = vmatpush3.bf16.msra.mxu0 %v4021_v5  ;;  %3732 = vmatprep.mubr.msk.bf16.mxu0 %vm126_vm0, %v4023_v8 }
 0xcae   :  { %3730 = vmatprep.subr.bf16.mxu0 %v4022_v6 }
 0xcb1   :  { %3731 = vmatpush3.bf16.msra.mxu0 %v4022_v6 }
 0xcb2   :  { %3736 = vmatprep.subr.bf16.mxu0 %v4191_v1 }
 0xcb4   :  { %3733 = vmatmul.mubr.msk.bf16.vlgmr.msra.gmra.mrb[36].mxu0 %vm126_vm0, %v4024_v9 }
 0xcb5   :  { %3737 = vmatpush3.bf16.msra.mxu0 %v4568_v60  ;;  %3740 = vmatprep.mubr.msk.bf16.mxu0 %vm4192_vm1, %v4191_v1 }
 0xcb6   :  { %3738 = vmatprep.subr.bf16.mxu0 %v4191_v1 }
 0xcb9   :  { %3739 = vmatpush3.bf16.msra.mxu0 %v4579_v12 }
 0xcba   :  { %3752 = vmatprep.subr.bf16.mxu0 %v4191_v1 }
 0xcbc   :  { %3741 = vmatmul.mubr.bf16.vlgmr.msra.gmra.mrb[40].mxu0 %v4193_v7 }
 0xcbd   :  { %3753 = vmatpush3.bf16.msra.mxu0 %v4568_v60  ;;  %3756 = vmatprep.mubr.msk.bf16.mxu0 %vm4192_vm1, %v4191_v1 }
 0xcbe   :  { %3754 = vmatprep.subr.bf16.mxu0 %v4191_v1 }
 0xcc1   :  { %3755 = vmatpush3.bf16.msra.mxu0 %v4579_v12 }
 0xcc2   :  { %3768 = vmatprep.subr.bf16.mxu0 %v4191_v1 }
 0xd7f   :  { %v3702_v33 = vpop.f32.mrb[32].mxu0 }
 0xd80   :  { %v1063_v35 = vadd.f32 %v3702_v33, %v1002_v32  ;;  %v1054_v36 = vpop.f32.mrb[33].mxu0 }
 0xd81   :  { %v1055_v38 = vadd.f32 %v1054_v36, %v1000_v13  ;;  %v3703_v39 = vpop.f32.mrb[34].mxu0  ;;  %v4028_v13 = vld [vmem:[%s5031_s17 + $0x8] sm:$0xff]  }
 0xd82   :  { %v1066_v40 = vadd.f32 %v3703_v39, %v1003_v34  ;;  %v1057_v41 = vpop.f32.mrb[35].mxu0  ;;  %v1076_v42 = vsel %vm1069_vm5, %v1063_v35, -inf  ;;  %v4029_v39 = vld [vmem:[%s5030_s16] sm:$0xff]  }
 0xd83   :  { %v1058_v43 = vadd.f32 %v1057_v41, %v1001_v37  ;;  %1077 = vmax.xlane.f32.xlu1 %v1076_v42  ;;  %v1070_v44 = vsel %vm1069_vm5, %v1055_v38, -inf }
 0xd84   :  { %1071 = vmax.xlane.f32.xlu0 %v1070_v44  ;;  %v1079_v45 = vsel %vm1069_vm5, %v1066_v40, -inf }
 0xd85   :  { %v1073_v46 = vsel %vm1069_vm5, %v1058_v43, -inf }
 0xd87   :  { %1080 = vmax.xlane.f32.xlu1 %v1079_v45  ;;  %v3734_v28 = vpop.f32.mrb[36].mxu0 }
 0xd88   :  { %1074 = vmax.xlane.f32.xlu0 %v1073_v46  ;;  %v4598_v30 = vadd.f32 %v3734_v28, %v3342_v29  ;;  %v1408_v32 = vpop.f32.mrb[37].mxu0 }
 0xd89   :  { %v1409_v33 = vadd.f32 %v3342_v29, %v1408_v32  ;;  %v3735_v34 = vpop.f32.mrb[38].mxu0 }
 0xd8a   :  { %v1411_v36 = vpop.f32.mrb[39].mxu0 }
 0xd8b   :  { %v4605_v37 = vadd.f32 %v3342_v29, %v1411_v36 }
 0xe10   :  { %v1078_v47 = vpop.xlane.xlu1 %1077 }
 0xe11   :  { %v1084_v48 = vsub.f32 %v1063_v35, %v1078_v47  ;;  %v1072_v49 = vpop.xlane.xlu0 %1071  ;;  %v4603_v35 = vadd.f32 %v3735_v34, %v3342_v29 }
 0xe12   :  { %v1082_v50 = vsub.f32 %v1055_v38, %v1072_v49  ;;  %v1469_v38 = vpop.f32.mrb[40].mxu0 }
 0xe13   :  { %v1090_v51 = vmul.f32 1.442695, %v1084_v48  ;;  %v3742_v41 = vpop.f32.mrb[41].mxu0 }
 0xe14   :  { %v1086_v52 = vmul.f32 1.442695, %v1082_v50  ;;  %v1081_v53 = vpop.xlane.xlu1 %1080  ;;  %v1472_v42 = vpop.f32.mrb[42].mxu0 }
 0xe15   :  { %v1085_v54 = vsub.f32 %v1066_v40, %v1081_v53  ;;  %v1075_v55 = vpop.xlane.xlu0 %1074  ;;  %v1475_v40 = vadd.f32 %v1469_v38, %v1409_v33 }
 0xe16   :  { %4075 = vpow2.f32 %v1086_v52  ;;  %v1083_v56 = vsub.f32 %v1058_v43, %v1075_v55  ;;  %v3743_v43 = vpop.f32.mrb[43].mxu0 }
 0xe17   :  { %4077 = vpow2.f32 %v1090_v51  ;;  %v1092_v58 = vmul.f32 1.442695, %v1085_v54  ;;  %v4030_v51 = vld [vmem:[%s5030_s16 + $0x8] sm:$0xff]  }
 0xe18   :  { %v1088_v59 = vmul.f32 1.442695, %v1083_v56 }
 0xe1a   :  { %4079 = vpow2.f32 %v1088_v59 }
 0xe1b   :  { %4081 = vpow2.f32 %v1092_v58 }
 0xe20   :  { %v4076_v61 = vpop.eup %4075 }
 0xe21   :  { %v1094_v62 = vsel %vm1069_vm5, %v4076_v61, 0.0  ;;  %v4078_v63 = vpop.eup %4077 }
 0xe22   :  { %1095 = vadd.xlane.f32.xlu0 %v1094_v62  ;;  %v1100_v2 = vsel %vm1069_vm5, %v4078_v63, 0.0 }
 0xe24   :  { %v4080_v0 = vpop.eup %4079 }
 0xe25   :  { %v1097_v3 = vsel %vm1069_vm5, %v4080_v0, 0.0  ;;  %v4082_v4 = vpop.eup %4081 }
 0xe26   :  { %1101 = vadd.xlane.f32.xlu0 %v1100_v2  ;;  %1098 = vadd.xlane.f32.xlu1 %v1097_v3  ;;  %v1103_v57 = vsel %vm1069_vm5, %v4082_v4, 0.0 }
 0xe2a   :  { %1104 = vadd.xlane.f32.xlu1 %v1103_v57 }
 0xeaf   :  { %v1096_v14 = vpop.xlane.xlu0 %1095 }
 0xeb0   :  { %4083 = vrcp.f32 %v1096_v14 }
 0xeb3   :  { %v1099_v15 = vpop.xlane.xlu1 %1098  ;;  %v1102_v16 = vpop.xlane.xlu0 %1101 }
 0xeb4   :  { %4085 = vrcp.f32 %v1099_v15 }
 0xeb5   :  { %4087 = vrcp.f32 %v1102_v16 }
 0xeb7   :  { %v1105_v17 = vpop.xlane.xlu1 %1104 }
 0xeb8   :  { %4089 = vrcp.f32 %v1105_v17 }
 0xeb9   :  { %4091 = vtanh.f32 %v1475_v40 }
 0xeba   :  { %v4084_v18 = vpop.eup %4083 }
 0xebb   :  { %v1110_v20 = vmul.f32 %v4084_v18, %v4076_v61 }
 0xebe   :  { %v4086_v19 = vpop.eup %4085 }
 0xebf   :  { %v1111_v21 = vmul.f32 %v4086_v19, %v4080_v0  ;;  %v4088_v22 = vpop.eup %4087 }
 0xec0   :  { %v1112_v25 = vmul.f32 %v4088_v22, %v4078_v63 }
 0xec1   :  { %v1114_v23 = vpack.c.bf16 %v1111_v21, %v1110_v20 }
 0xec2   :  { %v4090_v24 = vpop.eup %4089 }
 0xec3   :  { %v1113_v26 = vmul.f32 %v4090_v24, %v4082_v4  ;;  %3708 = vmatprep.mubr.msk.bf16.mxu1 %vm1069_vm5, %v1114_v23  ;;  %v4092_v44 = vpop.eup %4091 }
 0xec4   :  { %1477 = vst.msk [vmem:[#allocation4] sm:$0xf] %vm238_vm2, %v4092_v44  ;;  %v1478_v52 = vpack.c.bf16 %v4092_v44, %v4092_v44 }
 0xec5   :  { %v1115_v27 = vpack.c.bf16 %v1113_v26, %v1112_v25 }
 0xec7   :  { %3709 = vmatmul.mubr.msk.bf16.vlgmr.msra.gmra.mrb[32].mxu1 %vm1069_vm5, %v1115_v27 }
 0xec8   :  { %3713 = vmatpush3.bf16.msra.mxu1 %v4027_v10 }
 0xec9   :  { %3714 = vmatprep.subr.bf16.mxu1 %v4028_v13 }
 0xecc   :  { %3715 = vmatpush3.bf16.msra.mxu1 %v4028_v13 }
 0xecd   :  { %3720 = vmatprep.subr.bf16.mxu1 %v4029_v39 }
 0xf9a   :  { %v3710_v45 = vpop.f32.mrb[32].mxu1 }
 0xf9b   :  { %v1159_v46 = vpop.f32.mrb[33].mxu1 }
 0xf9c   :  { %v3711_v47 = vpop.f32.mrb[34].mxu1 }
 0xf9d   :  { %v1183_v48 = vpack.c.bf16 %v3711_v47, %v3710_v45  ;;  %v1162_v49 = vpop.f32.mrb[35].mxu1 }
 0xf9e   :  { %v1182_v50 = vpack.c.bf16 %v1162_v49, %v1159_v46 }
 0xfa0   :  { %3716 = vmatprep.mubr.msk.bf16.mxu1 %vm126_vm0, %v1182_v50  ;;  %v4034_v50 = vld [vmem:[%s5075_s0] sm:$0xff]  }
 0xfa1   :  { %3717 = vmatmul.mubr.msk.bf16.vlgmr.msra.gmra.mrb[36].mxu1 %vm126_vm0, %v1183_v48 }
 0xfa2   :  { %3721 = vmatpush3.bf16.msra.mxu1 %v4029_v39  ;;  %3724 = vmatprep.mubr.msk.bf16.mxu1 %vm126_vm0, %v4515_v11  ;;  %v3341_v11 = vld [vmem:[%s5032_s18] ss:$0 sm:$0xff] }
 0xfa3   :  { %3722 = vmatprep.subr.bf16.mxu1 %v4030_v51 }
 0xfa6   :  { %3723 = vmatpush3.bf16.msra.mxu1 %v4030_v51  ;;  %v4723_v51 = vld [vmem:[%s5067_s6] sm:$0xff]  }
 0xfa7   :  { %3744 = vmatprep.subr.bf16.mxu1 %v4191_v1 }
 0xfad   :  { %3725 = vmatmul.mubr.msk.bf16.vlgmr.msra.gmra.mrb[36].mxu1 %vm126_vm0, %v4528_v31 }
 0xfae   :  { %3745 = vmatpush3.bf16.msra.mxu1 %v4568_v60  ;;  %3748 = vmatprep.mubr.msk.bf16.mxu1 %vm4192_vm1, %v4191_v1 }
 0xfaf   :  { %3746 = vmatprep.subr.bf16.mxu1 %v4191_v1 }
 0xfb2   :  { %3747 = vmatpush3.bf16.msra.mxu1 %v4579_v12 }
 0xfb3   :  { %3760 = vmatprep.subr.bf16.mxu1 %v4191_v1 }
 0xfb5   :  { %3749 = vmatmul.mubr.msk.bf16.vlgmr.msra.gmra.mrb[40].mxu1 %vm126_vm0, %v1478_v52  ;;  %v4733_v52 = vld [vmem:[%s5067_s6 + $0x8] sm:$0xff]  }
 0xfb6   :  { %3761 = vmatpush3.bf16.msra.mxu1 %v4568_v60  ;;  %3764 = vmatprep.mubr.msk.bf16.mxu1 %vm4192_vm1, %v4191_v1 }
 0xfb7   :  { %3762 = vmatprep.subr.bf16.mxu1 %v4191_v1 }
 0xfba   :  { %3763 = vmatpush3.bf16.msra.mxu1 %v4579_v12 }
 0xfbb   :  { %3776 = vmatprep.subr.bf16.mxu1 %v4191_v1 }
0x1080   :  { %v3726_v31 = vpop.f32.mrb[36].mxu1 }
0x1081   :  { %v1321_v53 = vadd.f32 %v3726_v31, %v3341_v11  ;;  %v1297_v54 = vpop.f32.mrb[37].mxu1 }
0x1082   :  { %v1319_v55 = vadd.f32 %v3341_v11, %v1297_v54  ;;  %v3727_v56 = vpop.f32.mrb[38].mxu1 }
0x1083   :  { %4093 = vtanh.f32 %v1321_v53  ;;  %v1322_v58 = vadd.f32 %v3727_v56, %v3341_v11  ;;  %v1300_v59 = vpop.f32.mrb[39].mxu1 }
0x1084   :  { %4095 = vtanh.f32 %v1319_v55  ;;  %v1320_v61 = vadd.f32 %v3341_v11, %v1300_v59 }
0x1085   :  { %4097 = vtanh.f32 %v1322_v58 }
0x1086   :  { %4099 = vtanh.f32 %v1320_v61 }
0x1088   :  { %v1516_v62 = vpop.f32.mrb[40].mxu1 }
0x1089   :  { %v1523_v63 = vrot.slane %v1516_v62, 4  ;;  %v3750_v0 = vpop.f32.mrb[41].mxu1 }
0x108a   :  { %v1519_v2 = vpop.f32.mrb[42].mxu1 }
0x108b   :  { %v1525_v3 = vadd.f32 %v1523_v63, %v1409_v33  ;;  %v3751_v4 = vpop.f32.mrb[43].mxu1  ;;  %v3358_v63 = vld [vmem:[%s5069_s30] ss:$0 sm:$0xff] }
0x108d   :  { %v4637_v57 = vpop.eup %4093  ;;  %4101 = vtanh.f32 %v1525_v3 }
0x108e   :  { %v4639_v5 = vpop.eup %4095  ;;  %1831 = vst.msk [vmem:[%s5042_s28 + $0x10] sm:$0xff] %vm126_vm0, %v4637_v57 }
0x108f   :  { %v4646_v6 = vpop.eup %4097  ;;  %1829 = vst.msk [vmem:[%s5042_s28] sm:$0xff] %vm126_vm0, %v4639_v5 }
0x1090   :  { %v4653_v8 = vpop.eup %4099  ;;  %1832 = vst.msk [vmem:[%s5042_s28 + $0x18] sm:$0xf] %vm238_vm2, %v4646_v6  ;;  %v2831_v9 = vpack.c.bf16 %v4646_v6, %v4637_v57 }
0x1091   :  { %1830 = vst.msk [vmem:[%s5042_s28 + $0x8] sm:$0xff] %vm126_vm0, %v4653_v8  ;;  %v2830_v10 = vpack.c.bf16 %v4653_v8, %v4639_v5 }
0x1097   :  { %v4102_v14 = vpop.eup %4101 }
0x1098   :  { %1527 = vst.msk [vmem:[#allocation4] sm:$0xf0] %vm289_vm3, %v4102_v14  ;;  %v1528_v15 = vpack.c.bf16 %v4102_v14, %v4102_v14 }
0x109a   :  { %v1530_v16 = vrot.slane %v1528_v15, 2 }
0x109c   :  { %3757 = vmatmul.mubr.msk.bf16.vlgmr.msra.gmra.mrb[44].mxu0 %vm126_vm0, %v1530_v16 }
0x109d   :  { %3769 = vmatpush3.bf16.msra.mxu0 %v4568_v60  ;;  %3772 = vmatprep.mubr.msk.bf16.mxu0 %vm4192_vm1, %v4191_v1 }
0x109e   :  { %3770 = vmatprep.subr.bf16.mxu0 %v4191_v1 }
0x10a1   :  { %3771 = vmatpush3.bf16.msra.mxu0 %v4579_v12 }
0x10a2   :  { %3784 = vmatprep.subr.bf16.mxu0 %v4191_v1 }
0x116f   :  { %v1568_v17 = vpop.f32.mrb[44].mxu0 }
0x1170   :  { %v1574_v18 = vadd.f32 %v1568_v17, %v4605_v37  ;;  %v3758_v19 = vpop.f32.mrb[45].mxu0 }
0x1171   :  { %v1571_v20 = vpop.f32.mrb[46].mxu0 }
0x1172   :  { %4103 = vtanh.f32 %v1574_v18  ;;  %v3759_v21 = vpop.f32.mrb[47].mxu0 }
0x117c   :  { %v4104_v22 = vpop.eup %4103 }
0x117d   :  { %1576 = vst.msk [vmem:[#allocation4 + $0x8] sm:$0xf] %vm238_vm2, %v4104_v22  ;;  %v1577_v23 = vpack.c.bf16 %v4104_v22, %v4104_v22 }
0x117f   :  { %3765 = vmatmul.mubr.msk.bf16.vlgmr.msra.gmra.mrb[44].mxu1 %vm126_vm0, %v1577_v23 }
0x1180   :  { %3777 = vmatpush3.bf16.msra.mxu1 %v4568_v60  ;;  %3780 = vmatprep.mubr.msk.bf16.mxu1 %vm4192_vm1, %v4191_v1 }
0x1181   :  { %3778 = vmatprep.subr.bf16.mxu1 %v4191_v1 }
0x1184   :  { %3779 = vmatpush3.bf16.msra.mxu1 %v4579_v12 }
0x1185   :  { %3792 = vmatprep.subr.bf16.mxu1 %v4191_v1 }
0x1252   :  { %v1615_v24 = vpop.f32.mrb[44].mxu1 }
0x1253   :  { %v1622_v25 = vrot.slane %v1615_v24, 4  ;;  %v3766_v26 = vpop.f32.mrb[45].mxu1 }
0x1254   :  { %v1618_v27 = vpop.f32.mrb[46].mxu1 }
0x1255   :  { %v1624_v28 = vadd.f32 %v1622_v25, %v4605_v37  ;;  %v3767_v29 = vpop.f32.mrb[47].mxu1 }
0x1257   :  { %4105 = vtanh.f32 %v1624_v28 }
0x1261   :  { %v4106_v32 = vpop.eup %4105 }
0x1262   :  { %1626 = vst.msk [vmem:[#allocation4 + $0x8] sm:$0xf0] %vm289_vm3, %v4106_v32  ;;  %v1627_v13 = vpack.c.bf16 %v4106_v32, %v4106_v32 }
0x1264   :  { %v1629_v33 = vrot.slane %v1627_v13, 2 }
0x1266   :  { %3773 = vmatmul.mubr.msk.bf16.vlgmr.msra.gmra.mrb[48].mxu0 %vm126_vm0, %v1629_v33 }
0x1267   :  { %3785 = vmatpush3.bf16.msra.mxu0 %v4568_v60  ;;  %3788 = vmatprep.mubr.msk.bf16.mxu0 %vm4192_vm1, %v4191_v1 }
0x1268   :  { %3786 = vmatprep.subr.bf16.mxu0 %v4191_v1 }
0x126b   :  { %3787 = vmatpush3.bf16.msra.mxu0 %v4579_v12 }
0x126c   :  { %3800 = vmatprep.subr.bf16.mxu0 %v4191_v1 }
0x1339   :  { %v1667_v34 = vpop.f32.mrb[48].mxu0 }
0x133a   :  { %v1673_v36 = vadd.f32 %v1667_v34, %v4598_v30  ;;  %v3774_v37 = vpop.f32.mrb[49].mxu0 }
0x133b   :  { %v1670_v38 = vpop.f32.mrb[50].mxu0 }
0x133c   :  { %4107 = vtanh.f32 %v1673_v36  ;;  %v3775_v39 = vpop.f32.mrb[51].mxu0 }
0x1346   :  { %v4108_v40 = vpop.eup %4107 }
0x1347   :  { %1675 = vst.msk [vmem:[#allocation4 + $0x10] sm:$0xf] %vm238_vm2, %v4108_v40  ;;  %v1676_v41 = vpack.c.bf16 %v4108_v40, %v4108_v40 }
0x1349   :  { %3781 = vmatmul.mubr.msk.bf16.vlgmr.msra.gmra.mrb[48].mxu1 %vm126_vm0, %v1676_v41 }
0x134a   :  { %3793 = vmatpush3.bf16.msra.mxu1 %v4568_v60  ;;  %3796 = vmatprep.mubr.msk.bf16.mxu1 %vm4192_vm1, %v4191_v1 }
0x134b   :  { %3794 = vmatprep.subr.bf16.mxu1 %v4191_v1 }
0x134e   :  { %3795 = vmatpush3.bf16.msra.mxu1 %v4579_v12  ;;  %v4031_v12 = vld [vmem:[%s5066_s9] sm:$0xff]  }
0x134f   :  { %3808 = vmatprep.subr.bf16.mxu1 %v4191_v1 }
0x141c   :  { %v1714_v42 = vpop.f32.mrb[48].mxu1 }
0x141d   :  { %v1721_v43 = vrot.slane %v1714_v42, 4  ;;  %v3782_v44 = vpop.f32.mrb[49].mxu1 }
0x141e   :  { %v1717_v45 = vpop.f32.mrb[50].mxu1 }
0x141f   :  { %v1723_v46 = vadd.f32 %v1721_v43, %v4598_v30  ;;  %v3783_v47 = vpop.f32.mrb[51].mxu1  ;;  %v4032_v30 = vld [vmem:[%s5066_s9 + $0x8] sm:$0xff]  }
0x1421   :  { %4109 = vtanh.f32 %v1723_v46 }
0x142b   :  { %v4110_v48 = vpop.eup %4109 }
0x142c   :  { %1725 = vst.msk [vmem:[#allocation4 + $0x10] sm:$0xf0] %vm289_vm3, %v4110_v48  ;;  %v1726_v60 = vpack.c.bf16 %v4110_v48, %v4110_v48 }
0x142e   :  { %v1728_v49 = vrot.slane %v1726_v60, 2 }
0x1430   :  { %3789 = vmatmul.mubr.msk.bf16.vlgmr.msra.gmra.mrb[52].mxu0 %vm126_vm0, %v1728_v49 }
0x1431   :  { %3804 = vmatprep.mubr.msk.bf16.mxu0 %vm4192_vm1, %v4191_v1  ;;  %3801 = vmatpush3.bf16.msra.mxu0 %v4031_v12 }
0x1432   :  { %3802 = vmatprep.subr.bf16.mxu0 %v4191_v1 }
0x1435   :  { %3803 = vmatpush3.bf16.msra.mxu0 %v4032_v30 }
0x1436   :  { %3816 = vmatprep.subr.bf16.mxu0 %v4191_v1 }
0x1438   :  { %3805 = vmatmul.mubr.msk.bf16.vlgmr.msra.gmra.mrb[56].mxu0 %vm126_vm0, %v4034_v50 }
0x1439   :  { %3817 = vmatpush3.bf16.msra.mxu0 %v4723_v51  ;;  %3820 = vmatprep.mubr.msk.bf16.mxu0 %vm4192_vm1, %v4191_v1 }
0x143a   :  { %3818 = vmatprep.subr.bf16.mxu0 %v4191_v1 }
0x143d   :  { %3819 = vmatpush3.bf16.msra.mxu0 %v4733_v52 }
0x143e   :  { %3832 = vmatprep.subr.bf16.mxu0 %v4191_v1 }
0x1503   :  { %v1766_v11 = vpop.f32.mrb[52].mxu0 }
0x1504   :  { %v1772_v31 = vadd.f32 %v1766_v11, %v4603_v35  ;;  %v3790_v53 = vpop.f32.mrb[53].mxu0 }
0x1505   :  { %v1769_v54 = vpop.f32.mrb[54].mxu0 }
0x1506   :  { %4111 = vtanh.f32 %v1772_v31  ;;  %v3791_v55 = vpop.f32.mrb[55].mxu0 }
0x150b   :  { %v1904_v59 = vpop.f32.mrb[56].mxu0 }
0x150c   :  { %v3806_v61 = vpop.f32.mrb[57].mxu0  ;;  %v1905_v17 = vadd.f32 %v3358_v63, %v1904_v59 }
0x150d   :  { %v1907_v62 = vpop.f32.mrb[58].mxu0 }
0x150e   :  { %v3807_v0 = vpop.f32.mrb[59].mxu0 }
0x1510   :  { %v4112_v56 = vpop.eup %4111 }
0x1511   :  { %1774 = vst.msk [vmem:[#allocation4 + $0x18] sm:$0xf] %vm238_vm2, %v4112_v56  ;;  %v1775_v58 = vpack.c.bf16 %v4112_v56, %v4112_v56 }
0x1513   :  { %3797 = vmatmul.mubr.msk.bf16.vlgmr.msra.gmra.mrb[52].mxu1 %vm126_vm0, %v1775_v58 }
0x1514   :  { %3809 = vmatpush3.bf16.msra.mxu1 %v4723_v51  ;;  %3812 = vmatprep.mubr.msk.bf16.mxu1 %vm4192_vm1, %v4191_v1 }
0x1515   :  { %3810 = vmatprep.subr.bf16.mxu1 %v4191_v1 }
0x1518   :  { %3811 = vmatpush3.bf16.msra.mxu1 %v4733_v52 }
0x1519   :  { %3824 = vmatprep.subr.bf16.mxu1 %v4191_v1 }
0x151b   :  { %3813 = vmatmul.mubr.bf16.vlgmr.msra.gmra.mrb[56].mxu1 %v4193_v7  ;;  %v4756_v7 = vadd.f32 %v3358_v63, %v1907_v62 }
0x151c   :  { %3825 = vmatpush3.bf16.msra.mxu1 %v4723_v51  ;;  %3828 = vmatprep.mubr.msk.bf16.mxu1 %vm4192_vm1, %v4191_v1 }
0x151d   :  { %3826 = vmatprep.subr.bf16.mxu1 %v4191_v1 }
0x1520   :  { %3827 = vmatpush3.bf16.msra.mxu1 %v4733_v52 }
0x1521   :  { %3840 = vmatprep.subr.bf16.mxu1 %v4191_v1 }
0x15e6   :  { %v1813_v2 = vpop.f32.mrb[52].mxu1 }
0x15e7   :  { %v1820_v3 = vrot.slane %v1813_v2, 4  ;;  %v3798_v4 = vpop.f32.mrb[53].mxu1 }
0x15e8   :  { %v1816_v14 = vpop.f32.mrb[54].mxu1 }
0x15e9   :  { %v1822_v15 = vadd.f32 %v1820_v3, %v4603_v35  ;;  %v3799_v16 = vpop.f32.mrb[55].mxu1 }
0x15eb   :  { %4113 = vtanh.f32 %v1822_v15 }
0x15ee   :  { %v1957_v18 = vpop.f32.mrb[56].mxu1 }
0x15ef   :  { %v1963_v19 = vadd.f32 %v1957_v18, %v1905_v17  ;;  %v3814_v20 = vpop.f32.mrb[57].mxu1 }
0x15f0   :  { %v1960_v21 = vpop.f32.mrb[58].mxu1 }
0x15f1   :  { %4115 = vtanh.f32 %v1963_v19  ;;  %v3815_v22 = vpop.f32.mrb[59].mxu1 }
0x15f2   :  { %v4036_v22 = vld [vmem:[%s5033_s19] sm:$0xff]  }
0x15f5   :  { %v4114_v23 = vpop.eup %4113 }
0x15f6   :  { %1824 = vst.msk [vmem:[#allocation4 + $0x18] sm:$0xf0] %vm289_vm3, %v4114_v23  ;;  %v4037_v23 = vld [vmem:[%s5033_s19 + $0x8] sm:$0xff]  }
0x15fb   :  { %v4116_v24 = vpop.eup %4115 }
0x15fc   :  { %1966 = vst.msk [vmem:[#allocation5] sm:$0x3] %vm1965_vm6, %v4116_v24  ;;  %v1967_v25 = vpack.c.bf16 %v4116_v24, %v4116_v24  ;;  %v4821_v24 = vld [vmem:[%s5034_s20] sm:$0xff]  }
0x15fe   :  { %3821 = vmatmul.mubr.msk.bf16.vlgmr.msra.gmra.mrb[60].mxu0 %vm126_vm0, %v1967_v25  ;;  %v4039_v25 = vld [vmem:[%s5076_s13] sm:$0xff]  }
0x15ff   :  { %3833 = vmatpush3.bf16.msra.mxu0 %v4723_v51  ;;  %3836 = vmatprep.mubr.msk.bf16.mxu0 %vm4192_vm1, %v4191_v1 }
0x1600   :  { %3834 = vmatprep.subr.bf16.mxu0 %v4191_v1 }
0x1603   :  { %3835 = vmatpush3.bf16.msra.mxu0 %v4733_v52 }
0x1604   :  { %3848 = vmatprep.subr.bf16.mxu0 %v4191_v1 }
0x16d1   :  { %v2005_v35 = vpop.f32.mrb[60].mxu0 }
0x16d2   :  { %v2012_v26 = vrot.slane %v2005_v35, 6  ;;  %v3822_v27 = vpop.f32.mrb[61].mxu0  ;;  %v4833_v35 = vld [vmem:[%s5034_s20 + $0x8] sm:$0xff]  }
0x16d3   :  { %v2008_v28 = vpop.f32.mrb[62].mxu0 }
0x16d4   :  { %v2014_v29 = vadd.f32 %v2012_v26, %v1905_v17  ;;  %v3823_v32 = vpop.f32.mrb[63].mxu0 }
0x16d6   :  { %4117 = vtanh.f32 %v2014_v29 }
0x16e0   :  { %v4118_v13 = vpop.eup %4117 }
0x16e1   :  { %2017 = vst.msk [vmem:[#allocation5] sm:$0xc] %vm2016_vm7, %v4118_v13  ;;  %v2018_v33 = vpack.c.bf16 %v4118_v13, %v4118_v13 }
0x16e3   :  { %v2020_v34 = vrot.slane %v2018_v33, 1 }
0x16e5   :  { %3829 = vmatmul.mubr.msk.bf16.vlgmr.msra.gmra.mrb[60].mxu1 %vm126_vm0, %v2020_v34 }
0x16e6   :  { %3841 = vmatpush3.bf16.msra.mxu1 %v4723_v51  ;;  %3844 = vmatprep.mubr.msk.bf16.mxu1 %vm4192_vm1, %v4191_v1 }
0x16e7   :  { %3842 = vmatprep.subr.bf16.mxu1 %v4191_v1 }
0x16ea   :  { %3843 = vmatpush3.bf16.msra.mxu1 %v4733_v52 }
0x16eb   :  { %3856 = vmatprep.subr.bf16.mxu1 %v4191_v1 }
0x17b8   :  { %v2058_v36 = vpop.f32.mrb[60].mxu1 }
0x17b9   :  { %v2065_v37 = vrot.slane %v2058_v36, 4  ;;  %v3830_v38 = vpop.f32.mrb[61].mxu1 }
0x17ba   :  { %v2061_v39 = vpop.f32.mrb[62].mxu1 }
0x17bb   :  { %v2067_v40 = vadd.f32 %v2065_v37, %v1905_v17  ;;  %v3831_v41 = vpop.f32.mrb[63].mxu1 }
0x17bd   :  { %4119 = vtanh.f32 %v2067_v40 }
0x17c7   :  { %v4120_v42 = vpop.eup %4119 }
0x17c8   :  { %2070 = vst.msk [vmem:[#allocation5] sm:$0x30] %vm2069_vm8, %v4120_v42  ;;  %v2071_v43 = vpack.c.bf16 %v4120_v42, %v4120_v42 }
0x17ca   :  { %v2073_v44 = vrot.slane %v2071_v43, 2 }
0x17cc   :  { %3837 = vmatmul.mubr.msk.bf16.vlgmr.msra.gmra.mrb[64].mxu0 %vm126_vm0, %v2073_v44 }
0x17cd   :  { %3849 = vmatpush3.bf16.msra.mxu0 %v4723_v51  ;;  %3852 = vmatprep.mubr.msk.bf16.mxu0 %vm4192_vm1, %v4191_v1 }
0x17ce   :  { %3850 = vmatprep.subr.bf16.mxu0 %v4191_v1 }
0x17d1   :  { %3851 = vmatpush3.bf16.msra.mxu0 %v4733_v52 }
0x17d2   :  { %3864 = vmatprep.subr.bf16.mxu0 %v4191_v1 }
0x189f   :  { %v2111_v45 = vpop.f32.mrb[64].mxu0 }
0x18a0   :  { %v2118_v46 = vrot.slane %v2111_v45, 2  ;;  %v3838_v47 = vpop.f32.mrb[65].mxu0 }
0x18a1   :  { %v2114_v48 = vpop.f32.mrb[66].mxu0 }
0x18a2   :  { %v2120_v60 = vadd.f32 %v2118_v46, %v1905_v17  ;;  %v3839_v49 = vpop.f32.mrb[67].mxu0 }
0x18a4   :  { %4121 = vtanh.f32 %v2120_v60 }
0x18ae   :  { %v4122_v12 = vpop.eup %4121 }
0x18af   :  { %2123 = vst.msk [vmem:[#allocation5] sm:$0xc0] %vm2122_vm9, %v4122_v12  ;;  %v2124_v30 = vpack.c.bf16 %v4122_v12, %v4122_v12 }
0x18b1   :  { %v2126_v50 = vrot.slane %v2124_v30, 3 }
0x18b3   :  { %3845 = vmatmul.mubr.msk.bf16.vlgmr.msra.gmra.mrb[64].mxu1 %vm126_vm0, %v2126_v50 }
0x18b4   :  { %3857 = vmatpush3.bf16.msra.mxu1 %v4723_v51  ;;  %3860 = vmatprep.mubr.msk.bf16.mxu1 %vm4192_vm1, %v4191_v1 }
0x18b5   :  { %3858 = vmatprep.subr.bf16.mxu1 %v4191_v1 }
0x18b8   :  { %3859 = vmatpush3.bf16.msra.mxu1 %v4733_v52 }
0x18b9   :  { %3872 = vmatprep.subr.bf16.mxu1 %v4191_v1 }
0x1986   :  { %v2164_v11 = vpop.f32.mrb[64].mxu1 }
0x1987   :  { %v2170_v31 = vadd.f32 %v2164_v11, %v4756_v7  ;;  %v3846_v53 = vpop.f32.mrb[65].mxu1 }
0x1988   :  { %v2167_v54 = vpop.f32.mrb[66].mxu1 }
0x1989   :  { %4123 = vtanh.f32 %v2170_v31  ;;  %v3847_v55 = vpop.f32.mrb[67].mxu1 }
0x1993   :  { %v4124_v56 = vpop.eup %4123 }
0x1994   :  { %2172 = vst.msk [vmem:[#allocation5 + $0x8] sm:$0x3] %vm1965_vm6, %v4124_v56  ;;  %v2173_v58 = vpack.c.bf16 %v4124_v56, %v4124_v56 }
0x1996   :  { %3853 = vmatmul.mubr.msk.bf16.vlgmr.msra.gmra.mrb[68].mxu0 %vm126_vm0, %v2173_v58 }
0x1997   :  { %3865 = vmatpush3.bf16.msra.mxu0 %v4723_v51  ;;  %3868 = vmatprep.mubr.msk.bf16.mxu0 %vm4192_vm1, %v4191_v1 }
0x1998   :  { %3866 = vmatprep.subr.bf16.mxu0 %v4191_v1 }
0x199b   :  { %3867 = vmatpush3.bf16.msra.mxu0 %v4733_v52 }
0x199c   :  { %3880 = vmatprep.subr.bf16.mxu0 %v4191_v1 }
0x1a69   :  { %v2211_v59 = vpop.f32.mrb[68].mxu0 }
0x1a6a   :  { %v2218_v61 = vrot.slane %v2211_v59, 6  ;;  %v3854_v62 = vpop.f32.mrb[69].mxu0 }
0x1a6b   :  { %v2214_v63 = vpop.f32.mrb[70].mxu0 }
0x1a6c   :  { %v2220_v0 = vadd.f32 %v2218_v61, %v4756_v7  ;;  %v3855_v2 = vpop.f32.mrb[71].mxu0 }
0x1a6e   :  { %4125 = vtanh.f32 %v2220_v0 }
0x1a78   :  { %v4126_v3 = vpop.eup %4125 }
0x1a79   :  { %2222 = vst.msk [vmem:[#allocation5 + $0x8] sm:$0xc] %vm2016_vm7, %v4126_v3  ;;  %v2223_v51 = vpack.c.bf16 %v4126_v3, %v4126_v3 }
0x1a7b   :  { %v2225_v4 = vrot.slane %v2223_v51, 1 }
0x1a7d   :  { %3861 = vmatmul.mubr.msk.bf16.vlgmr.msra.gmra.mrb[68].mxu1 %vm126_vm0, %v2225_v4 }
0x1a7e   :  { %3876 = vmatprep.mubr.msk.bf16.mxu1 %vm4192_vm1, %v4191_v1  ;;  %3873 = vmatpush3.bf16.msra.mxu1 %v4036_v22 }
0x1a7f   :  { %3874 = vmatprep.subr.bf16.mxu1 %v4191_v1 }
0x1a82   :  { %3875 = vmatpush3.bf16.msra.mxu1 %v4037_v23 }
0x1a83   :  { %3888 = vmatprep.subr.bf16.mxu1 %v4191_v1 }
0x1a85   :  { %3877 = vmatmul.mubr.msk.bf16.vlgmr.msra.gmra.mrb[72].mxu1 %vm126_vm0, %v4039_v25 }
0x1a86   :  { %3889 = vmatpush3.bf16.msra.mxu1 %v4821_v24  ;;  %3892 = vmatprep.mubr.msk.bf16.mxu1 %vm4192_vm1, %v4191_v1 }
0x1a87   :  { %3890 = vmatprep.subr.bf16.mxu1 %v4191_v1 }
0x1a8a   :  { %3891 = vmatpush3.bf16.msra.mxu1 %v4833_v35 }
0x1a8b   :  { %3904 = vmatprep.subr.bf16.mxu1 %v4191_v1 }
0x1b50   :  { %v2263_v52 = vpop.f32.mrb[68].mxu1 }
0x1b51   :  { %v2270_v14 = vrot.slane %v2263_v52, 4  ;;  %v3862_v15 = vpop.f32.mrb[69].mxu1 }
0x1b52   :  { %v2266_v16 = vpop.f32.mrb[70].mxu1 }
0x1b53   :  { %v2272_v17 = vadd.f32 %v2270_v14, %v4756_v7  ;;  %v3863_v18 = vpop.f32.mrb[71].mxu1 }
0x1b55   :  { %4127 = vtanh.f32 %v2272_v17 }
0x1b58   :  { %v2400_v37 = vpop.f32.mrb[72].mxu1 }
0x1b59   :  { %v3878_v38 = vpop.f32.mrb[73].mxu1 }
0x1b5a   :  { %v2403_v39 = vpop.f32.mrb[74].mxu1 }
0x1b5b   :  { %v3879_v41 = vpop.f32.mrb[75].mxu1 }
0x1b5f   :  { %v4128_v19 = vpop.eup %4127 }
0x1b60   :  { %2274 = vst.msk [vmem:[#allocation5 + $0x8] sm:$0x30] %vm2069_vm8, %v4128_v19  ;;  %v2275_v20 = vpack.c.bf16 %v4128_v19, %v4128_v19 }
0x1b62   :  { %v2277_v21 = vrot.slane %v2275_v20, 2 }
0x1b64   :  { %3869 = vmatmul.mubr.msk.bf16.vlgmr.msra.gmra.mrb[72].mxu0 %vm126_vm0, %v2277_v21 }
0x1b65   :  { %3884 = vmatprep.mubr.msk.bf16.mxu0 %vm4192_vm1, %v4191_v1  ;;  %3881 = vmatpush3.bf16.msra.mxu0 %v4821_v24 }
0x1b66   :  { %3882 = vmatprep.subr.bf16.mxu0 %v4191_v1 }
0x1b69   :  { %3883 = vmatpush3.bf16.msra.mxu0 %v4833_v35 }
0x1b6a   :  { %3896 = vmatprep.subr.bf16.mxu0 %v4191_v1 }
0x1c37   :  { %v2315_v26 = vpop.f32.mrb[72].mxu0 }
0x1c38   :  { %v2322_v27 = vrot.slane %v2315_v26, 2  ;;  %v3870_v28 = vpop.f32.mrb[73].mxu0 }
0x1c39   :  { %v2318_v29 = vpop.f32.mrb[74].mxu0 }
0x1c3a   :  { %v2324_v32 = vadd.f32 %v2322_v27, %v4756_v7  ;;  %v3871_v13 = vpop.f32.mrb[75].mxu0  ;;  %v3372_v7 = vld [vmem:[%s5035_s21] ss:$0 sm:$0xff] }
0x1c3b   :  { %v4855_v40 = vadd.f32 %v3372_v7, %v2403_v39  ;;  %v2401_v42 = vadd.f32 %v3372_v7, %v2400_v37  ;;  %v2839_v37 = vsel %vm126_vm0, %v2831_v9, 0 }
0x1c3c   :  { %4129 = vtanh.f32 %v2324_v32 }
0x1c46   :  { %v4130_v33 = vpop.eup %4129 }
0x1c47   :  { %2326 = vst.msk [vmem:[#allocation5 + $0x8] sm:$0xc0] %vm2122_vm9, %v4130_v33  ;;  %v2407_v34 = vpack.c.bf16 %v4130_v33, %v4130_v33 }
0x1c49   :  { %v2409_v36 = vrot.slane %v2407_v34, 3 }
0x1c4b   :  { %3885 = vmatmul.mubr.msk.bf16.vlgmr.msra.gmra.mrb[76].mxu0 %vm126_vm0, %v2409_v36 }
0x1c4c   :  { %3897 = vmatpush3.bf16.msra.mxu0 %v4821_v24  ;;  %3900 = vmatprep.mubr.msk.bf16.mxu0 %vm4192_vm1, %v4191_v1 }
0x1c4d   :  { %3898 = vmatprep.subr.bf16.mxu0 %v4191_v1 }
0x1c50   :  { %3899 = vmatpush3.bf16.msra.mxu0 %v4833_v35 }
0x1c51   :  { %3912 = vmatprep.subr.bf16.mxu0 %v4191_v1 }
0x1d1e   :  { %v2459_v43 = vpop.f32.mrb[76].mxu0 }
0x1d1f   :  { %v2465_v44 = vadd.f32 %v2459_v43, %v2401_v42  ;;  %v3886_v45 = vpop.f32.mrb[77].mxu0  ;;  %v1826_v43 = vld [vmem:[#allocation4 + $0x8] sm:$0xff] }
0x1d20   :  { %v2462_v46 = vpop.f32.mrb[78].mxu0 }
0x1d21   :  { %4131 = vtanh.f32 %v2465_v44  ;;  %v3887_v47 = vpop.f32.mrb[79].mxu0  ;;  %v1827_v44 = vld [vmem:[#allocation4 + $0x10] sm:$0xff]  ;;  %v1825_v46 = vld [vmem:[#allocation4] sm:$0xff] }
0x1d22   :  { %v2906_v47 = vpack.c.bf16 %v1826_v43, %v1825_v46 }
0x1d2b   :  { %v4132_v48 = vpop.eup %4131 }
0x1d2c   :  { %2467 = vst.msk [vmem:[#allocation6] sm:$0x3] %vm1965_vm6, %v4132_v48  ;;  %v2468_v60 = vpack.c.bf16 %v4132_v48, %v4132_v48 }
0x1d2e   :  { %3893 = vmatmul.mubr.msk.bf16.vlgmr.msra.gmra.mrb[76].mxu1 %vm126_vm0, %v2468_v60  ;;  %v2911_v60 = vrot.slane %v2906_v47, 2 }
0x1d2f   :  { %3905 = vmatpush3.bf16.msra.mxu1 %v4821_v24  ;;  %3908 = vmatprep.mubr.msk.bf16.mxu1 %vm4192_vm1, %v4191_v1 }
0x1d30   :  { %3906 = vmatprep.subr.bf16.mxu1 %v4191_v1 }
0x1d33   :  { %3907 = vmatpush3.bf16.msra.mxu1 %v4833_v35 }
0x1d34   :  { %3920 = vmatprep.subr.bf16.mxu1 %v4191_v1 }
0x1e01   :  { %v2506_v49 = vpop.f32.mrb[76].mxu1 }
0x1e02   :  { %v2513_v12 = vrot.slane %v2506_v49, 6  ;;  %v3894_v30 = vpop.f32.mrb[77].mxu1 }
0x1e03   :  { %v2509_v50 = vpop.f32.mrb[78].mxu1 }
0x1e04   :  { %v2515_v11 = vadd.f32 %v2513_v12, %v2401_v42  ;;  %v3895_v31 = vpop.f32.mrb[79].mxu1 }
0x1e06   :  { %4133 = vtanh.f32 %v2515_v11 }
0x1e10   :  { %v4134_v53 = vpop.eup %4133 }
0x1e11   :  { %2517 = vst.msk [vmem:[#allocation6] sm:$0xc] %vm2016_vm7, %v4134_v53  ;;  %v2518_v54 = vpack.c.bf16 %v4134_v53, %v4134_v53 }
0x1e13   :  { %v2520_v55 = vrot.slane %v2518_v54, 1 }
0x1e15   :  { %3901 = vmatmul.mubr.msk.bf16.vlgmr.msra.gmra.mrb[80].mxu0 %vm126_vm0, %v2520_v55 }
0x1e16   :  { %3913 = vmatpush3.bf16.msra.mxu0 %v4821_v24  ;;  %3916 = vmatprep.mubr.msk.bf16.mxu0 %vm4192_vm1, %v4191_v1 }
0x1e17   :  { %3914 = vmatprep.subr.bf16.mxu0 %v4191_v1 }
0x1e1a   :  { %3915 = vmatpush3.bf16.msra.mxu0 %v4833_v35 }
0x1e1b   :  { %3928 = vmatprep.subr.bf16.mxu0 %v4191_v1 }
0x1ee8   :  { %v2558_v56 = vpop.f32.mrb[80].mxu0 }
0x1ee9   :  { %v2565_v58 = vrot.slane %v2558_v56, 4  ;;  %v3902_v59 = vpop.f32.mrb[81].mxu0  ;;  %v2328_v56 = vld [vmem:[#allocation5 + $0x8] sm:$0xff] }
0x1eea   :  { %v2561_v61 = vpop.f32.mrb[82].mxu0 }
0x1eeb   :  { %v2567_v62 = vadd.f32 %v2565_v58, %v2401_v42  ;;  %v3903_v63 = vpop.f32.mrb[83].mxu0 }
0x1eed   :  { %4135 = vtanh.f32 %v2567_v62  ;;  %v2327_v62 = vld [vmem:[#allocation5] sm:$0xff] }
0x1eee   :  { %v2965_v63 = vpack.c.bf16 %v2328_v56, %v2327_v62 }
0x1ef7   :  { %v4136_v0 = vpop.eup %4135 }
0x1ef8   :  { %2569 = vst.msk [vmem:[#allocation6] sm:$0x30] %vm2069_vm8, %v4136_v0  ;;  %v2570_v2 = vpack.c.bf16 %v4136_v0, %v4136_v0 }
0x1efa   :  { %v2572_v3 = vrot.slane %v2570_v2, 2  ;;  %v2828_v2 = vld [vmem:[%s5077_s3 + $0x8] sm:$0xff] }
0x1efc   :  { %3909 = vmatmul.mubr.msk.bf16.vlgmr.msra.gmra.mrb[80].mxu1 %vm126_vm0, %v2572_v3 }
0x1efd   :  { %3921 = vmatpush3.bf16.msra.mxu1 %v4821_v24  ;;  %3924 = vmatprep.mubr.msk.bf16.mxu1 %vm4192_vm1, %v4191_v1 }
0x1efe   :  { %3922 = vmatprep.subr.bf16.mxu1 %v4191_v1 }
0x1f01   :  { %3923 = vmatpush3.bf16.msra.mxu1 %v4833_v35 }
0x1f02   :  { %3936 = vmatprep.subr.bf16.mxu1 %v4191_v1 }
0x1fcf   :  { %v2610_v51 = vpop.f32.mrb[80].mxu1 }
0x1fd0   :  { %v2617_v4 = vrot.slane %v2610_v51, 2  ;;  %v3910_v52 = vpop.f32.mrb[81].mxu1 }
0x1fd1   :  { %v2613_v14 = vpop.f32.mrb[82].mxu1 }
0x1fd2   :  { %v2619_v15 = vadd.f32 %v2617_v4, %v2401_v42  ;;  %v3911_v16 = vpop.f32.mrb[83].mxu1  ;;  %v1828_v42 = vld [vmem:[#allocation4 + $0x18] sm:$0xff] }
0x1fd3   :  { %v2907_v45 = vpack.c.bf16 %v1828_v42, %v1827_v44  ;;  %v2964_v42 = vld [vmem:[%s5078_s2 + $0x8] sm:$0xff] }
0x1fd4   :  { %4137 = vtanh.f32 %v2619_v15 }
0x1fd5   :  { %v2912_v9 = vrot.slane %v2907_v45, 2 }
0x1fd7   :  { %v2913_v49 = vsel %vm2910_vm10, %v2911_v60, %v2912_v9  ;;  %v2920_v12 = vsel %vm2910_vm10, %v2912_v9, 0 }
0x1fde   :  { %v4138_v17 = vpop.eup %4137 }
0x1fdf   :  { %2621 = vst.msk [vmem:[#allocation6] sm:$0xc0] %vm2122_vm9, %v4138_v17  ;;  %v2622_v18 = vpack.c.bf16 %v4138_v17, %v4138_v17 }
0x1fe1   :  { %v2624_v19 = vrot.slane %v2622_v18, 3 }
0x1fe3   :  { %3917 = vmatmul.mubr.msk.bf16.vlgmr.msra.gmra.mrb[84].mxu0 %vm126_vm0, %v2624_v19 }
0x1fe4   :  { %3929 = vmatpush3.bf16.msra.mxu0 %v4821_v24  ;;  %3932 = vmatprep.mubr.msk.bf16.mxu0 %vm4192_vm1, %v4191_v1 }
0x1fe5   :  { %3930 = vmatprep.subr.bf16.mxu0 %v4191_v1 }
0x1fe6   :  { %v2825_v58 = vld [vmem:[#allocation6] sm:$0xff] }
0x1fe8   :  { %3931 = vmatpush3.bf16.msra.mxu0 %v4833_v35 }
0x1fe9   :  { %3944 = vmatprep.subr.bf16.mxu0 %v4191_v1 }
0x20b6   :  { %v2662_v20 = vpop.f32.mrb[84].mxu0 }
0x20b7   :  { %v2668_v21 = vadd.f32 %v2662_v20, %v4855_v40  ;;  %v3918_v22 = vpop.f32.mrb[85].mxu0 }
0x20b8   :  { %v2665_v23 = vpop.f32.mrb[86].mxu0 }
0x20b9   :  { %4139 = vtanh.f32 %v2668_v21  ;;  %v3919_v25 = vpop.f32.mrb[87].mxu0 }
0x20c3   :  { %v4140_v26 = vpop.eup %4139 }
0x20c4   :  { %2670 = vst.msk [vmem:[#allocation6 + $0x8] sm:$0x3] %vm1965_vm6, %v4140_v26  ;;  %v2671_v27 = vpack.c.bf16 %v4140_v26, %v4140_v26 }
0x20c6   :  { %3925 = vmatmul.mubr.msk.bf16.vlgmr.msra.gmra.mrb[84].mxu1 %vm126_vm0, %v2671_v27 }
0x20c7   :  { %3937 = vmatpush3.bf16.msra.mxu1 %v4821_v24  ;;  %3940 = vmatprep.mubr.msk.bf16.mxu1 %vm4192_vm1, %v4191_v1 }
0x20c8   :  { %3938 = vmatprep.subr.bf16.mxu1 %v4191_v1 }
0x20cb   :  { %3939 = vmatpush3.bf16.msra.mxu1 %v4833_v35  ;;  %v2836_v35 = vsel %vm126_vm0, %v2830_v10, 0 }
0x20cc   :  { %3952 = vmatprep.subr.bf16.mxu1 %v4191_v1 }
0x2199   :  { %v2709_v28 = vpop.f32.mrb[84].mxu1 }
0x219a   :  { %v2716_v29 = vrot.slane %v2709_v28, 6  ;;  %v3926_v32 = vpop.f32.mrb[85].mxu1 }
0x219b   :  { %v2712_v13 = vpop.f32.mrb[86].mxu1 }
0x219c   :  { %v2718_v33 = vadd.f32 %v2716_v29, %v4855_v40  ;;  %v3927_v34 = vpop.f32.mrb[87].mxu1 }
0x219e   :  { %4141 = vtanh.f32 %v2718_v33 }
0x21a8   :  { %v4142_v36 = vpop.eup %4141 }
0x21a9   :  { %2720 = vst.msk [vmem:[#allocation6 + $0x8] sm:$0xc] %vm2016_vm7, %v4142_v36  ;;  %v2721_v24 = vpack.c.bf16 %v4142_v36, %v4142_v36 }
0x21ab   :  { %v2723_v7 = vrot.slane %v2721_v24, 1  ;;  %v2967_v24 = vsel %vm126_vm0, %v2965_v63, 0 }
0x21ad   :  { %3933 = vmatmul.mubr.msk.bf16.vlgmr.msra.gmra.mrb[88].mxu0 %vm126_vm0, %v2723_v7  ;;  %v4041_v7 = vld [vmem:[%s5037_s23] sm:$0xff]  }
0x21ae   :  { %3945 = vmatpush3.bf16.xpose.msra.mxu0 %v2836_v35  ;;  %3948 = vmatprep.mubr.msk.bf16.mxu0 %vm4192_vm1, %v4191_v1  ;;  %v4042_v35 = vld [vmem:[%s5037_s23 + $0x8] sm:$0xff]  }
0x21af   :  { %3946 = vmatprep.subr.bf16.mxu0 %v4191_v1 }
0x21b6   :  { %3947 = vmatpush3.bf16.xpose.msra.mxu0 %v2839_v37 }
0x21b7   :  { %3966 = vmatprep.subr.bf16.mxu0 %v4191_v1 }
0x2280   :  { %v2761_v38 = vpop.f32.mrb[88].mxu0 }
0x2281   :  { %v2768_v39 = vrot.slane %v2761_v38, 4  ;;  %v3934_v41 = vpop.f32.mrb[89].mxu0 }
0x2282   :  { %v2764_v5 = vpop.f32.mrb[90].mxu0 }
0x2283   :  { %v2770_v8 = vadd.f32 %v2768_v39, %v4855_v40  ;;  %v3935_v10 = vpop.f32.mrb[91].mxu0 }
0x2285   :  { %4143 = vtanh.f32 %v2770_v8  ;;  %v2963_v8 = vld [vmem:[%s5078_s2] sm:$0xff] }
0x228f   :  { %v4144_v57 = vpop.eup %4143 }
0x2290   :  { %2772 = vst.msk [vmem:[#allocation6 + $0x8] sm:$0x30] %vm2069_vm8, %v4144_v57  ;;  %v2773_v6 = vpack.c.bf16 %v4144_v57, %v4144_v57 }
0x2292   :  { %v2775_v48 = vrot.slane %v2773_v6, 2 }
0x2294   :  { %3941 = vmatmul.mubr.msk.bf16.vlgmr.msra.gmra.mrb[88].mxu1 %vm126_vm0, %v2775_v48 }
0x2295   :  { %3953 = vmatpush3.bf16.msra.mxu1 %v2913_v49  ;;  %3956 = vmatprep.mubr.msk.bf16.mxu1 %vm4192_vm1, %v4191_v1 }
0x2296   :  { %3954 = vmatprep.subr.bf16.mxu1 %v4191_v1 }
0x2299   :  { %3955 = vmatpush3.bf16.msra.mxu1 %v2920_v12 }
0x229a   :  { %3960 = vmatprep.subr.bf16.mxu1 %v4191_v1 }
0x2367   :  { %v2813_v30 = vpop.f32.mrb[88].mxu1 }
0x2368   :  { %v2820_v50 = vrot.slane %v2813_v30, 2  ;;  %v3942_v11 = vpop.f32.mrb[89].mxu1 }
0x2369   :  { %v2816_v31 = vpop.f32.mrb[90].mxu1 }
0x236a   :  { %v2822_v53 = vadd.f32 %v2820_v50, %v4855_v40  ;;  %v3943_v54 = vpop.f32.mrb[91].mxu1  ;;  %v2827_v40 = vld [vmem:[%s5077_s3] sm:$0xff] }
0x236b   :  { %v4045_v54 = vld [vmem:[%s5038_s24] sm:$0xff]  }
0x236c   :  { %4145 = vtanh.f32 %v2822_v53 }
0x2376   :  { %v4146_v55 = vpop.eup %4145 }
0x2377   :  { %2824 = vst.msk [vmem:[#allocation6 + $0x8] sm:$0xc0] %vm2122_vm9, %v4146_v55 }
0x237e   :  { %v2826_v59 = vld [vmem:[#allocation6 + $0x8] sm:$0xff] }
0x237f   :  { %v4922_v61 = vpack.c.bf16 %v2826_v59, %v2825_v58 }
0x2381   :  { %3949 = vmatmul.mubr.msk.bf16.vlgmr.msra.gmra.mrb[92].mxu0 %vm126_vm0, %v4922_v61 }
0x2382   :  { %3967 = vmatpush3.bf16.msra.mxu0 %v2965_v63  ;;  %3968 = vmatprep.mubr.msk.bf16.mxu0 %vm4192_vm1, %v4191_v1 }
0x2383   :  { %3980 = vmatprep.subr.bf16.mxu0 %v4191_v1 }
0x2454   :  { %v2875_v0 = vpop.f32.mrb[92].mxu0 }
0x2455   :  { %v2876_v3 = vadd.f32 %v2875_v0, %v2827_v40  ;;  %v3950_v51 = vpop.f32.mrb[93].mxu0 }
0x2456   :  { %v2878_v4 = vpop.f32.mrb[94].mxu0  ;;  %v4043_v51 = vld [vmem:[%s5036_s22] sm:$0xff]  }
0x2457   :  { %v2879_v52 = vadd.f32 %v2878_v4, %v2828_v2  ;;  %v3951_v14 = vpop.f32.mrb[95].mxu0  ;;  %v2883_v15 = vsel %vm2882_vm11, %v2876_v3, -inf }
0x2458   :  { %2884 = vmax.xlane.f32.xlu0 %v2883_v15  ;;  %v4046_v14 = vld [vmem:[%s5038_s24 + $0x8] sm:$0xff]   ;;  %s4194_s24 = smov [#allocation7]  }
0x2459   :  { %v2886_v16 = vsel %vm2882_vm11, %v2879_v52, -inf  ;;  %s3279_s21 = sshll.u32 %s4194_s24, 4  ;;  %s3280_s21 = int_to_ptr.vmem [resolvable:$true] %s3279_s21 }
0x245a   :  { %2887 = vmax.xlane.f32.xlu1 %v2886_v16  ;;  %s4167_s14 = scalar_lea.vmem %s3280_s21, 256  ;;  %p4172_p1 = scmp.lt.s32.totalorder %s3280_s21, %s3280_s21 }
0x245b   :  { %p4168_p0 = scmp.ne.s32.totalorder %s3280_s21, %s4167_s14  ;;  %p4173_p2 = scmp.lt.s32.totalorder %s4167_s14, %s4167_s14 }
0x245d   :  { %p4174_p3 = por %p4173_p2, %p4172_p1 }
0x245f   :  { %p4175_p4 = pnand %p4174_p3, %p4168_p0 }
0x24e5   :  { %v2885_v17 = vpop.xlane.xlu0 %2884 }
0x24e6   :  { %v2889_v18 = vsub.f32 %v2876_v3, %v2885_v17 }
0x24e7   :  { %v2888_v19 = vpop.xlane.xlu1 %2887 }
0x24e8   :  { %v2891_v20 = vmul.f32 1.442695, %v2889_v18  ;;  %v2890_v21 = vsub.f32 %v2879_v52, %v2888_v19  ;;  %v4044_v52 = vld [vmem:[%s5036_s22 + $0x8] sm:$0xff]  }
0x24ea   :  { %4147 = vpow2.f32 %v2891_v20  ;;  %v2893_v22 = vmul.f32 1.442695, %v2890_v21 }
0x24ec   :  { %4149 = vpow2.f32 %v2893_v22 }
0x24f4   :  { %v4148_v23 = vpop.eup %4147 }
0x24f5   :  { %v2895_v25 = vsel %vm2882_vm11, %v4148_v23, 0.0 }
0x24f6   :  { %v4150_v26 = vpop.eup %4149  ;;  %2896 = vadd.xlane.f32.xlu0 %v2895_v25 }
0x24f7   :  { %v2898_v27 = vsel %vm2882_vm11, %v4150_v26, 0.0 }
0x24f8   :  { %2899 = vadd.xlane.f32.xlu1 %v2898_v27 }
0x2583   :  { %v2897_v28 = vpop.xlane.xlu0 %2896 }
0x2584   :  { %4151 = vrcp.f32 %v2897_v28 }
0x2585   :  { %v2900_v29 = vpop.xlane.xlu1 %2899 }
0x2586   :  { %4153 = vrcp.f32 %v2900_v29 }
0x258e   :  { %v4152_v32 = vpop.eup %4151 }
0x258f   :  { %v2903_v13 = vmul.f32 %v4152_v32, %v4148_v23 }
0x2590   :  { %v4154_v33 = vpop.eup %4153 }
0x2591   :  { %3078 = vst.msk [vmem:[%s5041_s27] sm:$0xff] %vm2882_vm11, %v2903_v13  ;;  %v2904_v34 = vmul.f32 %v4154_v33, %v4150_v26 }
0x2593   :  { %3079 = vst.msk [vmem:[%s5041_s27 + $0x8] sm:$0xff] %vm2882_vm11, %v2904_v34  ;;  %v2905_v36 = vpack.c.bf16 %v2904_v34, %v2903_v13 }
0x2595   :  { %3957 = vmatmul.mubr.msk.bf16.vlgmr.msra.gmra.mrb[92].mxu1 %vm2882_vm11, %v2905_v36 }
0x2596   :  { %3961 = vmatpush3.bf16.xpose.msra.mxu1 %v2967_v24  ;;  %3962 = vmatprep.mubr.msk.bf16.mxu1 %vm4192_vm1, %v4191_v1 }
0x2597   :  { %3972 = vmatprep.subr.bf16.mxu1 %v4191_v1 }
0x259d   :  { %3963 = vmatmul.mubr.msk.bf16.vlgmr.msra.gmra.mrb[96].mxu1 %vm126_vm0, %v4922_v61 }
0x259e   :  { %3973 = vmatpush3.bf16.msra.mxu1 %v4041_v7  ;;  %3976 = vmatprep.mubr.msk.bf16.mxu1 %vm4192_vm1, %v4191_v1 }
0x259f   :  { %3974 = vmatprep.subr.bf16.mxu1 %v4191_v1 }
0x25a2   :  { %3975 = vmatpush3.bf16.msra.mxu1 %v4042_v35 }
0x25a3   :  { %3988 = vmatprep.subr.bf16.mxu1 %v4191_v1 }
0x2668   :  { %v2956_v37 = vpop.f32.mrb[92].mxu1 }
0x2669   :  { %v3958_v38 = vpop.f32.mrb[93].mxu1 }
0x266a   :  { %v2959_v39 = vpop.f32.mrb[94].mxu1 }
0x266b   :  { %v3088_v41 = vpack.c.bf16 %v2959_v39, %v2956_v37  ;;  %v3959_v5 = vpop.f32.mrb[95].mxu1 }
0x266d   :  { %3977 = vmatmul.mubr.msk.bf16.vlgmr.msra.gmra.mrb[100].mxu1 %vm126_vm0, %v3088_v41 }
0x266e   :  { %3992 = vmatprep.mubr.msk.bf16.mxu1 %vm4192_vm1, %v4191_v1  ;;  %3989 = vmatpush3.bf16.msra.mxu1 %v4045_v54 }
0x266f   :  { %3990 = vmatprep.subr.bf16.mxu1 %v4191_v1 }
0x2670   :  { %v3003_v10 = vpop.f32.mrb[96].mxu1 }
0x2671   :  { %v3004_v43 = vadd.f32 %v3003_v10, %v2963_v8  ;;  %v3964_v44 = vpop.f32.mrb[97].mxu1 }
0x2672   :  { %v3006_v45 = vpop.f32.mrb[98].mxu1  ;;  %3991 = vmatpush3.bf16.msra.mxu1 %v4046_v14 }
0x2673   :  { %v3007_v46 = vadd.f32 %v3006_v45, %v2964_v42  ;;  %v3965_v47 = vpop.f32.mrb[99].mxu1  ;;  %v3011_v57 = vsel %vm3010_vm12, %v3004_v43, -inf }
0x2674   :  { %3012 = vmax.xlane.f32.xlu0 %v3011_v57 }
0x2675   :  { %v3014_v6 = vsel %vm3010_vm12, %v3007_v46, -inf }
0x2676   :  { %3015 = vmax.xlane.f32.xlu1 %v3014_v6 }
0x2701   :  { %v3013_v9 = vpop.xlane.xlu0 %3012 }
0x2702   :  { %v3017_v48 = vsub.f32 %v3004_v43, %v3013_v9 }
0x2703   :  { %v3016_v60 = vpop.xlane.xlu1 %3015 }
0x2704   :  { %v3019_v49 = vmul.f32 1.442695, %v3017_v48  ;;  %v3018_v12 = vsub.f32 %v3007_v46, %v3016_v60 }
0x2706   :  { %4155 = vpow2.f32 %v3019_v49  ;;  %v3021_v30 = vmul.f32 1.442695, %v3018_v12 }
0x2708   :  { %4157 = vpow2.f32 %v3021_v30 }
0x2710   :  { %v4156_v50 = vpop.eup %4155 }
0x2711   :  { %v3023_v11 = vsel %vm3010_vm12, %v4156_v50, 0.0 }
0x2712   :  { %v4158_v31 = vpop.eup %4157  ;;  %3024 = vadd.xlane.f32.xlu0 %v3023_v11 }
0x2713   :  { %v3026_v53 = vsel %vm3010_vm12, %v4158_v31, 0.0 }
0x2714   :  { %3027 = vadd.xlane.f32.xlu1 %v3026_v53 }
0x2740   :  { %v3138_v55 = vpop.f32.mrb[100].mxu1 }
0x2741   :  { %v3978_v56 = vpop.f32.mrb[101].mxu1 }
0x2742   :  { %v3141_v58 = vpop.f32.mrb[102].mxu1 }
0x2743   :  { %v3979_v59 = vpop.f32.mrb[103].mxu1 }
0x279f   :  { %v3025_v62 = vpop.xlane.xlu0 %3024 }
0x27a0   :  { %4159 = vrcp.f32 %v3025_v62 }
0x27a1   :  { %v3028_v63 = vpop.xlane.xlu1 %3027 }
0x27a2   :  { %4161 = vrcp.f32 %v3028_v63 }
0x27aa   :  { %v4160_v40 = vpop.eup %4159 }
0x27ab   :  { %v3031_v2 = vmul.f32 %v4160_v40, %v4156_v50 }
0x27ac   :  { %v4162_v0 = vpop.eup %4161 }
0x27ad   :  { %v3032_v3 = vmul.f32 %v4162_v0, %v4158_v31 }
0x27af   :  { %v3033_v4 = vpack.c.bf16 %v3032_v3, %v3031_v2 }
0x27b1   :  { %3969 = vmatmul.mubr.msk.bf16.vlgmr.msra.gmra.mrb[96].mxu0 %vm3010_vm12, %v3033_v4 }
0x27b2   :  { %3981 = vmatpush3.bf16.msra.mxu0 %v4043_v51  ;;  %3984 = vmatprep.mubr.msk.bf16.mxu0 %vm4192_vm1, %v4191_v1 }
0x27b3   :  { %3982 = vmatprep.subr.bf16.mxu0 %v4191_v1 }
0x27b6   :  { %3983 = vmatpush3.bf16.msra.mxu0 %v4044_v52 }
0x27b9   :  { %3985 = vmatmul.mubr.msk.bf16.vlgmr.msra.gmra.mrb[100].mxu0 %vm126_vm0, %v4922_v61  ;;  %v3400_v61 = vld [vmem:[%s5039_s25] ss:$0 sm:$0xff] }
0x2884   :  { %v3071_v15 = vpop.f32.mrb[96].mxu0 }
0x2885   :  { %v3970_v16 = vpop.f32.mrb[97].mxu0 }
0x2886   :  { %v3074_v17 = vpop.f32.mrb[98].mxu0 }
0x2887   :  { %v3202_v18 = vpack.c.bf16 %v3074_v17, %v3071_v15  ;;  %v3971_v19 = vpop.f32.mrb[99].mxu0 }
0x2889   :  { %3993 = vmatmul.mubr.msk.bf16.vlgmr.msra.gmra.mrb[104].mxu1 %vm126_vm0, %v3202_v18 }
0x288c   :  { %v3191_v20 = vpop.f32.mrb[100].mxu0 }
0x288d   :  { %v3192_v21 = vadd.f32 %v3191_v20, %v3138_v55  ;;  %v3986_v22 = vpop.f32.mrb[101].mxu0 }
0x288e   :  { %v3194_v1 = vpop.f32.mrb[102].mxu0 }
0x288f   :  { %v3195_v23 = vadd.f32 %v3194_v1, %v3141_v58  ;;  %v3987_v25 = vpop.f32.mrb[103].mxu0 }
0x295c   :  { %v3252_v26 = vpop.f32.mrb[104].mxu1 }
0x295d   :  { %v3259_v27 = vadd.f32 %v3252_v26, %v3192_v21  ;;  %v3994_v28 = vpop.f32.mrb[105].mxu1 }
0x295e   :  { %v3255_v29 = vpop.f32.mrb[106].mxu1 }
0x295f   :  { %v3268_v32 = vadd.f32 %v3400_v61, %v3259_v27  ;;  %v3260_v13 = vadd.f32 %v3255_v29, %v3195_v23  ;;  %v3995_v33 = vpop.f32.mrb[107].mxu1 }
0x2961   :  { %4163 = vtanh.f32 %v3268_v32  ;;  %v3269_v34 = vadd.f32 %v3400_v61, %v3260_v13 }
0x2963   :  { %4165 = vtanh.f32 %v3269_v34 }
0x296b   :  { %v4164_v36 = vpop.eup %4163 }
0x296c   :  { %3272 = vst.msk [vmem:[#allocation7] sm:$0xff] %vm126_vm0, %v4164_v36 }
0x296d   :  { %v4166_v24 = vpop.eup %4165 }
0x296e   :  { %3273 = vst.msk [vmem:[#allocation7 + $0x8] sm:$0xff] %vm126_vm0, %v4166_v24 }
0x296f   :  { %4178 = shalt.err (!%p4175_p4)
}
0x2970   :  { %s4179_s15 = scalar_lea.hbm %s5040_s26, 256 }
0x2971   :  { %p4180_p5 = scmp.ne.s32.totalorder %s5040_s26, %s4179_s15  ;;  %p4183_p6 = scmp.lt.u32.totalorder %s4179_s15, %s5040_s26 }
0x2973   :  { %p4185_p7 = pnand %p4183_p6, %p4180_p5 }
0x2975   :  { %4188 = shalt.err (!%p4185_p7)
}
0x2976   :  { %s4195_s9 = smov 128   ;;  %s4196_s16 = smov 8  }
0x2977   :  { %3285 = dma.vmem_to_hbm [thread:$0]  %s3280_s21, 256, %s5040_s26, [#allocation8], %s4195_s9, %s4195_s9, %s4196_s16  }
0x2978   :  { %4189 = dma.done.wait [#allocation8], 256  }
0x2979   :  { %4190 = vsyncadd [#allocation8], 4294967040 }
0x297a   :  { %3297 = vsyncpa [#allocation8], 1 }

</bundles_post_ra>
